<compile_context>
chip_gen: v5e
topology: v5e:2x2
jax: 0.10.0
libtpu: 0.0.40
codegen_flags: <defaults>
</compile_context>

<pallas_src>
import functools

import jax
import jax.numpy as jnp
from jax.experimental import pallas as pl

EPS = 1e-5    # PyTorch BatchNorm default eps
LANE = 128


def _round_up(x, m):
    return ((x + m - 1) // m) * m


# ----------------------------------------------------------------------------
# Fully fused kernel: whole sequence, statically unrolled
# ----------------------------------------------------------------------------

def _decoder_kernel(*refs, num_layers, seq_len):
    (enc_ref, emb_ref,
     enc_w_ref, enc_b_ref,
     dec_w_ref, dec_b_ref,
     bn1_s_ref, bn1_sh_ref, att_w1_ref, att_b1_ref,
     bn2_s_ref, bn2_sh_ref, att_w2_ref) = refs[:13]
    idx = 13
    lstm_refs = [tuple(refs[idx:idx + 4])]          # layer 0: w_att, w_emb, w_hh, b
    idx += 4
    for _ in range(1, num_layers):                  # layers > 0: w_x, w_hh, b
        lstm_refs.append(tuple(refs[idx:idx + 3]))
        idx += 3
    hw1_ref, hb1_ref, hw2_ref, hb2_ref = refs[idx:idx + 4]
    y_ref = refs[idx + 4]

    B, T, L, E = enc_ref.shape
    A = enc_w_ref.shape[1]
    Dp = dec_w_ref.shape[0]          # hidden width padded to a multiple of 128
    f32 = jnp.float32

    # ---- hoist all weight loads out of the unrolled time loop ----------------
    enc_w = enc_w_ref[...]; enc_b = enc_b_ref[...]
    dec_w = dec_w_ref[...]; dec_b = dec_b_ref[...]
    bn1_s = bn1_s_ref[...]; bn1_sh = bn1_sh_ref[...]
    att_w1 = att_w1_ref[...]; att_b1 = att_b1_ref[...]
    bn2_s = bn2_s_ref[...]; bn2_sh = bn2_sh_ref[...]
    att_w2 = att_w2_ref[...]
    lstm_w = [tuple(r[...] for r in layer) for layer in lstm_refs]
    hw1 = hw1_ref[...]; hb1 = hb1_ref[...]
    hw2 = hw2_ref[...]; hb2 = hb2_ref[...]

    enc_all = enc_ref[...]                                       # (B, T, L, E)
    emb_all = emb_ref[...]                                       # (T, B, EMB)

    # ---- encoder-attention projection hoisted out of the recurrence ----------
    enc_att_all = (jnp.dot(enc_all.reshape(B * T * L, E), enc_w,
                           preferred_element_type=f32) + enc_b
                   ).reshape(B, T, L, A)                         # (B, T, L, A)

    # ---- recurrent state (padding lanes >= D stay exactly 0 by construction) -
    h = [jnp.zeros((B, Dp), f32) for _ in range(num_layers)]
    c = [jnp.zeros((B, Dp), f32) for _ in range(num_layers)]

    for t in range(seq_len):                 # statically unrolled serial loop
        enc_out_t = enc_all[:, t]                                # (B, L, E)
        enc_att_t = enc_att_all[:, t]                            # (B, L, A)
        emb_t = emb_all[t]                                       # (B, EMB)

        # decoder attention on the layer-sum of h (bias pre-scaled by NL; exact)
        h_sum = h[0]
        for layer in range(1, num_layers):
            h_sum = h_sum + h[layer]
        dec_att = jnp.dot(h_sum, dec_w, preferred_element_type=f32) + dec_b

        # full_attention MLP (BN folded to scale/shift, dropout = identity)
        x = jnp.maximum(enc_att_t + dec_att[:, None, :], 0.0)    # ReLU
        x = x * bn1_s + bn1_sh                                   # BN1 (per loc)
        x = (jnp.dot(x.reshape(B * L, A), att_w1,
                     preferred_element_type=f32).reshape(B, L, A) + att_b1)
        x = jnp.maximum(x, 0.0)                                  # ReLU
        x = x * bn2_s + bn2_sh                                   # BN2 (per loc)
        # Linear(attention_dim -> 1) as a lane reduction; bias softmax-invariant
        s = jnp.sum(x * att_w2, axis=-1, keepdims=True)          # (B, L, 1)

        # softmax over locations (divide on the EUP slot) + attention pooling
        s_max = jnp.max(s, axis=1, keepdims=True)
        p = jnp.exp(s - s_max)
        denom = jnp.sum(p, axis=1, keepdims=True)
        alpha = p * pl.reciprocal(denom, approx=True)            # (B, L, 1)
        # TODO(synk): at production num_loc express pooling as an MXU einsum.
        att_out = jnp.sum(alpha * enc_out_t, axis=1)             # (B, E)

        # LSTM stack: separate dots summed (no lane-axis concats); gate blocks
        # padded to 128 lanes so the i/f/g/o slices are vreg-aligned.
        x_in = None
        for layer in range(num_layers):
            if layer == 0:
                w_att, w_emb, w_hh, b = lstm_w[0]
                gates = (jnp.dot(att_out, w_att, preferred_element_type=f32)
                         + jnp.dot(emb_t, w_emb, preferred_element_type=f32)
                         + jnp.dot(h[0], w_hh, preferred_element_type=f32)
                         + b)
            else:
                w_x, w_hh, b = lstm_w[layer]
                gates = (jnp.dot(x_in, w_x, preferred_element_type=f32)
                         + jnp.dot(h[layer], w_hh, preferred_element_type=f32)
                         + b)
            i_g = jax.nn.sigmoid(gates[:, 0 * Dp:1 * Dp])
            f_g = jax.nn.sigmoid(gates[:, 1 * Dp:2 * Dp])
            g_g = jnp.tanh(gates[:, 2 * Dp:3 * Dp])
            o_g = jax.nn.sigmoid(gates[:, 3 * Dp:4 * Dp])
            c_new = f_g * c[layer] + i_g * g_g
            h_new = o_g * jnp.tanh(c_new)
            h[layer] = h_new
            c[layer] = c_new
            x_in = h_new

        # merged fc_output heads (Linear -> ReLU -> [Dropout=id] -> Linear)
        hh = jnp.maximum(
            jnp.dot(x_in, hw1, preferred_element_type=f32) + hb1, 0.0)
        logits = jnp.dot(hh, hw2, preferred_element_type=f32) + hb2   # (B, P)
        y_ref[t] = logits        # lane-dense (P multiple of 128) VMEM store


# ----------------------------------------------------------------------------
# Parameter init (deterministic, synthetic)
# ----------------------------------------------------------------------------

def init_params(key, cfg):
    E, D, A = cfg['encoder_dim'], cfg['decoder_dim'], cfg['attention_dim']
    AD, L, NL = cfg['action_dim'], cfg['num_loc'], cfg['num_layers']
    y_keys_info = cfg['y_keys_info']

    keys = iter(jax.random.split(key, 128))

    def u(shape, fan_in):
        s = 1.0 / (fan_in ** 0.5)
        return jax.random.uniform(next(keys), shape, jnp.float32, -s, s)

    params = {
        'enc_att_w': u((E, A), E), 'enc_att_b': u((A,), E),
        'dec_att_w': u((D, A), D), 'dec_att_b': u((A,), D),
        'full_att': {
            'bn1_g': jnp.ones((L,), jnp.float32), 'bn1_b': jnp.zeros((L,), jnp.float32),
            'bn1_m': jnp.zeros((L,), jnp.float32), 'bn1_v': jnp.ones((L,), jnp.float32),
            'w1': u((A, A), A), 'b1': u((A,), A),
            'bn2_g': jnp.ones((L,), jnp.float32), 'bn2_b': jnp.zeros((L,), jnp.float32),
            'bn2_m': jnp.zeros((L,), jnp.float32), 'bn2_v': jnp.ones((L,), jnp.float32),
            'w2': u((A,), A), 'b2': u((1,), A),
        },
        'emb': {a: jax.random.normal(next(keys), (n, AD), jnp.float32)
                for a, n in y_keys_info.items()},
        'lstm': [],
        'fc': {},
    }
    in_dim = E + len(y_keys_info) * AD
    for layer in range(NL):
        il = in_dim if layer == 0 else D
        params['lstm'].append({
            'w_ih': u((il, 4 * D), D),
            'w_hh': u((D, 4 * D), D),
            'b': u((4 * D,), D),      # b_ih + b_hh fused
        })
    for a, n in y_keys_info.items():
        params['fc'][a] = {
            'w1': u((D, D), D), 'b1': u((D,), D),
            'w2': u((D, n), D), 'b2': u((n,), D),
        }
    return params


# ----------------------------------------------------------------------------
# Decoder.forward
# ----------------------------------------------------------------------------

def decoder_forward(params, encoder_outputs, actions, decoder_batch_size, seq_len, cfg):
    B, T = decoder_batch_size, seq_len
    E, D, A = cfg['encoder_dim'], cfg['decoder_dim'], cfg['attention_dim']
    AD, L, NL = cfg['action_dim'], cfg['num_loc'], cfg['num_layers']
    y_keys_info = cfg['y_keys_info']
    action_keys = list(y_keys_info.keys())
    NH = len(action_keys)
    EMB = NH * AD
    NTOT = sum(y_keys_info.values())
    Dp = _round_up(D, LANE)      # padded hidden width -> vreg-aligned gate slices
    P = _round_up(NTOT, LANE)    # lane-dense merged-head output width

    # ---- embedding gather (JAX glue) — matches torch.stack(dim=3).view -------
    embs = jnp.stack([params['emb'][a][actions[a]] for a in action_keys], axis=3)
    actions_embs = embs.reshape(B, T + 1, EMB)
    emb_seq = jnp.transpose(actions_embs[:, :T], (1, 0, 2))      # (T, B, EMB)

    # ---- fold eval-mode BatchNorm1d(num_loc) to per-location scale/shift -----
    fa = params['full_att']
    bn1_s = (fa['bn1_g'] * jax.lax.rsqrt(fa['bn1_v'] + EPS)).reshape(1, L, 1)
    bn1_sh = (fa['bn1_b'] - fa['bn1_m'] * bn1_s[0, :, 0]).reshape(1, L, 1)
    bn2_s = (fa['bn2_g'] * jax.lax.rsqrt(fa['bn2_v'] + EPS)).reshape(1, L, 1)
    bn2_sh = (fa['bn2_b'] - fa['bn2_m'] * bn2_s[0, :, 0]).reshape(1, L, 1)

    enc_b = params['enc_att_b'].reshape(1, A)
    dec_w = jnp.pad(params['dec_att_w'], ((0, Dp - D), (0, 0)))   # (Dp, A)
    dec_b = (params['dec_att_b'] * float(NL)).reshape(1, A)       # bias * NL
    att_b1 = fa['b1'].reshape(1, 1, A)
    att_w2 = fa['w2'].reshape(1, 1, A)                            # b2 dropped

    # ---- LSTM weights: split per input source, gate blocks zero-padded to Dp -
    def pad_gate_cols(w):
        k = w.shape[0]
        return jnp.pad(w.reshape(k, 4, D),
                       ((0, 0), (0, 0), (0, Dp - D))).reshape(k, 4 * Dp)

    def pad_rows(w):
        return jnp.pad(w, ((0, Dp - w.shape[0]), (0, 0)))

    lstm_flat = []
    for layer in range(NL):
        lw = params['lstm'][layer]
        b = jnp.pad(lw['b'].reshape(4, D), ((0, 0), (0, Dp - D))).reshape(1, 4 * Dp)
        w_hh = pad_rows(pad_gate_cols(lw['w_hh']))
        if layer == 0:
            w_att = pad_gate_cols(lw['w_ih'][:E])     # attention-output rows
            w_emb = pad_gate_cols(lw['w_ih'][E:])     # embedding rows
            lstm_flat += [w_att, w_emb, w_hh, b]
        else:
            w_x = pad_rows(pad_gate_cols(lw['w_ih']))
            lstm_flat += [w_x, w_hh, b]

    # ---- merged + lane-padded action heads ------------------------------------
    head_w1 = pad_rows(jnp.concatenate([params['fc'][a]['w1'] for a in action_keys],
                                       axis=1))                   # (Dp, NH*D)
    head_b1 = jnp.concatenate([params['fc'][a]['b1'] for a in action_keys]
                              ).reshape(1, NH * D)
    head_w2 = jnp.zeros((NH * D, P), jnp.float32)
    head_b2 = jnp.zeros((1, P), jnp.float32)
    off = 0
    for i, a in enumerate(action_keys):
        n = y_keys_info[a]
        head_w2 = head_w2.at[i * D:(i + 1) * D, off:off + n].set(params['fc'][a]['w2'])
        head_b2 = head_b2.at[0, off:off + n].set(params['fc'][a]['b2'])
        off += n

    # ---- single (grid-less) fused pallas_call ----------------------------------
    y_all = pl.pallas_call(
        functools.partial(_decoder_kernel, num_layers=NL, seq_len=T),
        out_shape=jax.ShapeDtypeStruct((T, B, P), jnp.float32),
    )(encoder_outputs, emb_seq,
      params['enc_att_w'], enc_b,
      dec_w, dec_b,
      bn1_s, bn1_sh, fa['w1'], att_b1, bn2_s, bn2_sh, att_w2,
      *lstm_flat,
      head_w1, head_b1, head_w2, head_b2)

    # ---- split merged heads, produce (B, num_class, T) per action -------------
    y = {}
    off = 0
    for a in action_keys:
        n = y_keys_info[a]
        y[a] = jnp.transpose(y_all[:, :, off:off + n], (1, 2, 0))   # (B, n, T)
        off += n
    return y


# ----------------------------------------------------------------------------
# Driver
# ----------------------------------------------------------------------------

if __name__ == "__main__":
    cfg = dict(
        encoder_dim=16,
        decoder_dim=32,
        attention_dim=16,
        action_dim=8,
        num_loc=8,
        num_layers=2,
        y_keys_info={'steer': 5, 'accel': 7},
    )
    B, T = 2, 4

    root = jax.random.PRNGKey(0)
    k_params, k_enc, k_act = jax.random.split(root, 3)

    params = init_params(k_params, cfg)

    encoder_outputs = jax.random.normal(
        k_enc, (B, T, cfg['num_loc'], cfg['encoder_dim']), jnp.float32)

    act_keys = jax.random.split(k_act, len(cfg['y_keys_info']))
    actions = {
        a: jax.random.randint(act_keys[j], (B, T + 1), 0, n, dtype=jnp.int32)
        for j, (a, n) in enumerate(cfg['y_keys_info'].items())
    }

    y = decoder_forward(params, encoder_outputs, actions, B, T, cfg)
    y = jax.block_until_ready(y)

    for a, n in cfg['y_keys_info'].items():
        assert y[a].shape == (B, n, T), (a, y[a].shape)
        assert bool(jnp.all(jnp.isfinite(y[a])))

    print("KERNEL_OK")
</pallas_src>

<mosaic_0001>
module attributes {stable_mosaic.version = 11 : i64} {
  func.func @_decoder_kernel(%arg0: memref<2x4x8x16xf32, #tpu.memory_space<vmem>>, %arg1: memref<4x2x16xf32, #tpu.memory_space<vmem>>, %arg2: memref<16x16xf32, #tpu.memory_space<vmem>>, %arg3: memref<1x16xf32, #tpu.memory_space<vmem>>, %arg4: memref<128x16xf32, #tpu.memory_space<vmem>>, %arg5: memref<1x16xf32, #tpu.memory_space<vmem>>, %arg6: memref<1x8x1xf32, #tpu.memory_space<vmem>>, %arg7: memref<1x8x1xf32, #tpu.memory_space<vmem>>, %arg8: memref<16x16xf32, #tpu.memory_space<vmem>>, %arg9: memref<1x1x16xf32, #tpu.memory_space<vmem>>, %arg10: memref<1x8x1xf32, #tpu.memory_space<vmem>>, %arg11: memref<1x8x1xf32, #tpu.memory_space<vmem>>, %arg12: memref<1x1x16xf32, #tpu.memory_space<vmem>>, %arg13: memref<16x512xf32, #tpu.memory_space<vmem>>, %arg14: memref<16x512xf32, #tpu.memory_space<vmem>>, %arg15: memref<128x512xf32, #tpu.memory_space<vmem>>, %arg16: memref<1x512xf32, #tpu.memory_space<vmem>>, %arg17: memref<128x512xf32, #tpu.memory_space<vmem>>, %arg18: memref<128x512xf32, #tpu.memory_space<vmem>>, %arg19: memref<1x512xf32, #tpu.memory_space<vmem>>, %arg20: memref<128x64xf32, #tpu.memory_space<vmem>>, %arg21: memref<1x64xf32, #tpu.memory_space<vmem>>, %arg22: memref<64x128xf32, #tpu.memory_space<vmem>>, %arg23: memref<1x128xf32, #tpu.memory_space<vmem>>, %arg24: memref<4x2x128xf32, #tpu.memory_space<vmem>>) attributes {dimension_semantics = [], scalar_prefetch = 0 : i64, scratch_operands = 0 : i64, tpu.core_type = #tpu.core_type<tc>} {
    %c0 = arith.constant 0 : index
    %c0_0 = arith.constant 0 : index
    %0 = vector.load %arg2[%c0, %c0_0] : memref<16x16xf32, #tpu.memory_space<vmem>>, vector<16x16xf32>
    %c0_1 = arith.constant 0 : index
    %c0_2 = arith.constant 0 : index
    %1 = vector.load %arg3[%c0_1, %c0_2] : memref<1x16xf32, #tpu.memory_space<vmem>>, vector<1x16xf32>
    %c0_3 = arith.constant 0 : index
    %c0_4 = arith.constant 0 : index
    %2 = vector.load %arg4[%c0_3, %c0_4] : memref<128x16xf32, #tpu.memory_space<vmem>>, vector<128x16xf32>
    %c0_5 = arith.constant 0 : index
    %c0_6 = arith.constant 0 : index
    %3 = vector.load %arg5[%c0_5, %c0_6] : memref<1x16xf32, #tpu.memory_space<vmem>>, vector<1x16xf32>
    %c0_7 = arith.constant 0 : index
    %c0_8 = arith.constant 0 : index
    %c0_9 = arith.constant 0 : index
    %4 = vector.load %arg6[%c0_7, %c0_8, %c0_9] : memref<1x8x1xf32, #tpu.memory_space<vmem>>, vector<1x8x1xf32>
    %c0_10 = arith.constant 0 : index
    %c0_11 = arith.constant 0 : index
    %c0_12 = arith.constant 0 : index
    %5 = vector.load %arg7[%c0_10, %c0_11, %c0_12] : memref<1x8x1xf32, #tpu.memory_space<vmem>>, vector<1x8x1xf32>
    %c0_13 = arith.constant 0 : index
    %c0_14 = arith.constant 0 : index
    %6 = vector.load %arg8[%c0_13, %c0_14] : memref<16x16xf32, #tpu.memory_space<vmem>>, vector<16x16xf32>
    %c0_15 = arith.constant 0 : index
    %c0_16 = arith.constant 0 : index
    %c0_17 = arith.constant 0 : index
    %7 = vector.load %arg9[%c0_15, %c0_16, %c0_17] : memref<1x1x16xf32, #tpu.memory_space<vmem>>, vector<1x1x16xf32>
    %c0_18 = arith.constant 0 : index
    %c0_19 = arith.constant 0 : index
    %c0_20 = arith.constant 0 : index
    %8 = vector.load %arg10[%c0_18, %c0_19, %c0_20] : memref<1x8x1xf32, #tpu.memory_space<vmem>>, vector<1x8x1xf32>
    %c0_21 = arith.constant 0 : index
    %c0_22 = arith.constant 0 : index
    %c0_23 = arith.constant 0 : index
    %9 = vector.load %arg11[%c0_21, %c0_22, %c0_23] : memref<1x8x1xf32, #tpu.memory_space<vmem>>, vector<1x8x1xf32>
    %c0_24 = arith.constant 0 : index
    %c0_25 = arith.constant 0 : index
    %c0_26 = arith.constant 0 : index
    %10 = vector.load %arg12[%c0_24, %c0_25, %c0_26] : memref<1x1x16xf32, #tpu.memory_space<vmem>>, vector<1x1x16xf32>
    %c0_27 = arith.constant 0 : index
    %c0_28 = arith.constant 0 : index
    %11 = vector.load %arg13[%c0_27, %c0_28] : memref<16x512xf32, #tpu.memory_space<vmem>>, vector<16x512xf32>
    %c0_29 = arith.constant 0 : index
    %c0_30 = arith.constant 0 : index
    %12 = vector.load %arg14[%c0_29, %c0_30] : memref<16x512xf32, #tpu.memory_space<vmem>>, vector<16x512xf32>
    %c0_31 = arith.constant 0 : index
    %c0_32 = arith.constant 0 : index
    %13 = vector.load %arg15[%c0_31, %c0_32] : memref<128x512xf32, #tpu.memory_space<vmem>>, vector<128x512xf32>
    %c0_33 = arith.constant 0 : index
    %c0_34 = arith.constant 0 : index
    %14 = vector.load %arg16[%c0_33, %c0_34] : memref<1x512xf32, #tpu.memory_space<vmem>>, vector<1x512xf32>
    %c0_35 = arith.constant 0 : index
    %c0_36 = arith.constant 0 : index
    %15 = vector.load %arg17[%c0_35, %c0_36] : memref<128x512xf32, #tpu.memory_space<vmem>>, vector<128x512xf32>
    %c0_37 = arith.constant 0 : index
    %c0_38 = arith.constant 0 : index
    %16 = vector.load %arg18[%c0_37, %c0_38] : memref<128x512xf32, #tpu.memory_space<vmem>>, vector<128x512xf32>
    %c0_39 = arith.constant 0 : index
    %c0_40 = arith.constant 0 : index
    %17 = vector.load %arg19[%c0_39, %c0_40] : memref<1x512xf32, #tpu.memory_space<vmem>>, vector<1x512xf32>
    %c0_41 = arith.constant 0 : index
    %c0_42 = arith.constant 0 : index
    %18 = vector.load %arg20[%c0_41, %c0_42] : memref<128x64xf32, #tpu.memory_space<vmem>>, vector<128x64xf32>
    %c0_43 = arith.constant 0 : index
    %c0_44 = arith.constant 0 : index
    %19 = vector.load %arg21[%c0_43, %c0_44] : memref<1x64xf32, #tpu.memory_space<vmem>>, vector<1x64xf32>
    %c0_45 = arith.constant 0 : index
    %c0_46 = arith.constant 0 : index
    %20 = vector.load %arg22[%c0_45, %c0_46] : memref<64x128xf32, #tpu.memory_space<vmem>>, vector<64x128xf32>
    %c0_47 = arith.constant 0 : index
    %c0_48 = arith.constant 0 : index
    %21 = vector.load %arg23[%c0_47, %c0_48] : memref<1x128xf32, #tpu.memory_space<vmem>>, vector<1x128xf32>
    %c0_49 = arith.constant 0 : index
    %c0_50 = arith.constant 0 : index
    %c0_51 = arith.constant 0 : index
    %c0_52 = arith.constant 0 : index
    %22 = vector.load %arg0[%c0_49, %c0_50, %c0_51, %c0_52] : memref<2x4x8x16xf32, #tpu.memory_space<vmem>>, vector<2x4x8x16xf32>
    %c0_53 = arith.constant 0 : index
    %c0_54 = arith.constant 0 : index
    %c0_55 = arith.constant 0 : index
    %23 = vector.load %arg1[%c0_53, %c0_54, %c0_55] : memref<4x2x16xf32, #tpu.memory_space<vmem>>, vector<4x2x16xf32>
    %24 = vector.shape_cast %22 : vector<2x4x8x16xf32> to vector<64x16xf32>
    %cst = arith.constant dense<0.000000e+00> : vector<64x16xf32>
    %25 = tpu.matmul %24, %0, %cst {dimension_numbers = #tpu.dot_dimension_numbers<[1], [0], [0], [1], [0, 0, 1, 1], [], []>} : vector<64x16xf32>, vector<16x16xf32>, vector<64x16xf32> -> vector<64x16xf32>
    %26 = vector.broadcast %1 : vector<1x16xf32> to vector<64x16xf32>
    %27 = arith.addf %25, %26 : vector<64x16xf32>
    %28 = vector.shape_cast %27 : vector<64x16xf32> to vector<2x4x8x16xf32>
    %cst_56 = arith.constant 0.000000e+00 : f32
    %29 = vector.broadcast %cst_56 : f32 to vector<2x128xf32>
    %cst_57 = arith.constant 0.000000e+00 : f32
    %30 = vector.broadcast %cst_57 : f32 to vector<2x128xf32>
    %cst_58 = arith.constant 0.000000e+00 : f32
    %31 = vector.broadcast %cst_58 : f32 to vector<2x128xf32>
    %cst_59 = arith.constant 0.000000e+00 : f32
    %32 = vector.broadcast %cst_59 : f32 to vector<2x128xf32>
    %33 = vector.extract_strided_slice %22 {offsets = [0, 0, 0, 0], sizes = [2, 1, 8, 16], strides = [1, 1, 1, 1]} : vector<2x4x8x16xf32> to vector<2x1x8x16xf32>
    %34 = vector.shape_cast %33 : vector<2x1x8x16xf32> to vector<2x8x16xf32>
    %35 = vector.extract_strided_slice %28 {offsets = [0, 0, 0, 0], sizes = [2, 1, 8, 16], strides = [1, 1, 1, 1]} : vector<2x4x8x16xf32> to vector<2x1x8x16xf32>
    %36 = vector.shape_cast %35 : vector<2x1x8x16xf32> to vector<2x8x16xf32>
    %37 = vector.extract_strided_slice %23 {offsets = [0, 0, 0], sizes = [1, 2, 16], strides = [1, 1, 1]} : vector<4x2x16xf32> to vector<1x2x16xf32>
    %38 = vector.shape_cast %37 : vector<1x2x16xf32> to vector<2x16xf32>
    %39 = arith.addf %29, %30 : vector<2x128xf32>
    %cst_60 = arith.constant dense<0.000000e+00> : vector<2x16xf32>
    %40 = tpu.matmul %39, %2, %cst_60 {dimension_numbers = #tpu.dot_dimension_numbers<[1], [0], [0], [1], [0, 0, 1, 1], [], []>} : vector<2x128xf32>, vector<128x16xf32>, vector<2x16xf32> -> vector<2x16xf32>
    %41 = vector.broadcast %3 : vector<1x16xf32> to vector<2x16xf32>
    %42 = arith.addf %40, %41 : vector<2x16xf32>
    %43 = vector.shape_cast %42 : vector<2x16xf32> to vector<2x1x16xf32>
    %44 = vector.broadcast %43 : vector<2x1x16xf32> to vector<2x8x16xf32>
    %45 = arith.addf %36, %44 : vector<2x8x16xf32>
    %cst_61 = arith.constant 0.000000e+00 : f32
    %46 = vector.broadcast %cst_61 : f32 to vector<2x8x16xf32>
    %47 = arith.maximumf %45, %46 : vector<2x8x16xf32>
    %48 = vector.broadcast %4 : vector<1x8x1xf32> to vector<2x8x16xf32>
    %49 = arith.mulf %47, %48 : vector<2x8x16xf32>
    %50 = vector.broadcast %5 : vector<1x8x1xf32> to vector<2x8x16xf32>
    %51 = arith.addf %49, %50 : vector<2x8x16xf32>
    %52 = vector.shape_cast %51 : vector<2x8x16xf32> to vector<16x16xf32>
    %cst_62 = arith.constant dense<0.000000e+00> : vector<16x16xf32>
    %53 = tpu.matmul %52, %6, %cst_62 {dimension_numbers = #tpu.dot_dimension_numbers<[1], [0], [0], [1], [0, 0, 1, 1], [], []>} : vector<16x16xf32>, vector<16x16xf32>, vector<16x16xf32> -> vector<16x16xf32>
    %54 = vector.shape_cast %53 : vector<16x16xf32> to vector<2x8x16xf32>
    %55 = vector.broadcast %7 : vector<1x1x16xf32> to vector<2x8x16xf32>
    %56 = arith.addf %54, %55 : vector<2x8x16xf32>
    %cst_63 = arith.constant 0.000000e+00 : f32
    %57 = vector.broadcast %cst_63 : f32 to vector<2x8x16xf32>
    %58 = arith.maximumf %56, %57 : vector<2x8x16xf32>
    %59 = vector.broadcast %8 : vector<1x8x1xf32> to vector<2x8x16xf32>
    %60 = arith.mulf %58, %59 : vector<2x8x16xf32>
    %61 = vector.broadcast %9 : vector<1x8x1xf32> to vector<2x8x16xf32>
    %62 = arith.addf %60, %61 : vector<2x8x16xf32>
    %63 = vector.broadcast %10 : vector<1x1x16xf32> to vector<2x8x16xf32>
    %64 = arith.mulf %62, %63 : vector<2x8x16xf32>
    %cst_64 = arith.constant dense<0.000000e+00> : vector<2x8xf32>
    %65 = vector.multi_reduction <add>, %64, %cst_64 [2] : vector<2x8x16xf32> to vector<2x8xf32>
    %66 = vector.shape_cast %65 : vector<2x8xf32> to vector<2x8x1xf32>
    %cst_65 = arith.constant dense<0xFF800000> : vector<2x1xf32>
    %67 = vector.multi_reduction <maximumf>, %66, %cst_65 [1] : vector<2x8x1xf32> to vector<2x1xf32>
    %68 = vector.shape_cast %67 : vector<2x1xf32> to vector<2x1x1xf32>
    %69 = vector.broadcast %68 : vector<2x1x1xf32> to vector<2x8x1xf32>
    %70 = arith.subf %66, %69 : vector<2x8x1xf32>
    %71 = math.exp %70 : vector<2x8x1xf32>
    %cst_66 = arith.constant dense<0.000000e+00> : vector<2x1xf32>
    %72 = vector.multi_reduction <add>, %71, %cst_66 [1] : vector<2x8x1xf32> to vector<2x1xf32>
    %73 = vector.shape_cast %72 : vector<2x1xf32> to vector<2x1x1xf32>
    %74 = tpu.reciprocal %73 {approx = true} : vector<2x1x1xf32> -> vector<2x1x1xf32>
    %75 = vector.broadcast %74 : vector<2x1x1xf32> to vector<2x8x1xf32>
    %76 = arith.mulf %71, %75 : vector<2x8x1xf32>
    %77 = vector.broadcast %76 : vector<2x8x1xf32> to vector<2x8x16xf32>
    %78 = arith.mulf %77, %34 : vector<2x8x16xf32>
    %cst_67 = arith.constant dense<0.000000e+00> : vector<2x16xf32>
    %79 = vector.multi_reduction <add>, %78, %cst_67 [1] : vector<2x8x16xf32> to vector<2x16xf32>
    %cst_68 = arith.constant dense<0.000000e+00> : vector<2x512xf32>
    %80 = tpu.matmul %79, %11, %cst_68 {dimension_numbers = #tpu.dot_dimension_numbers<[1], [0], [0], [1], [0, 0, 1, 1], [], []>} : vector<2x16xf32>, vector<16x512xf32>, vector<2x512xf32> -> vector<2x512xf32>
    %cst_69 = arith.constant dense<0.000000e+00> : vector<2x512xf32>
    %81 = tpu.matmul %38, %12, %cst_69 {dimension_numbers = #tpu.dot_dimension_numbers<[1], [0], [0], [1], [0, 0, 1, 1], [], []>} : vector<2x16xf32>, vector<16x512xf32>, vector<2x512xf32> -> vector<2x512xf32>
    %82 = arith.addf %80, %81 : vector<2x512xf32>
    %cst_70 = arith.constant dense<0.000000e+00> : vector<2x512xf32>
    %83 = tpu.matmul %29, %13, %cst_70 {dimension_numbers = #tpu.dot_dimension_numbers<[1], [0], [0], [1], [0, 0, 1, 1], [], []>} : vector<2x128xf32>, vector<128x512xf32>, vector<2x512xf32> -> vector<2x512xf32>
    %84 = arith.addf %82, %83 : vector<2x512xf32>
    %85 = vector.broadcast %14 : vector<1x512xf32> to vector<2x512xf32>
    %86 = arith.addf %84, %85 : vector<2x512xf32>
    %87 = vector.extract_strided_slice %86 {offsets = [0, 0], sizes = [2, 128], strides = [1, 1]} : vector<2x512xf32> to vector<2x128xf32>
    %88 = arith.negf %87 : vector<2x128xf32>
    %89 = math.exp %88 : vector<2x128xf32>
    %cst_71 = arith.constant 1.000000e+00 : f32
    %90 = vector.broadcast %cst_71 : f32 to vector<2x128xf32>
    %91 = arith.addf %90, %89 : vector<2x128xf32>
    %92 = arith.divf %90, %91 : vector<2x128xf32>
    %93 = vector.extract_strided_slice %86 {offsets = [0, 128], sizes = [2, 128], strides = [1, 1]} : vector<2x512xf32> to vector<2x128xf32>
    %94 = arith.negf %93 : vector<2x128xf32>
    %95 = math.exp %94 : vector<2x128xf32>
    %cst_72 = arith.constant 1.000000e+00 : f32
    %96 = vector.broadcast %cst_72 : f32 to vector<2x128xf32>
    %97 = arith.addf %96, %95 : vector<2x128xf32>
    %98 = arith.divf %96, %97 : vector<2x128xf32>
    %99 = vector.extract_strided_slice %86 {offsets = [0, 256], sizes = [2, 128], strides = [1, 1]} : vector<2x512xf32> to vector<2x128xf32>
    %100 = math.tanh %99 : vector<2x128xf32>
    %101 = vector.extract_strided_slice %86 {offsets = [0, 384], sizes = [2, 128], strides = [1, 1]} : vector<2x512xf32> to vector<2x128xf32>
    %102 = arith.negf %101 : vector<2x128xf32>
    %103 = math.exp %102 : vector<2x128xf32>
    %cst_73 = arith.constant 1.000000e+00 : f32
    %104 = vector.broadcast %cst_73 : f32 to vector<2x128xf32>
    %105 = arith.addf %104, %103 : vector<2x128xf32>
    %106 = arith.divf %104, %105 : vector<2x128xf32>
    %107 = arith.mulf %98, %31 : vector<2x128xf32>
    %108 = arith.mulf %92, %100 : vector<2x128xf32>
    %109 = arith.addf %107, %108 : vector<2x128xf32>
    %110 = math.tanh %109 : vector<2x128xf32>
    %111 = arith.mulf %106, %110 : vector<2x128xf32>
    %cst_74 = arith.constant dense<0.000000e+00> : vector<2x512xf32>
    %112 = tpu.matmul %111, %15, %cst_74 {dimension_numbers = #tpu.dot_dimension_numbers<[1], [0], [0], [1], [0, 0, 1, 1], [], []>} : vector<2x128xf32>, vector<128x512xf32>, vector<2x512xf32> -> vector<2x512xf32>
    %cst_75 = arith.constant dense<0.000000e+00> : vector<2x512xf32>
    %113 = tpu.matmul %30, %16, %cst_75 {dimension_numbers = #tpu.dot_dimension_numbers<[1], [0], [0], [1], [0, 0, 1, 1], [], []>} : vector<2x128xf32>, vector<128x512xf32>, vector<2x512xf32> -> vector<2x512xf32>
    %114 = arith.addf %112, %113 : vector<2x512xf32>
    %115 = vector.broadcast %17 : vector<1x512xf32> to vector<2x512xf32>
    %116 = arith.addf %114, %115 : vector<2x512xf32>
    %117 = vector.extract_strided_slice %116 {offsets = [0, 0], sizes = [2, 128], strides = [1, 1]} : vector<2x512xf32> to vector<2x128xf32>
    %118 = arith.negf %117 : vector<2x128xf32>
    %119 = math.exp %118 : vector<2x128xf32>
    %cst_76 = arith.constant 1.000000e+00 : f32
    %120 = vector.broadcast %cst_76 : f32 to vector<2x128xf32>
    %121 = arith.addf %120, %119 : vector<2x128xf32>
    %122 = arith.divf %120, %121 : vector<2x128xf32>
    %123 = vector.extract_strided_slice %116 {offsets = [0, 128], sizes = [2, 128], strides = [1, 1]} : vector<2x512xf32> to vector<2x128xf32>
    %124 = arith.negf %123 : vector<2x128xf32>
    %125 = math.exp %124 : vector<2x128xf32>
    %cst_77 = arith.constant 1.000000e+00 : f32
    %126 = vector.broadcast %cst_77 : f32 to vector<2x128xf32>
    %127 = arith.addf %126, %125 : vector<2x128xf32>
    %128 = arith.divf %126, %127 : vector<2x128xf32>
    %129 = vector.extract_strided_slice %116 {offsets = [0, 256], sizes = [2, 128], strides = [1, 1]} : vector<2x512xf32> to vector<2x128xf32>
    %130 = math.tanh %129 : vector<2x128xf32>
    %131 = vector.extract_strided_slice %116 {offsets = [0, 384], sizes = [2, 128], strides = [1, 1]} : vector<2x512xf32> to vector<2x128xf32>
    %132 = arith.negf %131 : vector<2x128xf32>
    %133 = math.exp %132 : vector<2x128xf32>
    %cst_78 = arith.constant 1.000000e+00 : f32
    %134 = vector.broadcast %cst_78 : f32 to vector<2x128xf32>
    %135 = arith.addf %134, %133 : vector<2x128xf32>
    %136 = arith.divf %134, %135 : vector<2x128xf32>
    %137 = arith.mulf %128, %32 : vector<2x128xf32>
    %138 = arith.mulf %122, %130 : vector<2x128xf32>
    %139 = arith.addf %137, %138 : vector<2x128xf32>
    %140 = math.tanh %139 : vector<2x128xf32>
    %141 = arith.mulf %136, %140 : vector<2x128xf32>
    %cst_79 = arith.constant dense<0.000000e+00> : vector<2x64xf32>
    %142 = tpu.matmul %141, %18, %cst_79 {dimension_numbers = #tpu.dot_dimension_numbers<[1], [0], [0], [1], [0, 0, 1, 1], [], []>} : vector<2x128xf32>, vector<128x64xf32>, vector<2x64xf32> -> vector<2x64xf32>
    %143 = vector.broadcast %19 : vector<1x64xf32> to vector<2x64xf32>
    %144 = arith.addf %142, %143 : vector<2x64xf32>
    %cst_80 = arith.constant 0.000000e+00 : f32
    %145 = vector.broadcast %cst_80 : f32 to vector<2x64xf32>
    %146 = arith.maximumf %144, %145 : vector<2x64xf32>
    %cst_81 = arith.constant dense<0.000000e+00> : vector<2x128xf32>
    %147 = tpu.matmul %146, %20, %cst_81 {dimension_numbers = #tpu.dot_dimension_numbers<[1], [0], [0], [1], [0, 0, 1, 1], [], []>} : vector<2x64xf32>, vector<64x128xf32>, vector<2x128xf32> -> vector<2x128xf32>
    %148 = vector.broadcast %21 : vector<1x128xf32> to vector<2x128xf32>
    %149 = arith.addf %147, %148 : vector<2x128xf32>
    %c0_82 = arith.constant 0 : index
    %c0_83 = arith.constant 0 : index
    %c0_84 = arith.constant 0 : index
    %150 = vector.load %arg24[%c0_82, %c0_83, %c0_84] : memref<4x2x128xf32, #tpu.memory_space<vmem>>, vector<1x2x128xf32>
    %151 = vector.shape_cast %150 : vector<1x2x128xf32> to vector<2x128xf32>
    %152 = vector.shape_cast %149 : vector<2x128xf32> to vector<1x2x128xf32>
    tpu.vector_store %arg24[%c0_82, %c0_83, %c0_84], %152 {strides = array<i32>} : memref<4x2x128xf32, #tpu.memory_space<vmem>>, vector<1x2x128xf32>,
    %153 = vector.extract_strided_slice %22 {offsets = [0, 1, 0, 0], sizes = [2, 1, 8, 16], strides = [1, 1, 1, 1]} : vector<2x4x8x16xf32> to vector<2x1x8x16xf32>
    %154 = vector.shape_cast %153 : vector<2x1x8x16xf32> to vector<2x8x16xf32>
    %155 = vector.extract_strided_slice %28 {offsets = [0, 1, 0, 0], sizes = [2, 1, 8, 16], strides = [1, 1, 1, 1]} : vector<2x4x8x16xf32> to vector<2x1x8x16xf32>
    %156 = vector.shape_cast %155 : vector<2x1x8x16xf32> to vector<2x8x16xf32>
    %157 = vector.extract_strided_slice %23 {offsets = [1, 0, 0], sizes = [1, 2, 16], strides = [1, 1, 1]} : vector<4x2x16xf32> to vector<1x2x16xf32>
    %158 = vector.shape_cast %157 : vector<1x2x16xf32> to vector<2x16xf32>
    %159 = arith.addf %111, %141 : vector<2x128xf32>
    %cst_85 = arith.constant dense<0.000000e+00> : vector<2x16xf32>
    %160 = tpu.matmul %159, %2, %cst_85 {dimension_numbers = #tpu.dot_dimension_numbers<[1], [0], [0], [1], [0, 0, 1, 1], [], []>} : vector<2x128xf32>, vector<128x16xf32>, vector<2x16xf32> -> vector<2x16xf32>
    %161 = vector.broadcast %3 : vector<1x16xf32> to vector<2x16xf32>
    %162 = arith.addf %160, %161 : vector<2x16xf32>
    %163 = vector.shape_cast %162 : vector<2x16xf32> to vector<2x1x16xf32>
    %164 = vector.broadcast %163 : vector<2x1x16xf32> to vector<2x8x16xf32>
    %165 = arith.addf %156, %164 : vector<2x8x16xf32>
    %cst_86 = arith.constant 0.000000e+00 : f32
    %166 = vector.broadcast %cst_86 : f32 to vector<2x8x16xf32>
    %167 = arith.maximumf %165, %166 : vector<2x8x16xf32>
    %168 = vector.broadcast %4 : vector<1x8x1xf32> to vector<2x8x16xf32>
    %169 = arith.mulf %167, %168 : vector<2x8x16xf32>
    %170 = vector.broadcast %5 : vector<1x8x1xf32> to vector<2x8x16xf32>
    %171 = arith.addf %169, %170 : vector<2x8x16xf32>
    %172 = vector.shape_cast %171 : vector<2x8x16xf32> to vector<16x16xf32>
    %cst_87 = arith.constant dense<0.000000e+00> : vector<16x16xf32>
    %173 = tpu.matmul %172, %6, %cst_87 {dimension_numbers = #tpu.dot_dimension_numbers<[1], [0], [0], [1], [0, 0, 1, 1], [], []>} : vector<16x16xf32>, vector<16x16xf32>, vector<16x16xf32> -> vector<16x16xf32>
    %174 = vector.shape_cast %173 : vector<16x16xf32> to vector<2x8x16xf32>
    %175 = vector.broadcast %7 : vector<1x1x16xf32> to vector<2x8x16xf32>
    %176 = arith.addf %174, %175 : vector<2x8x16xf32>
    %cst_88 = arith.constant 0.000000e+00 : f32
    %177 = vector.broadcast %cst_88 : f32 to vector<2x8x16xf32>
    %178 = arith.maximumf %176, %177 : vector<2x8x16xf32>
    %179 = vector.broadcast %8 : vector<1x8x1xf32> to vector<2x8x16xf32>
    %180 = arith.mulf %178, %179 : vector<2x8x16xf32>
    %181 = vector.broadcast %9 : vector<1x8x1xf32> to vector<2x8x16xf32>
    %182 = arith.addf %180, %181 : vector<2x8x16xf32>
    %183 = vector.broadcast %10 : vector<1x1x16xf32> to vector<2x8x16xf32>
    %184 = arith.mulf %182, %183 : vector<2x8x16xf32>
    %cst_89 = arith.constant dense<0.000000e+00> : vector<2x8xf32>
    %185 = vector.multi_reduction <add>, %184, %cst_89 [2] : vector<2x8x16xf32> to vector<2x8xf32>
    %186 = vector.shape_cast %185 : vector<2x8xf32> to vector<2x8x1xf32>
    %cst_90 = arith.constant dense<0xFF800000> : vector<2x1xf32>
    %187 = vector.multi_reduction <maximumf>, %186, %cst_90 [1] : vector<2x8x1xf32> to vector<2x1xf32>
    %188 = vector.shape_cast %187 : vector<2x1xf32> to vector<2x1x1xf32>
    %189 = vector.broadcast %188 : vector<2x1x1xf32> to vector<2x8x1xf32>
    %190 = arith.subf %186, %189 : vector<2x8x1xf32>
    %191 = math.exp %190 : vector<2x8x1xf32>
    %cst_91 = arith.constant dense<0.000000e+00> : vector<2x1xf32>
    %192 = vector.multi_reduction <add>, %191, %cst_91 [1] : vector<2x8x1xf32> to vector<2x1xf32>
    %193 = vector.shape_cast %192 : vector<2x1xf32> to vector<2x1x1xf32>
    %194 = tpu.reciprocal %193 {approx = true} : vector<2x1x1xf32> -> vector<2x1x1xf32>
    %195 = vector.broadcast %194 : vector<2x1x1xf32> to vector<2x8x1xf32>
    %196 = arith.mulf %191, %195 : vector<2x8x1xf32>
    %197 = vector.broadcast %196 : vector<2x8x1xf32> to vector<2x8x16xf32>
    %198 = arith.mulf %197, %154 : vector<2x8x16xf32>
    %cst_92 = arith.constant dense<0.000000e+00> : vector<2x16xf32>
    %199 = vector.multi_reduction <add>, %198, %cst_92 [1] : vector<2x8x16xf32> to vector<2x16xf32>
    %cst_93 = arith.constant dense<0.000000e+00> : vector<2x512xf32>
    %200 = tpu.matmul %199, %11, %cst_93 {dimension_numbers = #tpu.dot_dimension_numbers<[1], [0], [0], [1], [0, 0, 1, 1], [], []>} : vector<2x16xf32>, vector<16x512xf32>, vector<2x512xf32> -> vector<2x512xf32>
    %cst_94 = arith.constant dense<0.000000e+00> : vector<2x512xf32>
    %201 = tpu.matmul %158, %12, %cst_94 {dimension_numbers = #tpu.dot_dimension_numbers<[1], [0], [0], [1], [0, 0, 1, 1], [], []>} : vector<2x16xf32>, vector<16x512xf32>, vector<2x512xf32> -> vector<2x512xf32>
    %202 = arith.addf %200, %201 : vector<2x512xf32>
    %cst_95 = arith.constant dense<0.000000e+00> : vector<2x512xf32>
    %203 = tpu.matmul %111, %13, %cst_95 {dimension_numbers = #tpu.dot_dimension_numbers<[1], [0], [0], [1], [0, 0, 1, 1], [], []>} : vector<2x128xf32>, vector<128x512xf32>, vector<2x512xf32> -> vector<2x512xf32>
    %204 = arith.addf %202, %203 : vector<2x512xf32>
    %205 = vector.broadcast %14 : vector<1x512xf32> to vector<2x512xf32>
    %206 = arith.addf %204, %205 : vector<2x512xf32>
    %207 = vector.extract_strided_slice %206 {offsets = [0, 0], sizes = [2, 128], strides = [1, 1]} : vector<2x512xf32> to vector<2x128xf32>
    %208 = arith.negf %207 : vector<2x128xf32>
    %209 = math.exp %208 : vector<2x128xf32>
    %cst_96 = arith.constant 1.000000e+00 : f32
    %210 = vector.broadcast %cst_96 : f32 to vector<2x128xf32>
    %211 = arith.addf %210, %209 : vector<2x128xf32>
    %212 = arith.divf %210, %211 : vector<2x128xf32>
    %213 = vector.extract_strided_slice %206 {offsets = [0, 128], sizes = [2, 128], strides = [1, 1]} : vector<2x512xf32> to vector<2x128xf32>
    %214 = arith.negf %213 : vector<2x128xf32>
    %215 = math.exp %214 : vector<2x128xf32>
    %cst_97 = arith.constant 1.000000e+00 : f32
    %216 = vector.broadcast %cst_97 : f32 to vector<2x128xf32>
    %217 = arith.addf %216, %215 : vector<2x128xf32>
    %218 = arith.divf %216, %217 : vector<2x128xf32>
    %219 = vector.extract_strided_slice %206 {offsets = [0, 256], sizes = [2, 128], strides = [1, 1]} : vector<2x512xf32> to vector<2x128xf32>
    %220 = math.tanh %219 : vector<2x128xf32>
    %221 = vector.extract_strided_slice %206 {offsets = [0, 384], sizes = [2, 128], strides = [1, 1]} : vector<2x512xf32> to vector<2x128xf32>
    %222 = arith.negf %221 : vector<2x128xf32>
    %223 = math.exp %222 : vector<2x128xf32>
    %cst_98 = arith.constant 1.000000e+00 : f32
    %224 = vector.broadcast %cst_98 : f32 to vector<2x128xf32>
    %225 = arith.addf %224, %223 : vector<2x128xf32>
    %226 = arith.divf %224, %225 : vector<2x128xf32>
    %227 = arith.mulf %218, %109 : vector<2x128xf32>
    %228 = arith.mulf %212, %220 : vector<2x128xf32>
    %229 = arith.addf %227, %228 : vector<2x128xf32>
    %230 = math.tanh %229 : vector<2x128xf32>
    %231 = arith.mulf %226, %230 : vector<2x128xf32>
    %cst_99 = arith.constant dense<0.000000e+00> : vector<2x512xf32>
    %232 = tpu.matmul %231, %15, %cst_99 {dimension_numbers = #tpu.dot_dimension_numbers<[1], [0], [0], [1], [0, 0, 1, 1], [], []>} : vector<2x128xf32>, vector<128x512xf32>, vector<2x512xf32> -> vector<2x512xf32>
    %cst_100 = arith.constant dense<0.000000e+00> : vector<2x512xf32>
    %233 = tpu.matmul %141, %16, %cst_100 {dimension_numbers = #tpu.dot_dimension_numbers<[1], [0], [0], [1], [0, 0, 1, 1], [], []>} : vector<2x128xf32>, vector<128x512xf32>, vector<2x512xf32> -> vector<2x512xf32>
    %234 = arith.addf %232, %233 : vector<2x512xf32>
    %235 = vector.broadcast %17 : vector<1x512xf32> to vector<2x512xf32>
    %236 = arith.addf %234, %235 : vector<2x512xf32>
    %237 = vector.extract_strided_slice %236 {offsets = [0, 0], sizes = [2, 128], strides = [1, 1]} : vector<2x512xf32> to vector<2x128xf32>
    %238 = arith.negf %237 : vector<2x128xf32>
    %239 = math.exp %238 : vector<2x128xf32>
    %cst_101 = arith.constant 1.000000e+00 : f32
    %240 = vector.broadcast %cst_101 : f32 to vector<2x128xf32>
    %241 = arith.addf %240, %239 : vector<2x128xf32>
    %242 = arith.divf %240, %241 : vector<2x128xf32>
    %243 = vector.extract_strided_slice %236 {offsets = [0, 128], sizes = [2, 128], strides = [1, 1]} : vector<2x512xf32> to vector<2x128xf32>
    %244 = arith.negf %243 : vector<2x128xf32>
    %245 = math.exp %244 : vector<2x128xf32>
    %cst_102 = arith.constant 1.000000e+00 : f32
    %246 = vector.broadcast %cst_102 : f32 to vector<2x128xf32>
    %247 = arith.addf %246, %245 : vector<2x128xf32>
    %248 = arith.divf %246, %247 : vector<2x128xf32>
    %249 = vector.extract_strided_slice %236 {offsets = [0, 256], sizes = [2, 128], strides = [1, 1]} : vector<2x512xf32> to vector<2x128xf32>
    %250 = math.tanh %249 : vector<2x128xf32>
    %251 = vector.extract_strided_slice %236 {offsets = [0, 384], sizes = [2, 128], strides = [1, 1]} : vector<2x512xf32> to vector<2x128xf32>
    %252 = arith.negf %251 : vector<2x128xf32>
    %253 = math.exp %252 : vector<2x128xf32>
    %cst_103 = arith.constant 1.000000e+00 : f32
    %254 = vector.broadcast %cst_103 : f32 to vector<2x128xf32>
    %255 = arith.addf %254, %253 : vector<2x128xf32>
    %256 = arith.divf %254, %255 : vector<2x128xf32>
    %257 = arith.mulf %248, %139 : vector<2x128xf32>
    %258 = arith.mulf %242, %250 : vector<2x128xf32>
    %259 = arith.addf %257, %258 : vector<2x128xf32>
    %260 = math.tanh %259 : vector<2x128xf32>
    %261 = arith.mulf %256, %260 : vector<2x128xf32>
    %cst_104 = arith.constant dense<0.000000e+00> : vector<2x64xf32>
    %262 = tpu.matmul %261, %18, %cst_104 {dimension_numbers = #tpu.dot_dimension_numbers<[1], [0], [0], [1], [0, 0, 1, 1], [], []>} : vector<2x128xf32>, vector<128x64xf32>, vector<2x64xf32> -> vector<2x64xf32>
    %263 = vector.broadcast %19 : vector<1x64xf32> to vector<2x64xf32>
    %264 = arith.addf %262, %263 : vector<2x64xf32>
    %cst_105 = arith.constant 0.000000e+00 : f32
    %265 = vector.broadcast %cst_105 : f32 to vector<2x64xf32>
    %266 = arith.maximumf %264, %265 : vector<2x64xf32>
    %cst_106 = arith.constant dense<0.000000e+00> : vector<2x128xf32>
    %267 = tpu.matmul %266, %20, %cst_106 {dimension_numbers = #tpu.dot_dimension_numbers<[1], [0], [0], [1], [0, 0, 1, 1], [], []>} : vector<2x64xf32>, vector<64x128xf32>, vector<2x128xf32> -> vector<2x128xf32>
    %268 = vector.broadcast %21 : vector<1x128xf32> to vector<2x128xf32>
    %269 = arith.addf %267, %268 : vector<2x128xf32>
    %c1 = arith.constant 1 : index
    %c0_107 = arith.constant 0 : index
    %c0_108 = arith.constant 0 : index
    %270 = vector.load %arg24[%c1, %c0_107, %c0_108] : memref<4x2x128xf32, #tpu.memory_space<vmem>>, vector<1x2x128xf32>
    %271 = vector.shape_cast %270 : vector<1x2x128xf32> to vector<2x128xf32>
    %272 = vector.shape_cast %269 : vector<2x128xf32> to vector<1x2x128xf32>
    tpu.vector_store %arg24[%c1, %c0_107, %c0_108], %272 {strides = array<i32>} : memref<4x2x128xf32, #tpu.memory_space<vmem>>, vector<1x2x128xf32>,
    %273 = vector.extract_strided_slice %22 {offsets = [0, 2, 0, 0], sizes = [2, 1, 8, 16], strides = [1, 1, 1, 1]} : vector<2x4x8x16xf32> to vector<2x1x8x16xf32>
    %274 = vector.shape_cast %273 : vector<2x1x8x16xf32> to vector<2x8x16xf32>
    %275 = vector.extract_strided_slice %28 {offsets = [0, 2, 0, 0], sizes = [2, 1, 8, 16], strides = [1, 1, 1, 1]} : vector<2x4x8x16xf32> to vector<2x1x8x16xf32>
    %276 = vector.shape_cast %275 : vector<2x1x8x16xf32> to vector<2x8x16xf32>
    %277 = vector.extract_strided_slice %23 {offsets = [2, 0, 0], sizes = [1, 2, 16], strides = [1, 1, 1]} : vector<4x2x16xf32> to vector<1x2x16xf32>
    %278 = vector.shape_cast %277 : vector<1x2x16xf32> to vector<2x16xf32>
    %279 = arith.addf %231, %261 : vector<2x128xf32>
    %cst_109 = arith.constant dense<0.000000e+00> : vector<2x16xf32>
    %280 = tpu.matmul %279, %2, %cst_109 {dimension_numbers = #tpu.dot_dimension_numbers<[1], [0], [0], [1], [0, 0, 1, 1], [], []>} : vector<2x128xf32>, vector<128x16xf32>, vector<2x16xf32> -> vector<2x16xf32>
    %281 = vector.broadcast %3 : vector<1x16xf32> to vector<2x16xf32>
    %282 = arith.addf %280, %281 : vector<2x16xf32>
    %283 = vector.shape_cast %282 : vector<2x16xf32> to vector<2x1x16xf32>
    %284 = vector.broadcast %283 : vector<2x1x16xf32> to vector<2x8x16xf32>
    %285 = arith.addf %276, %284 : vector<2x8x16xf32>
    %cst_110 = arith.constant 0.000000e+00 : f32
    %286 = vector.broadcast %cst_110 : f32 to vector<2x8x16xf32>
    %287 = arith.maximumf %285, %286 : vector<2x8x16xf32>
    %288 = vector.broadcast %4 : vector<1x8x1xf32> to vector<2x8x16xf32>
    %289 = arith.mulf %287, %288 : vector<2x8x16xf32>
    %290 = vector.broadcast %5 : vector<1x8x1xf32> to vector<2x8x16xf32>
    %291 = arith.addf %289, %290 : vector<2x8x16xf32>
    %292 = vector.shape_cast %291 : vector<2x8x16xf32> to vector<16x16xf32>
    %cst_111 = arith.constant dense<0.000000e+00> : vector<16x16xf32>
    %293 = tpu.matmul %292, %6, %cst_111 {dimension_numbers = #tpu.dot_dimension_numbers<[1], [0], [0], [1], [0, 0, 1, 1], [], []>} : vector<16x16xf32>, vector<16x16xf32>, vector<16x16xf32> -> vector<16x16xf32>
    %294 = vector.shape_cast %293 : vector<16x16xf32> to vector<2x8x16xf32>
    %295 = vector.broadcast %7 : vector<1x1x16xf32> to vector<2x8x16xf32>
    %296 = arith.addf %294, %295 : vector<2x8x16xf32>
    %cst_112 = arith.constant 0.000000e+00 : f32
    %297 = vector.broadcast %cst_112 : f32 to vector<2x8x16xf32>
    %298 = arith.maximumf %296, %297 : vector<2x8x16xf32>
    %299 = vector.broadcast %8 : vector<1x8x1xf32> to vector<2x8x16xf32>
    %300 = arith.mulf %298, %299 : vector<2x8x16xf32>
    %301 = vector.broadcast %9 : vector<1x8x1xf32> to vector<2x8x16xf32>
    %302 = arith.addf %300, %301 : vector<2x8x16xf32>
    %303 = vector.broadcast %10 : vector<1x1x16xf32> to vector<2x8x16xf32>
    %304 = arith.mulf %302, %303 : vector<2x8x16xf32>
    %cst_113 = arith.constant dense<0.000000e+00> : vector<2x8xf32>
    %305 = vector.multi_reduction <add>, %304, %cst_113 [2] : vector<2x8x16xf32> to vector<2x8xf32>
    %306 = vector.shape_cast %305 : vector<2x8xf32> to vector<2x8x1xf32>
    %cst_114 = arith.constant dense<0xFF800000> : vector<2x1xf32>
    %307 = vector.multi_reduction <maximumf>, %306, %cst_114 [1] : vector<2x8x1xf32> to vector<2x1xf32>
    %308 = vector.shape_cast %307 : vector<2x1xf32> to vector<2x1x1xf32>
    %309 = vector.broadcast %308 : vector<2x1x1xf32> to vector<2x8x1xf32>
    %310 = arith.subf %306, %309 : vector<2x8x1xf32>
    %311 = math.exp %310 : vector<2x8x1xf32>
    %cst_115 = arith.constant dense<0.000000e+00> : vector<2x1xf32>
    %312 = vector.multi_reduction <add>, %311, %cst_115 [1] : vector<2x8x1xf32> to vector<2x1xf32>
    %313 = vector.shape_cast %312 : vector<2x1xf32> to vector<2x1x1xf32>
    %314 = tpu.reciprocal %313 {approx = true} : vector<2x1x1xf32> -> vector<2x1x1xf32>
    %315 = vector.broadcast %314 : vector<2x1x1xf32> to vector<2x8x1xf32>
    %316 = arith.mulf %311, %315 : vector<2x8x1xf32>
    %317 = vector.broadcast %316 : vector<2x8x1xf32> to vector<2x8x16xf32>
    %318 = arith.mulf %317, %274 : vector<2x8x16xf32>
    %cst_116 = arith.constant dense<0.000000e+00> : vector<2x16xf32>
    %319 = vector.multi_reduction <add>, %318, %cst_116 [1] : vector<2x8x16xf32> to vector<2x16xf32>
    %cst_117 = arith.constant dense<0.000000e+00> : vector<2x512xf32>
    %320 = tpu.matmul %319, %11, %cst_117 {dimension_numbers = #tpu.dot_dimension_numbers<[1], [0], [0], [1], [0, 0, 1, 1], [], []>} : vector<2x16xf32>, vector<16x512xf32>, vector<2x512xf32> -> vector<2x512xf32>
    %cst_118 = arith.constant dense<0.000000e+00> : vector<2x512xf32>
    %321 = tpu.matmul %278, %12, %cst_118 {dimension_numbers = #tpu.dot_dimension_numbers<[1], [0], [0], [1], [0, 0, 1, 1], [], []>} : vector<2x16xf32>, vector<16x512xf32>, vector<2x512xf32> -> vector<2x512xf32>
    %322 = arith.addf %320, %321 : vector<2x512xf32>
    %cst_119 = arith.constant dense<0.000000e+00> : vector<2x512xf32>
    %323 = tpu.matmul %231, %13, %cst_119 {dimension_numbers = #tpu.dot_dimension_numbers<[1], [0], [0], [1], [0, 0, 1, 1], [], []>} : vector<2x128xf32>, vector<128x512xf32>, vector<2x512xf32> -> vector<2x512xf32>
    %324 = arith.addf %322, %323 : vector<2x512xf32>
    %325 = vector.broadcast %14 : vector<1x512xf32> to vector<2x512xf32>
    %326 = arith.addf %324, %325 : vector<2x512xf32>
    %327 = vector.extract_strided_slice %326 {offsets = [0, 0], sizes = [2, 128], strides = [1, 1]} : vector<2x512xf32> to vector<2x128xf32>
    %328 = arith.negf %327 : vector<2x128xf32>
    %329 = math.exp %328 : vector<2x128xf32>
    %cst_120 = arith.constant 1.000000e+00 : f32
    %330 = vector.broadcast %cst_120 : f32 to vector<2x128xf32>
    %331 = arith.addf %330, %329 : vector<2x128xf32>
    %332 = arith.divf %330, %331 : vector<2x128xf32>
    %333 = vector.extract_strided_slice %326 {offsets = [0, 128], sizes = [2, 128], strides = [1, 1]} : vector<2x512xf32> to vector<2x128xf32>
    %334 = arith.negf %333 : vector<2x128xf32>
    %335 = math.exp %334 : vector<2x128xf32>
    %cst_121 = arith.constant 1.000000e+00 : f32
    %336 = vector.broadcast %cst_121 : f32 to vector<2x128xf32>
    %337 = arith.addf %336, %335 : vector<2x128xf32>
    %338 = arith.divf %336, %337 : vector<2x128xf32>
    %339 = vector.extract_strided_slice %326 {offsets = [0, 256], sizes = [2, 128], strides = [1, 1]} : vector<2x512xf32> to vector<2x128xf32>
    %340 = math.tanh %339 : vector<2x128xf32>
    %341 = vector.extract_strided_slice %326 {offsets = [0, 384], sizes = [2, 128], strides = [1, 1]} : vector<2x512xf32> to vector<2x128xf32>
    %342 = arith.negf %341 : vector<2x128xf32>
    %343 = math.exp %342 : vector<2x128xf32>
    %cst_122 = arith.constant 1.000000e+00 : f32
    %344 = vector.broadcast %cst_122 : f32 to vector<2x128xf32>
    %345 = arith.addf %344, %343 : vector<2x128xf32>
    %346 = arith.divf %344, %345 : vector<2x128xf32>
    %347 = arith.mulf %338, %229 : vector<2x128xf32>
    %348 = arith.mulf %332, %340 : vector<2x128xf32>
    %349 = arith.addf %347, %348 : vector<2x128xf32>
    %350 = math.tanh %349 : vector<2x128xf32>
    %351 = arith.mulf %346, %350 : vector<2x128xf32>
    %cst_123 = arith.constant dense<0.000000e+00> : vector<2x512xf32>
    %352 = tpu.matmul %351, %15, %cst_123 {dimension_numbers = #tpu.dot_dimension_numbers<[1], [0], [0], [1], [0, 0, 1, 1], [], []>} : vector<2x128xf32>, vector<128x512xf32>, vector<2x512xf32> -> vector<2x512xf32>
    %cst_124 = arith.constant dense<0.000000e+00> : vector<2x512xf32>
    %353 = tpu.matmul %261, %16, %cst_124 {dimension_numbers = #tpu.dot_dimension_numbers<[1], [0], [0], [1], [0, 0, 1, 1], [], []>} : vector<2x128xf32>, vector<128x512xf32>, vector<2x512xf32> -> vector<2x512xf32>
    %354 = arith.addf %352, %353 : vector<2x512xf32>
    %355 = vector.broadcast %17 : vector<1x512xf32> to vector<2x512xf32>
    %356 = arith.addf %354, %355 : vector<2x512xf32>
    %357 = vector.extract_strided_slice %356 {offsets = [0, 0], sizes = [2, 128], strides = [1, 1]} : vector<2x512xf32> to vector<2x128xf32>
    %358 = arith.negf %357 : vector<2x128xf32>
    %359 = math.exp %358 : vector<2x128xf32>
    %cst_125 = arith.constant 1.000000e+00 : f32
    %360 = vector.broadcast %cst_125 : f32 to vector<2x128xf32>
    %361 = arith.addf %360, %359 : vector<2x128xf32>
    %362 = arith.divf %360, %361 : vector<2x128xf32>
    %363 = vector.extract_strided_slice %356 {offsets = [0, 128], sizes = [2, 128], strides = [1, 1]} : vector<2x512xf32> to vector<2x128xf32>
    %364 = arith.negf %363 : vector<2x128xf32>
    %365 = math.exp %364 : vector<2x128xf32>
    %cst_126 = arith.constant 1.000000e+00 : f32
    %366 = vector.broadcast %cst_126 : f32 to vector<2x128xf32>
    %367 = arith.addf %366, %365 : vector<2x128xf32>
    %368 = arith.divf %366, %367 : vector<2x128xf32>
    %369 = vector.extract_strided_slice %356 {offsets = [0, 256], sizes = [2, 128], strides = [1, 1]} : vector<2x512xf32> to vector<2x128xf32>
    %370 = math.tanh %369 : vector<2x128xf32>
    %371 = vector.extract_strided_slice %356 {offsets = [0, 384], sizes = [2, 128], strides = [1, 1]} : vector<2x512xf32> to vector<2x128xf32>
    %372 = arith.negf %371 : vector<2x128xf32>
    %373 = math.exp %372 : vector<2x128xf32>
    %cst_127 = arith.constant 1.000000e+00 : f32
    %374 = vector.broadcast %cst_127 : f32 to vector<2x128xf32>
    %375 = arith.addf %374, %373 : vector<2x128xf32>
    %376 = arith.divf %374, %375 : vector<2x128xf32>
    %377 = arith.mulf %368, %259 : vector<2x128xf32>
    %378 = arith.mulf %362, %370 : vector<2x128xf32>
    %379 = arith.addf %377, %378 : vector<2x128xf32>
    %380 = math.tanh %379 : vector<2x128xf32>
    %381 = arith.mulf %376, %380 : vector<2x128xf32>
    %cst_128 = arith.constant dense<0.000000e+00> : vector<2x64xf32>
    %382 = tpu.matmul %381, %18, %cst_128 {dimension_numbers = #tpu.dot_dimension_numbers<[1], [0], [0], [1], [0, 0, 1, 1], [], []>} : vector<2x128xf32>, vector<128x64xf32>, vector<2x64xf32> -> vector<2x64xf32>
    %383 = vector.broadcast %19 : vector<1x64xf32> to vector<2x64xf32>
    %384 = arith.addf %382, %383 : vector<2x64xf32>
    %cst_129 = arith.constant 0.000000e+00 : f32
    %385 = vector.broadcast %cst_129 : f32 to vector<2x64xf32>
    %386 = arith.maximumf %384, %385 : vector<2x64xf32>
    %cst_130 = arith.constant dense<0.000000e+00> : vector<2x128xf32>
    %387 = tpu.matmul %386, %20, %cst_130 {dimension_numbers = #tpu.dot_dimension_numbers<[1], [0], [0], [1], [0, 0, 1, 1], [], []>} : vector<2x64xf32>, vector<64x128xf32>, vector<2x128xf32> -> vector<2x128xf32>
    %388 = vector.broadcast %21 : vector<1x128xf32> to vector<2x128xf32>
    %389 = arith.addf %387, %388 : vector<2x128xf32>
    %c2 = arith.constant 2 : index
    %c0_131 = arith.constant 0 : index
    %c0_132 = arith.constant 0 : index
    %390 = vector.load %arg24[%c2, %c0_131, %c0_132] : memref<4x2x128xf32, #tpu.memory_space<vmem>>, vector<1x2x128xf32>
    %391 = vector.shape_cast %390 : vector<1x2x128xf32> to vector<2x128xf32>
    %392 = vector.shape_cast %389 : vector<2x128xf32> to vector<1x2x128xf32>
    tpu.vector_store %arg24[%c2, %c0_131, %c0_132], %392 {strides = array<i32>} : memref<4x2x128xf32, #tpu.memory_space<vmem>>, vector<1x2x128xf32>,
    %393 = vector.extract_strided_slice %22 {offsets = [0, 3, 0, 0], sizes = [2, 1, 8, 16], strides = [1, 1, 1, 1]} : vector<2x4x8x16xf32> to vector<2x1x8x16xf32>
    %394 = vector.shape_cast %393 : vector<2x1x8x16xf32> to vector<2x8x16xf32>
    %395 = vector.extract_strided_slice %28 {offsets = [0, 3, 0, 0], sizes = [2, 1, 8, 16], strides = [1, 1, 1, 1]} : vector<2x4x8x16xf32> to vector<2x1x8x16xf32>
    %396 = vector.shape_cast %395 : vector<2x1x8x16xf32> to vector<2x8x16xf32>
    %397 = vector.extract_strided_slice %23 {offsets = [3, 0, 0], sizes = [1, 2, 16], strides = [1, 1, 1]} : vector<4x2x16xf32> to vector<1x2x16xf32>
    %398 = vector.shape_cast %397 : vector<1x2x16xf32> to vector<2x16xf32>
    %399 = arith.addf %351, %381 : vector<2x128xf32>
    %cst_133 = arith.constant dense<0.000000e+00> : vector<2x16xf32>
    %400 = tpu.matmul %399, %2, %cst_133 {dimension_numbers = #tpu.dot_dimension_numbers<[1], [0], [0], [1], [0, 0, 1, 1], [], []>} : vector<2x128xf32>, vector<128x16xf32>, vector<2x16xf32> -> vector<2x16xf32>
    %401 = vector.broadcast %3 : vector<1x16xf32> to vector<2x16xf32>
    %402 = arith.addf %400, %401 : vector<2x16xf32>
    %403 = vector.shape_cast %402 : vector<2x16xf32> to vector<2x1x16xf32>
    %404 = vector.broadcast %403 : vector<2x1x16xf32> to vector<2x8x16xf32>
    %405 = arith.addf %396, %404 : vector<2x8x16xf32>
    %cst_134 = arith.constant 0.000000e+00 : f32
    %406 = vector.broadcast %cst_134 : f32 to vector<2x8x16xf32>
    %407 = arith.maximumf %405, %406 : vector<2x8x16xf32>
    %408 = vector.broadcast %4 : vector<1x8x1xf32> to vector<2x8x16xf32>
    %409 = arith.mulf %407, %408 : vector<2x8x16xf32>
    %410 = vector.broadcast %5 : vector<1x8x1xf32> to vector<2x8x16xf32>
    %411 = arith.addf %409, %410 : vector<2x8x16xf32>
    %412 = vector.shape_cast %411 : vector<2x8x16xf32> to vector<16x16xf32>
    %cst_135 = arith.constant dense<0.000000e+00> : vector<16x16xf32>
    %413 = tpu.matmul %412, %6, %cst_135 {dimension_numbers = #tpu.dot_dimension_numbers<[1], [0], [0], [1], [0, 0, 1, 1], [], []>} : vector<16x16xf32>, vector<16x16xf32>, vector<16x16xf32> -> vector<16x16xf32>
    %414 = vector.shape_cast %413 : vector<16x16xf32> to vector<2x8x16xf32>
    %415 = vector.broadcast %7 : vector<1x1x16xf32> to vector<2x8x16xf32>
    %416 = arith.addf %414, %415 : vector<2x8x16xf32>
    %cst_136 = arith.constant 0.000000e+00 : f32
    %417 = vector.broadcast %cst_136 : f32 to vector<2x8x16xf32>
    %418 = arith.maximumf %416, %417 : vector<2x8x16xf32>
    %419 = vector.broadcast %8 : vector<1x8x1xf32> to vector<2x8x16xf32>
    %420 = arith.mulf %418, %419 : vector<2x8x16xf32>
    %421 = vector.broadcast %9 : vector<1x8x1xf32> to vector<2x8x16xf32>
    %422 = arith.addf %420, %421 : vector<2x8x16xf32>
    %423 = vector.broadcast %10 : vector<1x1x16xf32> to vector<2x8x16xf32>
    %424 = arith.mulf %422, %423 : vector<2x8x16xf32>
    %cst_137 = arith.constant dense<0.000000e+00> : vector<2x8xf32>
    %425 = vector.multi_reduction <add>, %424, %cst_137 [2] : vector<2x8x16xf32> to vector<2x8xf32>
    %426 = vector.shape_cast %425 : vector<2x8xf32> to vector<2x8x1xf32>
    %cst_138 = arith.constant dense<0xFF800000> : vector<2x1xf32>
    %427 = vector.multi_reduction <maximumf>, %426, %cst_138 [1] : vector<2x8x1xf32> to vector<2x1xf32>
    %428 = vector.shape_cast %427 : vector<2x1xf32> to vector<2x1x1xf32>
    %429 = vector.broadcast %428 : vector<2x1x1xf32> to vector<2x8x1xf32>
    %430 = arith.subf %426, %429 : vector<2x8x1xf32>
    %431 = math.exp %430 : vector<2x8x1xf32>
    %cst_139 = arith.constant dense<0.000000e+00> : vector<2x1xf32>
    %432 = vector.multi_reduction <add>, %431, %cst_139 [1] : vector<2x8x1xf32> to vector<2x1xf32>
    %433 = vector.shape_cast %432 : vector<2x1xf32> to vector<2x1x1xf32>
    %434 = tpu.reciprocal %433 {approx = true} : vector<2x1x1xf32> -> vector<2x1x1xf32>
    %435 = vector.broadcast %434 : vector<2x1x1xf32> to vector<2x8x1xf32>
    %436 = arith.mulf %431, %435 : vector<2x8x1xf32>
    %437 = vector.broadcast %436 : vector<2x8x1xf32> to vector<2x8x16xf32>
    %438 = arith.mulf %437, %394 : vector<2x8x16xf32>
    %cst_140 = arith.constant dense<0.000000e+00> : vector<2x16xf32>
    %439 = vector.multi_reduction <add>, %438, %cst_140 [1] : vector<2x8x16xf32> to vector<2x16xf32>
    %cst_141 = arith.constant dense<0.000000e+00> : vector<2x512xf32>
    %440 = tpu.matmul %439, %11, %cst_141 {dimension_numbers = #tpu.dot_dimension_numbers<[1], [0], [0], [1], [0, 0, 1, 1], [], []>} : vector<2x16xf32>, vector<16x512xf32>, vector<2x512xf32> -> vector<2x512xf32>
    %cst_142 = arith.constant dense<0.000000e+00> : vector<2x512xf32>
    %441 = tpu.matmul %398, %12, %cst_142 {dimension_numbers = #tpu.dot_dimension_numbers<[1], [0], [0], [1], [0, 0, 1, 1], [], []>} : vector<2x16xf32>, vector<16x512xf32>, vector<2x512xf32> -> vector<2x512xf32>
    %442 = arith.addf %440, %441 : vector<2x512xf32>
    %cst_143 = arith.constant dense<0.000000e+00> : vector<2x512xf32>
    %443 = tpu.matmul %351, %13, %cst_143 {dimension_numbers = #tpu.dot_dimension_numbers<[1], [0], [0], [1], [0, 0, 1, 1], [], []>} : vector<2x128xf32>, vector<128x512xf32>, vector<2x512xf32> -> vector<2x512xf32>
    %444 = arith.addf %442, %443 : vector<2x512xf32>
    %445 = vector.broadcast %14 : vector<1x512xf32> to vector<2x512xf32>
    %446 = arith.addf %444, %445 : vector<2x512xf32>
    %447 = vector.extract_strided_slice %446 {offsets = [0, 0], sizes = [2, 128], strides = [1, 1]} : vector<2x512xf32> to vector<2x128xf32>
    %448 = arith.negf %447 : vector<2x128xf32>
    %449 = math.exp %448 : vector<2x128xf32>
    %cst_144 = arith.constant 1.000000e+00 : f32
    %450 = vector.broadcast %cst_144 : f32 to vector<2x128xf32>
    %451 = arith.addf %450, %449 : vector<2x128xf32>
    %452 = arith.divf %450, %451 : vector<2x128xf32>
    %453 = vector.extract_strided_slice %446 {offsets = [0, 128], sizes = [2, 128], strides = [1, 1]} : vector<2x512xf32> to vector<2x128xf32>
    %454 = arith.negf %453 : vector<2x128xf32>
    %455 = math.exp %454 : vector<2x128xf32>
    %cst_145 = arith.constant 1.000000e+00 : f32
    %456 = vector.broadcast %cst_145 : f32 to vector<2x128xf32>
    %457 = arith.addf %456, %455 : vector<2x128xf32>
    %458 = arith.divf %456, %457 : vector<2x128xf32>
    %459 = vector.extract_strided_slice %446 {offsets = [0, 256], sizes = [2, 128], strides = [1, 1]} : vector<2x512xf32> to vector<2x128xf32>
    %460 = math.tanh %459 : vector<2x128xf32>
    %461 = vector.extract_strided_slice %446 {offsets = [0, 384], sizes = [2, 128], strides = [1, 1]} : vector<2x512xf32> to vector<2x128xf32>
    %462 = arith.negf %461 : vector<2x128xf32>
    %463 = math.exp %462 : vector<2x128xf32>
    %cst_146 = arith.constant 1.000000e+00 : f32
    %464 = vector.broadcast %cst_146 : f32 to vector<2x128xf32>
    %465 = arith.addf %464, %463 : vector<2x128xf32>
    %466 = arith.divf %464, %465 : vector<2x128xf32>
    %467 = arith.mulf %458, %349 : vector<2x128xf32>
    %468 = arith.mulf %452, %460 : vector<2x128xf32>
    %469 = arith.addf %467, %468 : vector<2x128xf32>
    %470 = math.tanh %469 : vector<2x128xf32>
    %471 = arith.mulf %466, %470 : vector<2x128xf32>
    %cst_147 = arith.constant dense<0.000000e+00> : vector<2x512xf32>
    %472 = tpu.matmul %471, %15, %cst_147 {dimension_numbers = #tpu.dot_dimension_numbers<[1], [0], [0], [1], [0, 0, 1, 1], [], []>} : vector<2x128xf32>, vector<128x512xf32>, vector<2x512xf32> -> vector<2x512xf32>
    %cst_148 = arith.constant dense<0.000000e+00> : vector<2x512xf32>
    %473 = tpu.matmul %381, %16, %cst_148 {dimension_numbers = #tpu.dot_dimension_numbers<[1], [0], [0], [1], [0, 0, 1, 1], [], []>} : vector<2x128xf32>, vector<128x512xf32>, vector<2x512xf32> -> vector<2x512xf32>
    %474 = arith.addf %472, %473 : vector<2x512xf32>
    %475 = vector.broadcast %17 : vector<1x512xf32> to vector<2x512xf32>
    %476 = arith.addf %474, %475 : vector<2x512xf32>
    %477 = vector.extract_strided_slice %476 {offsets = [0, 0], sizes = [2, 128], strides = [1, 1]} : vector<2x512xf32> to vector<2x128xf32>
    %478 = arith.negf %477 : vector<2x128xf32>
    %479 = math.exp %478 : vector<2x128xf32>
    %cst_149 = arith.constant 1.000000e+00 : f32
    %480 = vector.broadcast %cst_149 : f32 to vector<2x128xf32>
    %481 = arith.addf %480, %479 : vector<2x128xf32>
    %482 = arith.divf %480, %481 : vector<2x128xf32>
    %483 = vector.extract_strided_slice %476 {offsets = [0, 128], sizes = [2, 128], strides = [1, 1]} : vector<2x512xf32> to vector<2x128xf32>
    %484 = arith.negf %483 : vector<2x128xf32>
    %485 = math.exp %484 : vector<2x128xf32>
    %cst_150 = arith.constant 1.000000e+00 : f32
    %486 = vector.broadcast %cst_150 : f32 to vector<2x128xf32>
    %487 = arith.addf %486, %485 : vector<2x128xf32>
    %488 = arith.divf %486, %487 : vector<2x128xf32>
    %489 = vector.extract_strided_slice %476 {offsets = [0, 256], sizes = [2, 128], strides = [1, 1]} : vector<2x512xf32> to vector<2x128xf32>
    %490 = math.tanh %489 : vector<2x128xf32>
    %491 = vector.extract_strided_slice %476 {offsets = [0, 384], sizes = [2, 128], strides = [1, 1]} : vector<2x512xf32> to vector<2x128xf32>
    %492 = arith.negf %491 : vector<2x128xf32>
    %493 = math.exp %492 : vector<2x128xf32>
    %cst_151 = arith.constant 1.000000e+00 : f32
    %494 = vector.broadcast %cst_151 : f32 to vector<2x128xf32>
    %495 = arith.addf %494, %493 : vector<2x128xf32>
    %496 = arith.divf %494, %495 : vector<2x128xf32>
    %497 = arith.mulf %488, %379 : vector<2x128xf32>
    %498 = arith.mulf %482, %490 : vector<2x128xf32>
    %499 = arith.addf %497, %498 : vector<2x128xf32>
    %500 = math.tanh %499 : vector<2x128xf32>
    %501 = arith.mulf %496, %500 : vector<2x128xf32>
    %cst_152 = arith.constant dense<0.000000e+00> : vector<2x64xf32>
    %502 = tpu.matmul %501, %18, %cst_152 {dimension_numbers = #tpu.dot_dimension_numbers<[1], [0], [0], [1], [0, 0, 1, 1], [], []>} : vector<2x128xf32>, vector<128x64xf32>, vector<2x64xf32> -> vector<2x64xf32>
    %503 = vector.broadcast %19 : vector<1x64xf32> to vector<2x64xf32>
    %504 = arith.addf %502, %503 : vector<2x64xf32>
    %cst_153 = arith.constant 0.000000e+00 : f32
    %505 = vector.broadcast %cst_153 : f32 to vector<2x64xf32>
    %506 = arith.maximumf %504, %505 : vector<2x64xf32>
    %cst_154 = arith.constant dense<0.000000e+00> : vector<2x128xf32>
    %507 = tpu.matmul %506, %20, %cst_154 {dimension_numbers = #tpu.dot_dimension_numbers<[1], [0], [0], [1], [0, 0, 1, 1], [], []>} : vector<2x64xf32>, vector<64x128xf32>, vector<2x128xf32> -> vector<2x128xf32>
    %508 = vector.broadcast %21 : vector<1x128xf32> to vector<2x128xf32>
    %509 = arith.addf %507, %508 : vector<2x128xf32>
    %c3 = arith.constant 3 : index
    %c0_155 = arith.constant 0 : index
    %c0_156 = arith.constant 0 : index
    %510 = vector.load %arg24[%c3, %c0_155, %c0_156] : memref<4x2x128xf32, #tpu.memory_space<vmem>>, vector<1x2x128xf32>
    %511 = vector.shape_cast %510 : vector<1x2x128xf32> to vector<2x128xf32>
    %512 = vector.shape_cast %509 : vector<2x128xf32> to vector<1x2x128xf32>
    tpu.vector_store %arg24[%c3, %c0_155, %c0_156], %512 {strides = array<i32>} : memref<4x2x128xf32, #tpu.memory_space<vmem>>, vector<1x2x128xf32>,
    return
  }
}

</mosaic_0001>

<bundles_post_ra>
// kernel: tpu_custom_call.1
= control target key start
LH: loop header
LB: loop body
LE: loop exit
PB: predicated region body
PF: predicated region fallthrough
CT: control target
= control target key end

     0   :  { %s6460_s0 = inlined_call_operand.vmem [shape: f32[2,4,8,16], index: 0, kind: input, shape index: {}]   ;;  %s6461_s1 = inlined_call_operand.hbm [shape: f32[4,2,16], index: 1, kind: input, shape index: {}]   ;;  %s6462_s2 = inlined_call_operand.vmem [shape: f32[16,16], index: 2, kind: input, shape index: {}]   ;;  %s6463_s3 = inlined_call_operand.vmem [shape: f32[1,16], index: 3, kind: input, shape index: {}]   ;;  %s6464_s4 = inlined_call_operand.vmem [shape: f32[128,16], index: 4, kind: input, shape index: {}]   ;;  %s6465_s5 = inlined_call_operand.hbm [shape: f32[1,16], index: 5, kind: input, shape index: {}]   ;;  %s6466_s6 = inlined_call_operand.vmem [shape: f32[1,8,1], index: 6, kind: input, shape index: {}]   ;;  %s6467_s7 = inlined_call_operand.vmem [shape: f32[1,8,1], index: 7, kind: input, shape index: {}]   ;;  %s6468_s8 = inlined_call_operand.vmem [shape: f32[16,16], index: 8, kind: input, shape index: {}]   ;;  %s6469_s9 = inlined_call_operand.hbm [shape: f32[1,1,16], index: 9, kind: input, shape index: {}]   ;;  %s6470_s10 = inlined_call_operand.vmem [shape: f32[1,8,1], index: 10, kind: input, shape index: {}]   ;;  %s6471_s11 = inlined_call_operand.vmem [shape: f32[1,8,1], index: 11, kind: input, shape index: {}]   ;;  %s6472_s12 = inlined_call_operand.vmem [shape: f32[1,1,16], index: 12, kind: input, shape index: {}]   ;;  %s6473_s13 = inlined_call_operand.vmem [shape: f32[16,512], index: 13, kind: input, shape index: {}]   ;;  %s6474_s14 = inlined_call_operand.vmem [shape: f32[16,512], index: 14, kind: input, shape index: {}]   ;;  %s6475_s15 = inlined_call_operand.hbm [shape: f32[128,512], index: 15, kind: input, shape index: {}]   ;;  %s6476_s16 = inlined_call_operand.vmem [shape: f32[1,512], index: 16, kind: input, shape index: {}]   ;;  %s6477_s17 = inlined_call_operand.hbm [shape: f32[128,512], index: 17, kind: input, shape index: {}]   ;;  %s6478_s18 = inlined_call_operand.hbm [shape: f32[128,512], index: 18, kind: input, shape index: {}]   ;;  %s6479_s19 = inlined_call_operand.vmem [shape: f32[1,512], index: 19, kind: input, shape index: {}]   ;;  %s6480_s20 = inlined_call_operand.vmem [shape: f32[128,64], index: 20, kind: input, shape index: {}]   ;;  %s6481_s21 = inlined_call_operand.vmem [shape: f32[1,64], index: 21, kind: input, shape index: {}]   ;;  %s6482_s22 = inlined_call_operand.vmem [shape: f32[64,128], index: 22, kind: input, shape index: {}]   ;;  %s6483_s23 = inlined_call_operand.vmem [shape: f32[1,128], index: 23, kind: input, shape index: {}]   ;;  %s6484_s24 = inlined_call_operand.hbm [shape: f32[4,2,128], index: 24, kind: output, shape index: {}]  }
   0x1   :  { %6604 = sst [smem:[#allocation82_spill]] %s6460_s0 }
   0x2   :  { %6605 = sst [smem:[#allocation83_spill]] %s6461_s1 }
   0x3   :  { %6606 = sst [smem:[#allocation84_spill]] %s6462_s2 }
   0x4   :  { %6607 = sst [smem:[#allocation85_spill]] %s6463_s3 }
   0x5   :  { %6608 = sst [smem:[#allocation86_spill]] %s6464_s4 }
   0x6   :  { %6609 = sst [smem:[#allocation87_spill]] %s6465_s5 }
   0x7   :  { %6610 = sst [smem:[#allocation88_spill]] %s6466_s6 }
   0x8   :  { %6611 = sst [smem:[#allocation89_spill]] %s6467_s7 }
   0x9   :  { %6612 = sst [smem:[#allocation90_spill]] %s6468_s8 }
   0xa   :  { %29 = vsyncpa [#allocation3], 0 }
   0xb   :  { %30 = vsyncpa [#allocation6], 0 }
   0xc   :  { %31 = vsyncpa [#allocation9], 0 }
   0xd   :  { %32 = vsyncpa [#allocation12], 0  ;;  %s6613_s27 = sld [smem:[#allocation87_spill]] }
  0x13   :  { %s60_s28 = sshll.u32 %s6613_s27, 4  ;;  %s61_s28 = int_to_ptr.hbm [resolvable:$true] %s60_s28 }
  0x14   :  { %33 = vsyncpa [#allocation4], 0  ;;  %s4491_s6 = smov [#allocation5]   ;;  %s97_s7 = sshll.u32 %s6475_s15, 4  ;;  %s98_s7 = int_to_ptr.hbm [resolvable:$true] %s97_s7 }
  0x15   :  { %s62_s2 = sshll.u32 %s4491_s6, 4  ;;  %s4492_s30 = smov [#allocation8]   ;;  %s63_s2 = int_to_ptr.vmem [resolvable:$true] %s62_s2 }
  0x16   :  { %65 = dma.hbm_to_vmem [thread:$0]  %s61_s28, 16, %s63_s2, [#allocation6]  }
  0x17   :  { %s99_s3 = sshll.u32 %s4492_s30, 4  ;;  %s6490_s25 = smov 512   ;;  %s100_s3 = int_to_ptr.vmem [resolvable:$true] %s99_s3 }
  0x18   :  { %s4494_s8 = smov 32   ;;  %s6614_s5 = sld [smem:[#allocation83_spill]] }
  0x19   :  { %105 = dma.hbm_to_vmem [thread:$0]  %s98_s7, 8192, %s100_s3, [#allocation9], %s6490_s25, %s6490_s25, %s4494_s8  }
  0x1a   :  { %s4495_s27 = smov [#allocation2]   ;;  %s4496_s6 = smov 2  }
  0x1b   :  { %s42_s28 = sshll.u32 %s4495_s27, 4  ;;  %s77_s29 = sshll.u32 %s6469_s9, 4  ;;  %s43_s28 = int_to_ptr.vmem [resolvable:$true] %s42_s28  ;;  %s78_s29 = int_to_ptr.hbm [resolvable:$true] %s77_s29 }
  0x1c   :  { %s4497_s0 = smov [#allocation7]   ;;  %s112_s4 = sshll.u32 %s6477_s17, 4  ;;  %s113_s4 = int_to_ptr.hbm [resolvable:$true] %s112_s4 }
  0x1d   :  { %s79_s7 = sshll.u32 %s4497_s0, 4  ;;  %s4498_s1 = smov [#allocation10]   ;;  %s80_s7 = int_to_ptr.vmem [resolvable:$true] %s79_s7 }
  0x1e   :  { %s40_s26 = sshll.u32 %s6614_s5, 4  ;;  %s114_s5 = sshll.u32 %s4498_s1, 4  ;;  %s41_s26 = int_to_ptr.hbm [resolvable:$true] %s40_s26  ;;  %s115_s5 = int_to_ptr.vmem [resolvable:$true] %s114_s5 }
  0x1f   :  { %48 = dma.hbm_to_vmem [thread:$0]  %s41_s26, 128, %s43_s28, [#allocation3], %s4494_s8, %s4494_s8, %s4496_s6  }
  0x20   :  { %82 = dma.hbm_to_vmem [thread:$0]  %s78_s29, 16, %s80_s7, [#allocation6]  }
  0x21   :  { %s125_s26 = sshll.u32 %s6478_s18, 4  ;;  %s6615_s28 = smov 512   ;;  %s126_s26 = int_to_ptr.hbm [resolvable:$true] %s125_s26 }
  0x22   :  { %120 = dma.hbm_to_vmem [thread:$0]  %s113_s4, 8192, %s115_s5, [#allocation9], %s6615_s28, %s6615_s28, %s4494_s8  }
  0x23   :  { %s4499_s9 = smov [#allocation11]  }
  0x24   :  { %s127_s15 = sshll.u32 %s4499_s9, 4  ;;  %s128_s15 = int_to_ptr.vmem [resolvable:$true] %s127_s15 }
  0x25   :  { %133 = dma.hbm_to_vmem [thread:$0]  %s126_s26, 8192, %s128_s15, [#allocation12], %s6615_s28, %s6615_s28, %s4494_s8  }
  0x26   :  { %4481 = dma.done.wait [#allocation3], 128  }
  0x27   :  { %4482 = vsyncadd [#allocation3], 4294967168 }
  0x28   :  { %4483 = dma.done.wait [#allocation6], 32  }
  0x29   :  { %4484 = vsyncadd [#allocation6], 4294967264 }
  0x2a   :  { %4485 = dma.done.wait [#allocation9], 16384  }
  0x2b   :  { %4486 = vsyncadd [#allocation9], 4294950912 }
  0x2c   :  { %4487 = dma.done.wait [#allocation12], 8192  }
  0x2d   :  { %4488 = vsyncadd [#allocation12], 4294959104  ;;  %s6616_s25 = sld [smem:[#allocation84_spill]]  ;;  %vm447_vm0 = vcmask 130048   ;;  %v4500_v6 = vmov 0   ;;  %v4501_v25 = vmov 0.0  }
  0x2e   :  { %s6617_s0 = sld [smem:[#allocation86_spill]]  ;;  %3564 = vset.pattern.permute.xlu0 %v4500_v6  ;;  %3565 = vset.pattern.permute.xlu1 %v4500_v6  ;;  %v193_v31 = vld [vmem:[%s6470_s10] sm:$0xff]  ;;  %v3567_v35 = vld [vmem:[#allocation5] ss:$0 sm:$0xff]  ;;  %v3568_v56 = vld [vmem:[#allocation7] ss:$0 sm:$0xff] }
  0x2f   :  { %s6618_s27 = sld [smem:[#allocation82_spill]]  ;;  %598 = vperm.xlu1 %3565, %v193_v31   ;;  %v194_v33 = vld [vmem:[%s6471_s11] sm:$0xff]  ;;  %v265_v31 = vld [vmem:[#allocation8 + $0x1a8] sm:$0xff]  ;;  %vm756_vm1 = vcmask 1041409   ;;  %s3460_s9 = sshll.u32 %s6484_s24, 4  ;;  %s3461_s9 = int_to_ptr.hbm [resolvable:$true] %s3460_s9 }
  0x30   :  { %s6619_s29 = sld [smem:[#allocation88_spill]]  ;;  %v3569_v61 = vld [vmem:[%s6472_s12] ss:$0 sm:$0xff] }
  0x31   :  { %s6620_s17 = sld [smem:[#allocation89_spill]] }
  0x32   :  { %s6621_s5 = sld [smem:[#allocation90_spill]] }
  0x33   :  { %v169_v0 = vld [vmem:[%s6616_s25 + $0x8] sm:$0xff]  ;;  %v168_v2 = vld [vmem:[%s6616_s25] sm:$0xff] }
  0x34   :  { %v186_v1 = vld [vmem:[%s6617_s0 + $0x78] sm:$0xff]  ;;  %486 = vmatpush.msra.mxu0 %v169_v0  ;;  %v185_v3 = vld [vmem:[%s6617_s0 + $0x70] sm:$0xff]  ;;  %v184_v5 = vld [vmem:[%s6617_s0 + $0x68] sm:$0xff] }
  0x35   :  { %516 = vmatpush.msra.mxu1 %v186_v1  ;;  %v4673_v4 = vld [vmem:[%s6618_s27] sm:$0xff]  ;;  %v182_v8 = vld [vmem:[%s6617_s0 + $0x58] sm:$0xff]  ;;  %v181_v10 = vld [vmem:[%s6617_s0 + $0x50] sm:$0xff] }
  0x36   :  { %487 = vmatpush.msra.mxu0 %v168_v2  ;;  %v183_v7 = vld [vmem:[%s6617_s0 + $0x60] sm:$0xff]  ;;  %v433_v11 = vld [vmem:[%s6618_s27 + $0x8] sm:$0xff]  ;;  %v178_v15 = vld [vmem:[%s6617_s0 + $0x38] sm:$0xff] }
  0x37   :  { %517 = vmatpush.msra.mxu1 %v185_v3  ;;  %3476 = vmatmul.msk.f32.vlgmr.msra.gmra.mxu0 %vm447_vm0, %v4673_v4  ;;  %v188_v9 = vld [vmem:[%s6619_s29] sm:$0xff]  ;;  %v180_v12 = vld [vmem:[%s6617_s0 + $0x48] sm:$0xff]  ;;  %v177_v16 = vld [vmem:[%s6617_s0 + $0x30] sm:$0xff]  ;;  %s6625_s29 = sld [smem:[#allocation85_spill]] }
  0x38   :  { %548 = vperm.xlu0 %3564, %v188_v9   ;;  %v179_v13 = vld [vmem:[%s6617_s0 + $0x40] sm:$0xff]  ;;  %v434_v17 = vld [vmem:[%s6618_s27 + $0x10] sm:$0xff]  ;;  %v176_v18 = vld [vmem:[%s6617_s0 + $0x28] sm:$0xff]  ;;  %605 = vperm.xlu1 %3565, %v194_v33  }
  0x39   :  { %518 = vmatpush.msra.mxu1 %v184_v5  ;;  %v189_v14 = vld [vmem:[%s6620_s17] sm:$0xff]  ;;  %v174_v20 = vld [vmem:[%s6617_s0 + $0x18] sm:$0xff]  ;;  %v173_v21 = vld [vmem:[%s6617_s0 + $0x10] sm:$0xff] }
  0x3a   :  { %v175_v19 = vld [vmem:[%s6617_s0 + $0x20] sm:$0xff]  ;;  %v435_v22 = vld [vmem:[%s6618_s27 + $0x18] sm:$0xff]  ;;  %v172_v23 = vld [vmem:[%s6617_s0 + $0x8] sm:$0xff] }
  0x3b   :  { %519 = vmatpush.msra.mxu1 %v183_v7  ;;  %v171_v24 = vld [vmem:[%s6617_s0] sm:$0xff]  ;;  %v191_v28 = vld [vmem:[%s6621_s5 + $0x8] sm:$0xff] }
  0x3c   :  { %v4741_v26 = vld [vmem:[%s6618_s27 + $0x20] sm:$0xff]  ;;  %580 = vmatpush.msra.mxu2 %v191_v28  ;;  %v272_v33 = vld [vmem:[#allocation8 + $0x1e0] sm:$0xff] }
  0x3d   :  { %520 = vmatpush.msra.mxu1 %v182_v8  ;;  %v190_v29 = vld [vmem:[%s6621_s5] sm:$0xff] }
  0x3e   :  { %581 = vmatpush.msra.mxu2 %v190_v29  ;;  %v3566_v36 = vld [vmem:[%s6625_s29] ss:$0 sm:$0xff]  ;;  %v209_v29 = vld [vmem:[%s6474_s14 + $0x28] sm:$0xff] }
  0x3f   :  { %521 = vmatpush.msra.mxu1 %v181_v10  ;;  %3477 = vmatmul.msk.f32.gmra.mxu0 %vm447_vm0, %v433_v11  ;;  %v4795_v28 = vld [vmem:[#allocation2] sm:$0x3] }
  0x40   :  { %555 = vperm.xlu0 %3564, %v189_v14  }
  0x41   :  { %522 = vmatpush.msra.mxu1 %v180_v12 }
  0x43   :  { %523 = vmatpush.msra.mxu1 %v179_v13 }
  0x45   :  { %524 = vmatpush.msra.mxu1 %v178_v15 }
  0x47   :  { %525 = vmatpush.msra.mxu1 %v177_v16  ;;  %3478 = vmatmul.msk.f32.gmra.mxu0 %vm447_vm0, %v434_v17 }
  0x49   :  { %526 = vmatpush.msra.mxu1 %v176_v18  ;;  %v208_v18 = vld [vmem:[%s6474_s14 + $0x20] sm:$0xff] }
  0x4a   :  { %688 = vmatpush.msra.mxu3 %v208_v18  ;;  %v236_v18 = vld [vmem:[#allocation8 + $0xc0] sm:$0xff] }
  0x4b   :  { %527 = vmatpush.msra.mxu1 %v175_v19 }
  0x4d   :  { %528 = vmatpush.msra.mxu1 %v174_v20 }
  0x4f   :  { %529 = vmatpush.msra.mxu1 %v173_v21  ;;  %3479 = vmatmul.msk.f32.gmra.mxu0 %vm447_vm0, %v435_v22  ;;  %v204_v21 = vld [vmem:[%s6474_s14] sm:$0xff]  ;;  %v273_v22 = vld [vmem:[#allocation8 + $0x1e8] sm:$0xff] }
  0x50   :  { %689 = vmatpush.msra.mxu3 %v204_v21  ;;  %860 = vmatpush.msrb.mxu0 %v273_v22  ;;  %v229_v22 = vld [vmem:[#allocation8 + $0x88] sm:$0xff] }
  0x51   :  { %530 = vmatpush.msra.mxu1 %v172_v23  ;;  %v269_v23 = vld [vmem:[#allocation8 + $0x1c8] sm:$0xff]  ;;  %3486 = vmatmul.msk.f32.vlgmr.msra.gmra.mxu3 %vm447_vm0, %v4795_v28 }
  0x52   :  { %861 = vmatpush.msrb.mxu0 %v269_v23  ;;  %708 = vmatpush.msrb.mxu3 %v209_v29  ;;  %v232_v23 = vld [vmem:[#allocation8 + $0xa0] sm:$0xff] }
  0x53   :  { %531 = vmatpush.msra.mxu1 %v171_v24  ;;  %v228_v29 = vld [vmem:[#allocation8 + $0x80] sm:$0xff] }
  0x54   :  { %532 = vmatmul.f32.vlgmr.msra.gmra.mxu1 %v4501_v25  ;;  %862 = vmatpush.msrb.mxu0 %v265_v31 }
  0x55   :  { %840 = vmatpush.msrb.mxu1 %v272_v33 }
  0x57   :  { %3480 = vmatmul.msk.f32.gmra.mxu0 %vm447_vm0, %v4741_v26 }
  0xa1   :  { %v4776_v55 = vpop.permute.xlu1 %598 }
  0xa2   :  { %6628 = vst [vmem:[#allocation24_spill] sm:$0xff] %v4776_v55 }
  0xaa   :  { %v4766_v37 = vpop.permute.xlu0 %548  ;;  %v4782_v62 = vpop.permute.xlu1 %605 }
  0xab   :  { %6626 = vst [vmem:[#allocation22_spill] sm:$0xff] %v4766_v37 }
  0xac   :  { %6629 = vst [vmem:[#allocation25_spill] sm:$0xff] %v4782_v62 }
  0xb2   :  { %v4769_v50 = vpop.permute.xlu0 %555 }
  0xb3   :  { %6627 = vst [vmem:[#allocation23_spill] sm:$0xff] %v4769_v50 }
  0xb4   :  { %v489_v27 = vpop.f32.mrf.mxu0 }
  0xb5   :  { %v490_v40 = vadd.f32 %v3566_v36, %v489_v27 }
  0xbc   :  { %v4751_v30 = vpop.f32.mrf.mxu0 }
  0xbd   :  { %6622 = vst [vmem:[#allocation19_spill] sm:$0xff] %v4751_v30 }
  0xc4   :  { %v4756_v32 = vpop.f32.mrf.mxu0 }
  0xc5   :  { %6623 = vst [vmem:[#allocation20_spill] sm:$0xff] %v4756_v32  ;;  %v3754_v32 = vld [vmem:[#allocation8 + $0x1e0] sm:$0xff] }
  0xcc   :  { %v4761_v34 = vpop.f32.mrf.mxu0 }
  0xcd   :  { %6624 = vst [vmem:[#allocation21_spill] sm:$0xff] %v4761_v34 }
  0xd1   :  { %v533_v38 = vpop.f32.mrf.mxu1 }
  0xd2   :  { %v534_v39 = vadd.f32 %v3567_v35, %v533_v38  ;;  %v268_v38 = vld [vmem:[#allocation8 + $0x1c0] sm:$0xff] }
  0xd3   :  { %841 = vmatpush.msrb.mxu1 %v268_v38 }
  0xd4   :  { %v537_v41 = vrot.slane %v534_v39, 1  ;;  %v538_v42 = vperm.slane %v534_v39, 0  ;;  %v501_v43 = vpop.f32.mrf.mxu0  ;;  %v205_v39 = vld [vmem:[%s6474_s14 + $0x8] sm:$0xff] }
  0xd5   :  { %v502_v46 = vadd.f32 %v3566_v36, %v501_v43  ;;  %709 = vmatpush.msrb.mxu3 %v205_v39  ;;  %v220_v39 = vld [vmem:[#allocation8 + $0x40] sm:$0xff] }
  0xd6   :  { %v539_v44 = vperm.slane %v537_v41, 0  ;;  %v542_v45 = vadd.f32 %v538_v42, %v490_v40  ;;  %v261_v40 = vld [vmem:[#allocation8 + $0x188] sm:$0xff]  ;;  %v437_v41 = vld [vmem:[%s6618_s27 + $0x28] sm:$0xff]  ;;  %3487 = vmatmul.msk.f32.vlgmr.msrb.gmra.mxu3 %vm447_vm0, %v4795_v28 }
  0xd7   :  { %v211_v42 = vld [vmem:[%s6474_s14 + $0x38] sm:$0xff]  ;;  %3481 = vmatmul.msk.f32.gmra.mxu0 %vm447_vm0, %v437_v41 }
  0xd8   :  { %v544_v47 = vmax.f32 %v542_v45, 0.0  ;;  %v543_v48 = vadd.f32 %v539_v44, %v502_v46  ;;  %v264_v44 = vld [vmem:[#allocation8 + $0x1a0] sm:$0xff]  ;;  %v257_v46 = vld [vmem:[#allocation8 + $0x168] sm:$0xff]  ;;  %863 = vmatpush.msrb.mxu0 %v261_v40  ;;  %748 = vmatpush.msra.mxu3 %v211_v42 }
  0xd9   :  { %v210_v45 = vld [vmem:[%s6474_s14 + $0x30] sm:$0xff]  ;;  %842 = vmatpush.msrb.mxu1 %v264_v44 }
  0xda   :  { %v551_v49 = vmul.f32 %v4766_v37, %v544_v47  ;;  %v545_v51 = vmax.f32 %v543_v48, 0.0  ;;  %v207_v47 = vld [vmem:[%s6474_s14 + $0x18] sm:$0xff]  ;;  %728 = vmatpush.msrb.mxu2 %v210_v45  ;;  %864 = vmatpush.msrb.mxu0 %v257_v46  ;;  %v212_v46 = vld [vmem:[#allocation8] sm:$0xff] }
  0xdb   :  { %749 = vmatpush.msra.mxu3 %v207_v47  ;;  %v221_v40 = vld [vmem:[#allocation8 + $0x48] sm:$0xff] }
  0xdc   :  { %v558_v52 = vadd.f32 %v4769_v50, %v551_v49  ;;  %v552_v53 = vmul.f32 %v4766_v37, %v545_v51  ;;  %v260_v49 = vld [vmem:[#allocation8 + $0x180] sm:$0xff]  ;;  %v253_v51 = vld [vmem:[#allocation8 + $0x148] sm:$0xff] }
  0xdd   :  { %843 = vmatpush.msrb.mxu1 %v260_v49  ;;  %865 = vmatpush.msrb.mxu0 %v253_v51  ;;  %v217_v44 = vld [vmem:[#allocation8 + $0x28] sm:$0xff] }
  0xde   :  { %3484 = vmatmul.msk.f32.vlgmr.msra.gmra.mxu2 %vm447_vm0, %v558_v52  ;;  %v559_v54 = vadd.f32 %v4769_v50, %v552_v53  ;;  %v206_v52 = vld [vmem:[%s6474_s14 + $0x10] sm:$0xff]  ;;  %3489 = vmatmul.msk.f32.vlgmr.msra.gmra.mxu3 %vm447_vm0, %v4795_v28 }
  0xdf   :  { %729 = vmatpush.msrb.mxu2 %v206_v52  ;;  %v213_v47 = vld [vmem:[#allocation8 + $0x8] sm:$0xff] }
  0xe6   :  { %3485 = vmatmul.msk.f32.gmra.mxu2 %vm447_vm0, %v559_v54  ;;  %v256_v54 = vld [vmem:[#allocation8 + $0x160] sm:$0xff] }
  0xe7   :  { %844 = vmatpush.msrb.mxu1 %v256_v54 }
  0xee   :  { %3488 = vmatmul.msk.f32.vlgmr.msrb.gmra.mxu2 %vm447_vm0, %v4795_v28 }
 0x161   :  { %v583_v57 = vpop.f32.mrf.mxu2 }
 0x162   :  { %v592_v58 = vadd.f32 %v3568_v56, %v583_v57  ;;  %v201_v57 = vld [vmem:[%s6473_s13 + $0x28] sm:$0xff] }
 0x163   :  { %794 = vmatpush.msrb.mxu3 %v201_v57 }
 0x164   :  { %v594_v59 = vmax.f32 %v592_v58, 0.0 }
 0x166   :  { %v601_v60 = vmul.f32 %v4776_v55, %v594_v59 }
 0x168   :  { %v608_v63 = vadd.f32 %v4782_v62, %v601_v60  ;;  %v252_v60 = vld [vmem:[#allocation8 + $0x140] sm:$0xff] }
 0x169   :  { %v586_v0 = vpop.f32.mrf.mxu2  ;;  %845 = vmatpush.msrb.mxu1 %v252_v60 }
 0x16a   :  { %v593_v1 = vadd.f32 %v3568_v56, %v586_v0  ;;  %v613_v2 = vmul.f32 %v3569_v61, %v608_v63  ;;  %v249_v56 = vld [vmem:[#allocation8 + $0x128] sm:$0xff] }
 0x16b   :  { %v245_v0 = vld [vmem:[#allocation8 + $0x108] sm:$0xff]  ;;  %866 = vmatpush.msrb.mxu0 %v249_v56 }
 0x16c   :  { %v595_v3 = vmax.f32 %v593_v1, 0.0  ;;  %v615_v5 = vsel %vm447_vm0, %v613_v2, 0.0  ;;  %v200_v1 = vld [vmem:[%s6473_s13 + $0x20] sm:$0xff]  ;;  %v248_v2 = vld [vmem:[#allocation8 + $0x120] sm:$0xff] }
 0x16d   :  { %616 = vadd.xlane.f32.xlu2 %v615_v5  ;;  %867 = vmatpush.msrb.mxu0 %v245_v0 }
 0x16e   :  { %v602_v6 = vmul.f32 %v4776_v55, %v595_v3  ;;  %v197_v3 = vld [vmem:[%s6473_s13 + $0x8] sm:$0xff]  ;;  %774 = vmatpush.msra.mxu2 %v200_v1  ;;  %846 = vmatpush.msrb.mxu1 %v248_v2 }
 0x16f   :  { %795 = vmatpush.msrb.mxu3 %v197_v3 }
 0x170   :  { %v609_v7 = vadd.f32 %v4782_v62, %v602_v6  ;;  %v241_v6 = vld [vmem:[#allocation8 + $0xe8] sm:$0xff] }
 0x171   :  { %868 = vmatpush.msrb.mxu0 %v241_v6  ;;  %v275_v6 = vld [vmem:[#allocation8 + $0x1f8] sm:$0xff] }
 0x172   :  { %v614_v8 = vmul.f32 %v3569_v61, %v609_v7  ;;  %v438_v61 = vld [vmem:[%s6618_s27 + $0x30] sm:$0xff]  ;;  %v196_v7 = vld [vmem:[%s6473_s13] sm:$0xff] }
 0x173   :  { %3482 = vmatmul.msk.f32.gmra.mxu0 %vm447_vm0, %v438_v61  ;;  %775 = vmatpush.msra.mxu2 %v196_v7 }
 0x174   :  { %v618_v9 = vsel %vm447_vm0, %v614_v8, 0.0  ;;  %v244_v8 = vld [vmem:[#allocation8 + $0x100] sm:$0xff] }
 0x175   :  { %619 = vadd.xlane.f32.xlu2 %v618_v9  ;;  %847 = vmatpush.msrb.mxu1 %v244_v8  ;;  %v271_v8 = vld [vmem:[#allocation8 + $0x1d8] sm:$0xff] }
 0x1e0   :  { %v617_v10 = vpop.xlane.xlu2 %616 }
 0x1e1   :  { %v621_v11 = vrot.slane %v617_v10, 4 }
 0x1e3   :  { %v622_v12 = vmax.f32 %v617_v10, %v621_v11  ;;  %v202_v11 = vld [vmem:[%s6473_s13 + $0x30] sm:$0xff] }
 0x1e4   :  { %814 = vmatpush.msrb.mxu2 %v202_v11  ;;  %v262_v11 = vld [vmem:[#allocation8 + $0x190] sm:$0xff] }
 0x1e5   :  { %v623_v13 = vrot.slane %v622_v12, 2 }
 0x1e7   :  { %v624_v14 = vmax.f32 %v622_v12, %v623_v13  ;;  %v240_v12 = vld [vmem:[#allocation8 + $0xe0] sm:$0xff]  ;;  %v203_v13 = vld [vmem:[%s6473_s13 + $0x38] sm:$0xff] }
 0x1e8   :  { %v620_v15 = vpop.xlane.xlu2 %619  ;;  %848 = vmatpush.msrb.mxu1 %v240_v12  ;;  %834 = vmatpush.msra.mxu3 %v203_v13  ;;  %v263_v12 = vld [vmem:[#allocation8 + $0x198] sm:$0xff]  ;;  %v258_v13 = vld [vmem:[#allocation8 + $0x170] sm:$0xff] }
 0x1e9   :  { %v625_v16 = vrot.slane %v624_v14, 1  ;;  %v627_v17 = vrot.slane %v620_v15, 4 }
 0x1ea   :  { %849 = vmatpush.msrb.mxu1 %v236_v18  ;;  %v251_v18 = vld [vmem:[#allocation8 + $0x138] sm:$0xff] }
 0x1eb   :  { %v626_v19 = vmax.f32 %v624_v14, %v625_v16  ;;  %v628_v20 = vmax.f32 %v620_v15, %v627_v17  ;;  %v198_v16 = vld [vmem:[%s6473_s13 + $0x10] sm:$0xff] }
 0x1ec   :  { %815 = vmatpush.msrb.mxu2 %v198_v16  ;;  %850 = vmatpush.msrb.mxu1 %v232_v23  ;;  %v255_v16 = vld [vmem:[#allocation8 + $0x158] sm:$0xff]  ;;  %v238_v23 = vld [vmem:[#allocation8 + $0xd0] sm:$0xff] }
 0x1ed   :  { %v633_v24 = vsub.f32 %v617_v10, %v626_v19  ;;  %v629_v27 = vrot.slane %v628_v20, 2  ;;  %v237_v10 = vld [vmem:[#allocation8 + $0xc8] sm:$0xff] }
 0x1ee   :  { %869 = vmatpush.msrb.mxu0 %v237_v10  ;;  %v199_v19 = vld [vmem:[%s6473_s13 + $0x18] sm:$0xff]  ;;  %851 = vmatpush.msrb.mxu1 %v228_v29  ;;  %v267_v10 = vld [vmem:[#allocation8 + $0x1b8] sm:$0xff] }
 0x1ef   :  { %v635_v35 = vmul.f32 1.442695, %v633_v24  ;;  %v630_v36 = vmax.f32 %v628_v20, %v629_v27  ;;  %v439_v24 = vld [vmem:[%s6618_s27 + $0x38] sm:$0xff]  ;;  %835 = vmatpush.msra.mxu3 %v199_v19 }
 0x1f0   :  { %3483 = vmatmul.msk.f32.gmra.mxu0 %vm447_vm0, %v439_v24  ;;  %v246_v19 = vld [vmem:[#allocation8 + $0x110] sm:$0xff]  ;;  %v239_v24 = vld [vmem:[#allocation8 + $0xd8] sm:$0xff] }
 0x1f1   :  { %3572 = vpow2.f32 %v635_v35  ;;  %v631_v43 = vrot.slane %v630_v36, 1  ;;  %v224_v35 = vld [vmem:[#allocation8 + $0x60] sm:$0xff]  ;;  %v230_v29 = vld [vmem:[#allocation8 + $0x90] sm:$0xff] }
 0x1f2   :  { %852 = vmatpush.msrb.mxu1 %v224_v35  ;;  %v227_v35 = vld [vmem:[#allocation8 + $0x78] sm:$0xff] }
 0x1f3   :  { %v632_v48 = vmax.f32 %v630_v36, %v631_v43  ;;  %v225_v36 = vld [vmem:[#allocation8 + $0x68] sm:$0xff]  ;;  %v216_v43 = vld [vmem:[#allocation8 + $0x20] sm:$0xff] }
 0x1f4   :  { %853 = vmatpush.msrb.mxu1 %v220_v39  ;;  %v218_v39 = vld [vmem:[#allocation8 + $0x30] sm:$0xff] }
 0x1f5   :  { %v634_v53 = vsub.f32 %v620_v15, %v632_v48  ;;  %v233_v15 = vld [vmem:[#allocation8 + $0xa8] sm:$0xff] }
 0x1f6   :  { %870 = vmatpush.msrb.mxu0 %v233_v15  ;;  %854 = vmatpush.msrb.mxu1 %v216_v43  ;;  %v254_v15 = vld [vmem:[#allocation8 + $0x150] sm:$0xff]  ;;  %v4877_v43 = vpop.f32.mrf.mxu0 }
 0x1f7   :  { %v4826_v58 = vpop.eup %3572  ;;  %v637_v59 = vmul.f32 1.442695, %v634_v53  ;;  %6630 = vst [vmem:[#allocation26_spill] sm:$0xff] %v4877_v43  ;;  %v3763_v43 = vld [vmem:[#allocation8 + $0xc0] sm:$0xff] }
 0x1f8   :  { %v639_v63 = vrot.slane %v4826_v58, 4  ;;  %871 = vmatpush.msrb.mxu0 %v229_v22  ;;  %855 = vmatpush.msrb.mxu1 %v212_v46  ;;  %v243_v22 = vld [vmem:[#allocation8 + $0xf8] sm:$0xff]  ;;  %v402_v46 = vld [vmem:[#allocation11 + $0x1e8] sm:$0xff] }
 0x1f9   :  { %3574 = vpow2.f32 %v637_v59  ;;  %856 = vmatmul.f32.vlgmr.msrb.gmra.mxu1 %v4501_v25 }
 0x1fa   :  { %v640_v5 = vadd.f32 %v4826_v58, %v639_v63  ;;  %872 = vmatpush.msrb.mxu0 %v225_v36  ;;  %v222_v36 = vld [vmem:[#allocation8 + $0x50] sm:$0xff] }
 0x1fc   :  { %v641_v9 = vrot.slane %v640_v5, 2  ;;  %873 = vmatpush.msrb.mxu0 %v221_v40  ;;  %v219_v40 = vld [vmem:[#allocation8 + $0x38] sm:$0xff] }
 0x1fe   :  { %v642_v14 = vadd.f32 %v641_v9, %v640_v5  ;;  %874 = vmatpush.msrb.mxu0 %v217_v44  ;;  %v274_v5 = vld [vmem:[#allocation8 + $0x1f0] sm:$0xff]  ;;  %v4879_v44 = vpop.f32.mrf.mxu3 }
 0x1ff   :  { %v3575_v17 = vpop.eup %3574  ;;  %v266_v9 = vld [vmem:[#allocation8 + $0x1b0] sm:$0xff] }
 0x200   :  { %v643_v20 = vrot.slane %v642_v14, 1  ;;  %v645_v21 = vrot.slane %v3575_v17, 4  ;;  %875 = vmatpush.msrb.mxu0 %v213_v47  ;;  %v403_v47 = vld [vmem:[#allocation11 + $0x1f0] sm:$0xff] }
 0x201   :  { %876 = vmatmul.f32.vlgmr.msrb.gmra.mxu0 %v4501_v25 }
 0x202   :  { %v644_v27 = vadd.f32 %v643_v20, %v642_v14  ;;  %v646_v28 = vadd.f32 %v3575_v17, %v645_v21  ;;  %v259_v14 = vld [vmem:[#allocation8 + $0x178] sm:$0xff]  ;;  %v242_v21 = vld [vmem:[#allocation8 + $0xf0] sm:$0xff]  ;;  %1020 = vmatpush.msra.mxu0 %v402_v46 }
 0x203   :  { %v247_v20 = vld [vmem:[#allocation8 + $0x118] sm:$0xff]  ;;  %v355_v46 = vld [vmem:[#allocation11 + $0x70] sm:$0xff] }
 0x204   :  { %3576 = vrcp.f32 %v644_v27  ;;  %v647_v31 = vrot.slane %v646_v28, 2  ;;  %v234_v27 = vld [vmem:[#allocation8 + $0xb0] sm:$0xff] }
 0x206   :  { %v648_v33 = vadd.f32 %v647_v31, %v646_v28  ;;  %v235_v28 = vld [vmem:[#allocation8 + $0xb8] sm:$0xff] }
 0x207   :  { %v231_v31 = vld [vmem:[#allocation8 + $0x98] sm:$0xff] }
 0x208   :  { %v649_v38 = vrot.slane %v648_v33, 1 }
 0x20a   :  { %v3577_v41 = vpop.eup %3576  ;;  %v650_v42 = vadd.f32 %v649_v38, %v648_v33  ;;  %v226_v33 = vld [vmem:[#allocation8 + $0x70] sm:$0xff]  ;;  %v223_v38 = vld [vmem:[#allocation8 + $0x58] sm:$0xff] }
 0x20b   :  { %v653_v45 = vmul.f32 %v3577_v41, %v4826_v58  ;;  %v214_v41 = vld [vmem:[#allocation8 + $0x10] sm:$0xff] }
 0x20c   :  { %3578 = vrcp.f32 %v650_v42  ;;  %v215_v42 = vld [vmem:[#allocation8 + $0x18] sm:$0xff] }
 0x20d   :  { %v655_v48 = vmul.f32 %v653_v45, %v4673_v4  ;;  %v401_v45 = vld [vmem:[#allocation11 + $0x1e0] sm:$0xff] }
 0x20e   :  { %1000 = vmatpush.msra.mxu1 %v401_v45  ;;  %v354_v45 = vld [vmem:[#allocation11 + $0x68] sm:$0xff] }
 0x20f   :  { %v657_v49 = vsel %vm447_vm0, %v655_v48, 0.0  ;;  %v404_v48 = vld [vmem:[#allocation11 + $0x1f8] sm:$0xff] }
 0x210   :  { %v658_v51 = vrot.slane %v657_v49, 4 }
 0x212   :  { %v3579_v52 = vpop.eup %3578  ;;  %v659_v53 = vadd.f32 %v658_v51, %v657_v49  ;;  %v397_v49 = vld [vmem:[#allocation11 + $0x1c0] sm:$0xff]  ;;  %v398_v51 = vld [vmem:[#allocation11 + $0x1c8] sm:$0xff] }
 0x213   :  { %v654_v54 = vmul.f32 %v3579_v52, %v3575_v17  ;;  %v250_v17 = vld [vmem:[#allocation8 + $0x130] sm:$0xff]  ;;  %1001 = vmatpush.msra.mxu1 %v397_v49  ;;  %1021 = vmatpush.msra.mxu0 %v398_v51  ;;  %v4929_v49 = vld [vmem:[#allocation11 + $0x40] sm:$0xff]  ;;  %v350_v51 = vld [vmem:[#allocation11 + $0x48] sm:$0xff] }
 0x214   :  { %v660_v57 = vrot.slane %v659_v53, 2  ;;  %v399_v52 = vld [vmem:[#allocation11 + $0x1d0] sm:$0xff] }
 0x215   :  { %v656_v56 = vmul.f32 %v654_v54, %v4741_v26  ;;  %v270_v26 = vld [vmem:[#allocation8 + $0x1d0] sm:$0xff]  ;;  %v4881_v54 = vld [vmem:[#allocation11 + $0x1a0] sm:$0xff] }
 0x216   :  { %v661_v60 = vadd.f32 %v660_v57, %v659_v53  ;;  %v400_v53 = vld [vmem:[#allocation11 + $0x1d8] sm:$0xff]  ;;  %v395_v57 = vld [vmem:[#allocation11 + $0x1b0] sm:$0xff]  ;;  %1002 = vmatpush.msra.mxu1 %v4881_v54 }
 0x217   :  { %v664_v58 = vsel %vm447_vm0, %v656_v56, 0.0  ;;  %v394_v56 = vld [vmem:[#allocation11 + $0x1a8] sm:$0xff] }
 0x218   :  { %v665_v59 = vrot.slane %v664_v58, 4  ;;  %v662_v63 = vrot.slane %v661_v60, 1  ;;  %1022 = vmatpush.msra.mxu0 %v394_v56 }
 0x21a   :  { %v666_v4 = vadd.f32 %v665_v59, %v664_v58  ;;  %v663_v2 = vadd.f32 %v662_v63, %v661_v60  ;;  %v396_v58 = vld [vmem:[#allocation11 + $0x1b8] sm:$0xff]  ;;  %v4884_v59 = vld [vmem:[#allocation11 + $0x180] sm:$0xff]  ;;  %v390_v60 = vld [vmem:[#allocation11 + $0x188] sm:$0xff] }
 0x21b   :  { %1003 = vmatpush.msra.mxu1 %v4884_v59  ;;  %1023 = vmatpush.msra.mxu0 %v390_v60  ;;  %v392_v63 = vld [vmem:[#allocation11 + $0x198] sm:$0xff] }
 0x21c   :  { %v667_v61 = vrot.slane %v666_v4, 2 }
 0x21e   :  { %v668_v0 = vadd.f32 %v667_v61, %v666_v4  ;;  %v391_v4 = vld [vmem:[#allocation11 + $0x190] sm:$0xff]  ;;  %v4886_v61 = vpop.f32.mrf.mxu0 }
 0x21f   :  { %6631 = vst [vmem:[#allocation27_spill] sm:$0xff] %v4886_v61 }
 0x220   :  { %v669_v1 = vrot.slane %v668_v0, 1 }
 0x222   :  { %v670_v3 = vadd.f32 %v669_v1, %v668_v0  ;;  %v4889_v0 = vpop.f32.mrf.mxu3  ;;  %v4891_v1 = vld [vmem:[#allocation11 + $0x160] sm:$0xff] }
 0x223   :  { %1004 = vmatpush.msra.mxu1 %v4891_v1 }
 0x224   :  { %v757_v7 = vsel %vm756_vm1, %v670_v3, %v663_v2  ;;  %v386_v2 = vld [vmem:[#allocation11 + $0x168] sm:$0xff]  ;;  %v387_v3 = vld [vmem:[#allocation11 + $0x170] sm:$0xff] }
 0x225   :  { %3490 = vmatmul.msk.f32.vlgmr.msra.gmra.mxu2 %vm447_vm0, %v757_v7  ;;  %3491 = vmatmul.msk.f32.vlgmr.msrb.gmra.mxu3 %vm447_vm0, %v757_v7 }
 0x226   :  { %880 = vmatpush.msra.mxu2 %v274_v5  ;;  %900 = vmatpush.msrb.mxu3 %v275_v6  ;;  %v388_v5 = vld [vmem:[#allocation11 + $0x178] sm:$0xff]  ;;  %v4894_v6 = vld [vmem:[#allocation11 + $0x140] sm:$0xff] }
 0x227   :  { %1024 = vmatpush.msra.mxu0 %v386_v2  ;;  %1005 = vmatpush.msra.mxu1 %v4894_v6 }
 0x228   :  { %881 = vmatpush.msra.mxu2 %v270_v26  ;;  %901 = vmatpush.msrb.mxu3 %v271_v8  ;;  %v383_v26 = vld [vmem:[#allocation11 + $0x150] sm:$0xff]  ;;  %v384_v8 = vld [vmem:[#allocation11 + $0x158] sm:$0xff] }
 0x22a   :  { %882 = vmatpush.msra.mxu2 %v266_v9  ;;  %902 = vmatpush.msrb.mxu3 %v267_v10  ;;  %v4897_v9 = vld [vmem:[#allocation11 + $0x120] sm:$0xff]  ;;  %v378_v10 = vld [vmem:[#allocation11 + $0x128] sm:$0xff] }
 0x22b   :  { %1006 = vmatpush.msra.mxu1 %v4897_v9 }
 0x22c   :  { %883 = vmatpush.msra.mxu2 %v262_v11  ;;  %903 = vmatpush.msrb.mxu3 %v263_v12  ;;  %v379_v11 = vld [vmem:[#allocation11 + $0x130] sm:$0xff]  ;;  %v380_v12 = vld [vmem:[#allocation11 + $0x138] sm:$0xff] }
 0x22d   :  { %3492 = vmatmul.msk.f32.vlgmr.msrb.gmra.mxu2 %vm447_vm0, %v757_v7  ;;  %3493 = vmatmul.msk.f32.vlgmr.msra.gmra.mxu3 %vm447_vm0, %v757_v7  ;;  %v382_v7 = vld [vmem:[#allocation11 + $0x148] sm:$0xff] }
 0x22e   :  { %884 = vmatpush.msra.mxu2 %v258_v13  ;;  %904 = vmatpush.msrb.mxu3 %v259_v14  ;;  %v4900_v13 = vld [vmem:[#allocation11 + $0x100] sm:$0xff]  ;;  %v374_v14 = vld [vmem:[#allocation11 + $0x108] sm:$0xff] }
 0x22f   :  { %1025 = vmatpush.msra.mxu0 %v382_v7  ;;  %1007 = vmatpush.msra.mxu1 %v4900_v13  ;;  %v346_v7 = vld [vmem:[#allocation11 + $0x28] sm:$0xff] }
 0x230   :  { %885 = vmatpush.msra.mxu2 %v254_v15  ;;  %905 = vmatpush.msrb.mxu3 %v255_v16  ;;  %v375_v15 = vld [vmem:[#allocation11 + $0x110] sm:$0xff]  ;;  %v376_v16 = vld [vmem:[#allocation11 + $0x118] sm:$0xff] }
 0x231   :  { %1026 = vmatpush.msra.mxu0 %v378_v10 }
 0x232   :  { %886 = vmatpush.msra.mxu2 %v250_v17  ;;  %906 = vmatpush.msrb.mxu3 %v251_v18  ;;  %v4903_v17 = vld [vmem:[#allocation11 + $0xe0] sm:$0xff]  ;;  %v370_v18 = vld [vmem:[#allocation11 + $0xe8] sm:$0xff] }
 0x233   :  { %1027 = vmatpush.msra.mxu0 %v374_v14  ;;  %1008 = vmatpush.msra.mxu1 %v4903_v17  ;;  %v344_v14 = vld [vmem:[#allocation11 + $0x18] sm:$0xff] }
 0x234   :  { %887 = vmatpush.msra.mxu2 %v246_v19  ;;  %907 = vmatpush.msrb.mxu3 %v247_v20  ;;  %v371_v19 = vld [vmem:[#allocation11 + $0xf0] sm:$0xff] }
 0x235   :  { %1028 = vmatpush.msra.mxu0 %v370_v18 }
 0x236   :  { %888 = vmatpush.msra.mxu2 %v242_v21  ;;  %908 = vmatpush.msrb.mxu3 %v243_v22  ;;  %v372_v21 = vld [vmem:[#allocation11 + $0xf8] sm:$0xff]  ;;  %v4908_v22 = vpop.f32.mrf.mxu2 }
 0x238   :  { %889 = vmatpush.msra.mxu2 %v238_v23  ;;  %909 = vmatpush.msrb.mxu3 %v239_v24  ;;  %v4910_v23 = vpop.f32.mrf.mxu3  ;;  %v4912_v24 = vld [vmem:[#allocation11 + $0xc0] sm:$0xff] }
 0x239   :  { %1009 = vmatpush.msra.mxu1 %v4912_v24 }
 0x23a   :  { %890 = vmatpush.msra.mxu2 %v234_v27  ;;  %910 = vmatpush.msrb.mxu3 %v235_v28  ;;  %v366_v27 = vld [vmem:[#allocation11 + $0xc8] sm:$0xff]  ;;  %v367_v28 = vld [vmem:[#allocation11 + $0xd0] sm:$0xff] }
 0x23b   :  { %1029 = vmatpush.msra.mxu0 %v366_v27  ;;  %v340_v27 = vld [vmem:[#allocation10 + $0x1f8] sm:$0xff] }
 0x23c   :  { %891 = vmatpush.msra.mxu2 %v230_v29  ;;  %911 = vmatpush.msrb.mxu3 %v231_v31  ;;  %v368_v29 = vld [vmem:[#allocation11 + $0xd8] sm:$0xff]  ;;  %v4915_v31 = vld [vmem:[#allocation11 + $0xa0] sm:$0xff] }
 0x23d   :  { %1010 = vmatpush.msra.mxu1 %v4915_v31 }
 0x23e   :  { %892 = vmatpush.msra.mxu2 %v226_v33  ;;  %912 = vmatpush.msrb.mxu3 %v227_v35  ;;  %v362_v33 = vld [vmem:[#allocation11 + $0xa8] sm:$0xff]  ;;  %v363_v35 = vld [vmem:[#allocation11 + $0xb0] sm:$0xff] }
 0x23f   :  { %1030 = vmatpush.msra.mxu0 %v362_v33  ;;  %v335_v33 = vld [vmem:[#allocation10 + $0x1d0] sm:$0xff] }
 0x240   :  { %893 = vmatpush.msra.mxu2 %v222_v36  ;;  %913 = vmatpush.msrb.mxu3 %v223_v38  ;;  %v364_v36 = vld [vmem:[#allocation11 + $0xb8] sm:$0xff]  ;;  %v4918_v38 = vld [vmem:[#allocation11 + $0x80] sm:$0xff] }
 0x241   :  { %1011 = vmatpush.msra.mxu1 %v4918_v38 }
 0x242   :  { %894 = vmatpush.msra.mxu2 %v218_v39  ;;  %914 = vmatpush.msrb.mxu3 %v219_v40  ;;  %v358_v39 = vld [vmem:[#allocation11 + $0x88] sm:$0xff]  ;;  %v359_v40 = vld [vmem:[#allocation11 + $0x90] sm:$0xff] }
 0x243   :  { %1031 = vmatpush.msra.mxu0 %v358_v39  ;;  %v336_v39 = vld [vmem:[#allocation10 + $0x1d8] sm:$0xff] }
 0x244   :  { %895 = vmatpush.msra.mxu2 %v214_v41  ;;  %915 = vmatpush.msrb.mxu3 %v215_v42  ;;  %v360_v41 = vld [vmem:[#allocation11 + $0x98] sm:$0xff]  ;;  %v4921_v42 = vld [vmem:[#allocation11 + $0x60] sm:$0xff] }
 0x245   :  { %896 = vmatmul.f32.vlgmr.msra.gmra.mxu2 %v4501_v25  ;;  %916 = vmatmul.f32.vlgmr.msrb.gmra.mxu3 %v4501_v25 }
 0x246   :  { %1040 = vmatpush.msrb.mxu2 %v403_v47  ;;  %1060 = vmatpush.msra.mxu3 %v404_v48  ;;  %v4926_v47 = vld [vmem:[%s6476_s16] sm:$0xf]  ;;  %v356_v48 = vld [vmem:[#allocation11 + $0x78] sm:$0xff] }
 0x247   :  { %1012 = vmatpush.msra.mxu1 %v4921_v42  ;;  %1032 = vmatpush.msra.mxu0 %v354_v45  ;;  %v4935_v2 = vperm.slane %v4926_v47, 0  ;;  %v331_v45 = vld [vmem:[#allocation10 + $0x1b0] sm:$0xff] }
 0x248   :  { %1041 = vmatpush.msrb.mxu2 %v399_v52  ;;  %1061 = vmatpush.msra.mxu3 %v400_v53  ;;  %v351_v52 = vld [vmem:[#allocation11 + $0x50] sm:$0xff] }
 0x249   :  { %1013 = vmatpush.msra.mxu1 %v4929_v49  ;;  %1033 = vmatpush.msra.mxu0 %v350_v51  ;;  %6633 = vst [vmem:[#allocation29_spill] sm:$0xff] %v4935_v2  ;;  %v326_v51 = vld [vmem:[#allocation10 + $0x188] sm:$0xff] }
 0x24a   :  { %1042 = vmatpush.msrb.mxu2 %v395_v57  ;;  %1062 = vmatpush.msra.mxu3 %v396_v58  ;;  %v352_v57 = vld [vmem:[#allocation11 + $0x58] sm:$0xff] }
 0x24b   :  { %1034 = vmatpush.msra.mxu0 %v346_v7  ;;  %v319_v7 = vld [vmem:[#allocation10 + $0x150] sm:$0xff] }
 0x24c   :  { %1043 = vmatpush.msrb.mxu2 %v391_v4  ;;  %1063 = vmatpush.msra.mxu3 %v392_v63 }
 0x24e   :  { %1044 = vmatpush.msrb.mxu2 %v387_v3  ;;  %1064 = vmatpush.msra.mxu3 %v388_v5  ;;  %v4938_v3 = vperm.slane %v4926_v47, 1  ;;  %v4940_v5 = vld [vmem:[#allocation11 + $0x20] sm:$0xff] }
 0x24f   :  { %1014 = vmatpush.msra.mxu1 %v4940_v5 }
 0x250   :  { %1045 = vmatpush.msrb.mxu2 %v383_v26  ;;  %1065 = vmatpush.msra.mxu3 %v384_v8  ;;  %6634 = vst [vmem:[#allocation30_spill] sm:$0xff] %v4938_v3  ;;  %v347_v26 = vld [vmem:[#allocation11 + $0x30] sm:$0xff]  ;;  %v348_v8 = vld [vmem:[#allocation11 + $0x38] sm:$0xff] }
 0x252   :  { %1046 = vmatpush.msrb.mxu2 %v379_v11  ;;  %1066 = vmatpush.msra.mxu3 %v380_v12  ;;  %v343_v12 = vld [vmem:[#allocation11 + $0x10] sm:$0xff] }
 0x254   :  { %1047 = vmatpush.msrb.mxu2 %v375_v15  ;;  %1067 = vmatpush.msra.mxu3 %v376_v16  ;;  %v4946_v15 = vld [vmem:[#allocation10 + $0x1e0] sm:$0xff]  ;;  %v338_v16 = vld [vmem:[#allocation10 + $0x1e8] sm:$0xff] }
 0x256   :  { %1048 = vmatpush.msrb.mxu2 %v371_v19  ;;  %1068 = vmatpush.msra.mxu3 %v372_v21  ;;  %v339_v21 = vld [vmem:[#allocation10 + $0x1f0] sm:$0xff] }
 0x258   :  { %1049 = vmatpush.msrb.mxu2 %v367_v28  ;;  %1069 = vmatpush.msra.mxu3 %v368_v29  ;;  %v4951_v28 = vld [vmem:[#allocation10 + $0x1c0] sm:$0xff]  ;;  %v334_v29 = vld [vmem:[#allocation10 + $0x1c8] sm:$0xff] }
 0x25a   :  { %1050 = vmatpush.msrb.mxu2 %v363_v35  ;;  %1070 = vmatpush.msra.mxu3 %v364_v36 }
 0x25c   :  { %1051 = vmatpush.msrb.mxu2 %v359_v40  ;;  %1071 = vmatpush.msra.mxu3 %v360_v41  ;;  %v4954_v40 = vld [vmem:[#allocation10 + $0x1a0] sm:$0xff]  ;;  %v330_v41 = vld [vmem:[#allocation10 + $0x1a8] sm:$0xff] }
 0x25e   :  { %1052 = vmatpush.msrb.mxu2 %v355_v46  ;;  %1072 = vmatpush.msra.mxu3 %v356_v48  ;;  %v332_v46 = vld [vmem:[#allocation10 + $0x1b8] sm:$0xff]  ;;  %v4957_v48 = vld [vmem:[#allocation10 + $0x180] sm:$0xff] }
 0x260   :  { %1053 = vmatpush.msrb.mxu2 %v351_v52  ;;  %1073 = vmatpush.msra.mxu3 %v352_v57  ;;  %v327_v52 = vld [vmem:[#allocation10 + $0x190] sm:$0xff]  ;;  %v322_v57 = vld [vmem:[#allocation10 + $0x168] sm:$0xff] }
 0x262   :  { %1054 = vmatpush.msrb.mxu2 %v347_v26  ;;  %1074 = vmatpush.msra.mxu3 %v348_v8  ;;  %v320_v8 = vld [vmem:[#allocation10 + $0x158] sm:$0xff] }
 0x264   :  { %1055 = vmatpush.msrb.mxu2 %v343_v12  ;;  %1075 = vmatpush.msra.mxu3 %v344_v14  ;;  %v315_v12 = vld [vmem:[#allocation10 + $0x130] sm:$0xff] }
 0x265   :  { %1056 = vmatmul.f32.vlgmr.msrb.gmra.mxu2 %v4501_v25  ;;  %1076 = vmatmul.f32.vlgmr.msra.gmra.mxu3 %v4501_v25 }
 0x266   :  { %1120 = vmatpush.msra.mxu2 %v339_v21  ;;  %1140 = vmatpush.msrb.mxu3 %v340_v27  ;;  %v310_v21 = vld [vmem:[#allocation10 + $0x108] sm:$0xff]  ;;  %v311_v27 = vld [vmem:[#allocation10 + $0x110] sm:$0xff] }
 0x268   :  { %1121 = vmatpush.msra.mxu2 %v335_v33  ;;  %1141 = vmatpush.msrb.mxu3 %v336_v39  ;;  %v4976_v33 = vld [vmem:[#allocation10 + $0xe0] sm:$0xff]  ;;  %v308_v39 = vld [vmem:[#allocation10 + $0xf8] sm:$0xff] }
 0x26a   :  { %1122 = vmatpush.msra.mxu2 %v331_v45  ;;  %1142 = vmatpush.msrb.mxu3 %v332_v46  ;;  %v302_v45 = vld [vmem:[#allocation10 + $0xc8] sm:$0xff]  ;;  %v303_v46 = vld [vmem:[#allocation10 + $0xd0] sm:$0xff] }
 0x26c   :  { %1123 = vmatpush.msra.mxu2 %v327_v52 }
 0x26d   :  { %v4905_v20 = vpop.f32.mrf.mxu0 }
 0x26e   :  { %6632 = vst [vmem:[#allocation28_spill] sm:$0xff] %v4905_v20 }
 0x276   :  { %v857_v53 = vpop.f32.mrf.mxu1 }
 0x27e   :  { %v877_v56 = vpop.f32.mrf.mxu0 }
 0x2a8   :  { %v777_v58 = vpop.f32.mrf.mxu2  ;;  %v797_v60 = vpop.f32.mrf.mxu3 }
 0x2a9   :  { %v778_v4 = vadd.f32 %v777_v58, %v4879_v44  ;;  %v798_v63 = vadd.f32 %v797_v60, %v4889_v0  ;;  %v4943_v44 = vld [vmem:[#allocation11] sm:$0xff]  ;;  %v342_v0 = vld [vmem:[#allocation11 + $0x8] sm:$0xff]  ;;  %v323_v58 = vld [vmem:[#allocation10 + $0x170] sm:$0xff] }
 0x2aa   :  { %1015 = vmatpush.msra.mxu1 %v4943_v44  ;;  %1035 = vmatpush.msra.mxu0 %v342_v0  ;;  %v324_v60 = vld [vmem:[#allocation10 + $0x178] sm:$0xff]  ;;  %v314_v0 = vld [vmem:[#allocation10 + $0x128] sm:$0xff] }
 0x2ab   :  { %v920_v10 = vadd.f32 %v857_v53, %v778_v4  ;;  %v921_v11 = vadd.f32 %v877_v56, %v798_v63  ;;  %v328_v53 = vld [vmem:[#allocation10 + $0x198] sm:$0xff]  ;;  %v4960_v56 = vld [vmem:[#allocation10 + $0x160] sm:$0xff]  ;;  %v318_v63 = vld [vmem:[#allocation10 + $0x148] sm:$0xff]  ;;  %1124 = vmatpush.msra.mxu2 %v323_v58  ;;  %1016 = vmatmul.f32.vlgmr.msra.gmra.mxu1 %v4501_v25 }
 0x2ac   :  { %1080 = vmatpush.msrb.mxu1 %v4946_v15  ;;  %1100 = vmatpush.msrb.mxu0 %v338_v16  ;;  %v4963_v4 = vld [vmem:[#allocation10 + $0x140] sm:$0xff]  ;;  %v316_v16 = vld [vmem:[#allocation10 + $0x138] sm:$0xff]  ;;  %v298_v58 = vld [vmem:[#allocation10 + $0xa8] sm:$0xff] }
 0x2ad   :  { %v933_v18 = vadd.f32 %v4935_v2, %v920_v10  ;;  %v934_v19 = vadd.f32 %v4938_v3, %v921_v11  ;;  %1143 = vmatpush.msrb.mxu3 %v328_v53  ;;  %v4966_v11 = vld [vmem:[#allocation10 + $0x120] sm:$0xff]  ;;  %1125 = vmatpush.msra.mxu2 %v319_v7 }
 0x2ae   :  { %1081 = vmatpush.msrb.mxu1 %v4951_v28  ;;  %1101 = vmatpush.msrb.mxu0 %v334_v29  ;;  %v312_v29 = vld [vmem:[#allocation10 + $0x118] sm:$0xff]  ;;  %v4987_v7 = vld [vmem:[#allocation10 + $0x80] sm:$0xff] }
 0x2af   :  { %v3494_v35 = vmul.f32 -1.442695, %v933_v18  ;;  %v3495_v36 = vmul.f32 -1.442695, %v934_v19  ;;  %1144 = vmatpush.msrb.mxu3 %v324_v60  ;;  %v4973_v19 = vld [vmem:[#allocation10 + $0x100] sm:$0xff]  ;;  %1126 = vmatpush.msra.mxu2 %v315_v12  ;;  %v299_v60 = vld [vmem:[#allocation10 + $0xb0] sm:$0xff] }
 0x2b0   :  { %1082 = vmatpush.msrb.mxu1 %v4954_v40  ;;  %1102 = vmatpush.msrb.mxu0 %v330_v41  ;;  %v4981_v41 = vld [vmem:[#allocation10 + $0xc0] sm:$0xff]  ;;  %v817_v52 = vpop.f32.mrf.mxu2  ;;  %v837_v53 = vpop.f32.mrf.mxu3 }
 0x2b1   :  { %3580 = vpow2.f32 %v3494_v35  ;;  %1145 = vmatpush.msrb.mxu3 %v320_v8  ;;  %v306_v35 = vld [vmem:[#allocation10 + $0xe8] sm:$0xff]  ;;  %1127 = vmatpush.msra.mxu2 %v311_v27  ;;  %v291_v27 = vld [vmem:[#allocation10 + $0x70] sm:$0xff]  ;;  %v3757_v2 = vld [vmem:[#allocation8 + $0x180] sm:$0xff] }
 0x2b2   :  { %3582 = vpow2.f32 %v3495_v36  ;;  %1083 = vmatpush.msrb.mxu1 %v4957_v48  ;;  %1103 = vmatpush.msrb.mxu0 %v326_v51  ;;  %v307_v36 = vld [vmem:[#allocation10 + $0xf0] sm:$0xff]  ;;  %v304_v51 = vld [vmem:[#allocation10 + $0xd8] sm:$0xff] }
 0x2b3   :  { %1146 = vmatpush.msrb.mxu3 %v316_v16  ;;  %1128 = vmatpush.msra.mxu2 %v307_v36  ;;  %v4994_v16 = vld [vmem:[#allocation10 + $0x60] sm:$0xff] }
 0x2b4   :  { %1084 = vmatpush.msrb.mxu1 %v4960_v56  ;;  %1104 = vmatpush.msrb.mxu0 %v322_v57  ;;  %v4984_v57 = vld [vmem:[#allocation10 + $0xa0] sm:$0xff] }
 0x2b5   :  { %1147 = vmatpush.msrb.mxu3 %v312_v29  ;;  %1129 = vmatpush.msra.mxu2 %v303_v46  ;;  %v292_v29 = vld [vmem:[#allocation10 + $0x78] sm:$0xff]  ;;  %v5008_v46 = vld [vmem:[#allocation10 + $0x40] sm:$0xff] }
 0x2b6   :  { %1085 = vmatpush.msrb.mxu1 %v4963_v4  ;;  %1105 = vmatpush.msrb.mxu0 %v318_v63  ;;  %v300_v63 = vld [vmem:[#allocation10 + $0xb8] sm:$0xff] }
 0x2b7   :  { %v3581_v26 = vpop.eup %3580  ;;  %1148 = vmatpush.msrb.mxu3 %v308_v39  ;;  %1130 = vmatpush.msra.mxu2 %v299_v60  ;;  %v838_v39 = vadd.f32 %v837_v53, %v4910_v23  ;;  %v5012_v53 = vld [vmem:[#allocation10 + $0x20] sm:$0xff] }
 0x2b8   :  { %v3583_v10 = vpop.eup %3582  ;;  %v4968_v14 = vadd.f32 1.0, %v3581_v26  ;;  %1086 = vmatpush.msrb.mxu1 %v4966_v11  ;;  %1106 = vmatpush.msrb.mxu0 %v314_v0  ;;  %v294_v26 = vld [vmem:[#allocation10 + $0x88] sm:$0xff]  ;;  %v296_v0 = vld [vmem:[#allocation10 + $0x98] sm:$0xff] }
 0x2b9   :  { %v4970_v18 = vadd.f32 1.0, %v3583_v10  ;;  %1149 = vmatpush.msrb.mxu3 %v304_v51  ;;  %v295_v10 = vld [vmem:[#allocation10 + $0x90] sm:$0xff]  ;;  %1036 = vmatmul.f32.vlgmr.msra.gmra.mxu0 %v4501_v25  ;;  %v286_v51 = vld [vmem:[#allocation10 + $0x48] sm:$0xff]  ;;  %v5015_v25 = vperm.slane %v4926_v47, 2 }
 0x2ba   :  { %1087 = vmatpush.msrb.mxu1 %v4973_v19  ;;  %1107 = vmatpush.msrb.mxu0 %v310_v21  ;;  %3584 = vrcp.f32 %v4968_v14  ;;  %v290_v21 = vld [vmem:[#allocation10 + $0x68] sm:$0xff]  ;;  %vm946_vm4 = vweird.f32 %v4968_v14 }
 0x2bb   :  { %3586 = vrcp.f32 %v4970_v18  ;;  %1150 = vmatpush.msrb.mxu3 %v300_v63  ;;  %1131 = vmatpush.msra.mxu2 %v295_v10  ;;  %v288_v10 = vld [vmem:[#allocation10 + $0x58] sm:$0xff]  ;;  %6636 = vst [vmem:[#allocation32_spill] sm:$0xff] %v5015_v25  ;;  %vm965_vm5 = vweird.f32 %v4970_v18 }
 0x2bc   :  { %1088 = vmatpush.msrb.mxu1 %v4976_v33  ;;  %1108 = vmatpush.msrb.mxu0 %v306_v35 }
 0x2bd   :  { %1151 = vmatpush.msrb.mxu3 %v296_v0  ;;  %1132 = vmatpush.msra.mxu2 %v291_v27  ;;  %v282_v0 = vld [vmem:[#allocation10 + $0x28] sm:$0xff]  ;;  %v5019_v27 = vld [vmem:[#allocation10] sm:$0xff] }
 0x2be   :  { %1089 = vmatpush.msrb.mxu1 %v4981_v41  ;;  %1109 = vmatpush.msrb.mxu0 %v302_v45  ;;  %v5004_v45 = vperm.slane %v4926_v47, 3  ;;  %v280_v47 = vld [vmem:[#allocation10 + $0x18] sm:$0xff] }
 0x2bf   :  { %1152 = vmatpush.msrb.mxu3 %v292_v29  ;;  %v278_v29 = vld [vmem:[#allocation10 + $0x8] sm:$0xff] }
 0x2c0   :  { %1090 = vmatpush.msrb.mxu1 %v4984_v57  ;;  %1110 = vmatpush.msrb.mxu0 %v298_v58  ;;  %v4989_v8 = vpop.eup %3584  ;;  %6635 = vst [vmem:[#allocation31_spill] sm:$0xff] %v5004_v45  ;;  %v818_v58 = vadd.f32 %v817_v52, %v4908_v22  ;;  %v283_v22 = vld [vmem:[#allocation10 + $0x30] sm:$0xff]  ;;  %v284_v52 = vld [vmem:[#allocation10 + $0x38] sm:$0xff] }
 0x2c1   :  { %v4991_v12 = vpop.eup %3586  ;;  %v942_v35 = vmul.f32 %v4989_v8, %v4968_v14  ;;  %1153 = vmatpush.msrb.mxu3 %v288_v10  ;;  %vm947_vm2 = vweird.f32 %v4989_v8 }
 0x2c2   :  { %1091 = vmatpush.msrb.mxu1 %v4987_v7  ;;  %1111 = vmatpush.msrb.mxu0 %v294_v26  ;;  %v961_v36 = vmul.f32 %v4991_v12, %v4970_v18  ;;  %v287_v26 = vld [vmem:[#allocation10 + $0x50] sm:$0xff]  ;;  %vm966_vm3 = vweird.f32 %v4991_v12  ;;  %vm5074_vm6 = vmor %vm946_vm4, %vm947_vm2 }
 0x2c3   :  { %v943_v34 = vsub.f32 1.0, %v942_v35  ;;  %1133 = vmatpush.msra.mxu2 %v287_v26  ;;  %1154 = vmatpush.msrb.mxu3 %v284_v52  ;;  %v5025_v35 = vld [vmem:[%s6480_s20 + $0x78] sm:$0xff]  ;;  %v3734_v26 = vld [vmem:[%s6617_s0 + $0x70] sm:$0xff]  ;;  %v971_v52 = vand.u32 2147483648, %v4970_v18  ;;  %vm5082_vm7 = vmor %vm965_vm5, %vm966_vm3 }
 0x2c4   :  { %1092 = vmatpush.msrb.mxu1 %v4994_v16  ;;  %1112 = vmatpush.msrb.mxu0 %v290_v21  ;;  %v962_v61 = vsub.f32 1.0, %v961_v36 }
 0x2c5   :  { %1134 = vmatpush.msra.mxu2 %v283_v22  ;;  %1155 = vmatpush.msrb.mxu3 %v280_v47  ;;  %v3735_v22 = vld [vmem:[%s6621_s5] sm:$0xff] }
 0x2c6   :  { %1093 = vmatpush.msrb.mxu1 %v5008_v46  ;;  %1113 = vmatpush.msrb.mxu0 %v286_v51  ;;  %v963_v51 = vmul.f32 %v4991_v12, %v962_v61  ;;  %v5043_v61 = vld [vmem:[%s6480_s20 + $0x68] sm:$0xff] }
 0x2c8   :  { %v897_v60 = vpop.f32.mrf.mxu2  ;;  %v917_v63 = vpop.f32.mrf.mxu3  ;;  %1094 = vmatpush.msrb.mxu1 %v5012_v53  ;;  %1114 = vmatpush.msrb.mxu0 %v282_v0  ;;  %v5059_v0 = vld [vmem:[%s6480_s20 + $0x60] sm:$0xff] }
 0x2c9   :  { %v923_v23 = vadd.f32 %v917_v63, %v838_v39  ;;  %v922_v20 = vadd.f32 %v897_v60, %v818_v58  ;;  %v279_v39 = vld [vmem:[#allocation10 + $0x10] sm:$0xff]  ;;  %v944_v60 = vmul.f32 %v4989_v8, %v943_v34  ;;  %v5034_v63 = vld [vmem:[%s6480_s20 + $0x70] sm:$0xff]  ;;  %v3733_v34 = vld [vmem:[%s6621_s5 + $0x8] sm:$0xff] }
 0x2ca   :  { %1095 = vmatpush.msrb.mxu1 %v5019_v27  ;;  %1115 = vmatpush.msrb.mxu0 %v278_v29  ;;  %v3736_v29 = vld [vmem:[%s6617_s0 + $0x68] sm:$0xff] }
 0x2cb   :  { %v936_v21 = vadd.f32 %v5004_v45, %v923_v23  ;;  %v935_v36 = vadd.f32 %v5015_v25, %v922_v20  ;;  %1135 = vmatpush.msra.mxu2 %v279_v39  ;;  %v3732_v20 = vld [vmem:[%s6617_s0 + $0x78] sm:$0xff]  ;;  %1343 = vmatpush.msra.mxu3 %v3733_v34  ;;  %v945_v10 = vadd.f32 %v4989_v8, %v944_v60  ;;  %v3756_v25 = vld [vmem:[#allocation8 + $0x1a0] sm:$0xff] }
 0x2cc   :  { %1239 = vmatpush.msra.mxu1 %v5025_v35  ;;  %v964_v23 = vadd.f32 %v4991_v12, %v963_v51 }
 0x2cd   :  { %v3496_v58 = vmul.f32 -1.442695, %v936_v21  ;;  %1289 = vmatpush.msrb.mxu2 %v3732_v20  ;;  %1344 = vmatpush.msra.mxu3 %v3735_v22  ;;  %v952_v21 = vand.u32 2147483648, %v4968_v14  ;;  %v3737_v20 = vld [vmem:[%s6617_s0 + $0x60] sm:$0xff]  ;;  %v972_v22 = vor.u32 1.1754944e-38, %v971_v52 }
 0x2ce   :  { %1240 = vmatpush.msra.mxu1 %v5034_v63  ;;  %v3741_v52 = vld [vmem:[%s6617_s0 + $0x40] sm:$0xff] }
 0x2cf   :  { %3588 = vpow2.f32 %v3496_v58  ;;  %1290 = vmatpush.msrb.mxu2 %v3734_v26  ;;  %v950_v58 = vand.u32 2147483647, %v4968_v14  ;;  %v949_v14 = vsel %vm5074_vm6, %v4989_v8, %v945_v10  ;;  %v953_v26 = vor.u32 1.1754944e-38, %v952_v21  ;;  %v3739_v8 = vld [vmem:[%s6617_s0 + $0x50] sm:$0xff] }
 0x2d0   :  { %3590 = vtanh.f32 %v935_v36  ;;  %1241 = vmatpush.msra.mxu1 %v5043_v61  ;;  %v969_v36 = vand.u32 2147483647, %v4970_v18  ;;  %v968_v18 = vsel %vm5082_vm7, %v4991_v12, %v964_v23  ;;  %v3740_v12 = vld [vmem:[%s6617_s0 + $0x48] sm:$0xff] }
 0x2d1   :  { %1291 = vmatpush.msrb.mxu2 %v3736_v29  ;;  %v3738_v29 = vld [vmem:[%s6617_s0 + $0x58] sm:$0xff]  ;;  %vm951_vm8 = vcmp.eq.f32.partialorder %v950_v58, 8.507059e+37 }
 0x2d2   :  { %1242 = vmatpush.msra.mxu1 %v5059_v0  ;;  %vm970_vm9 = vcmp.eq.f32.partialorder %v969_v36, 8.507059e+37  ;;  %v3742_v36 = vld [vmem:[%s6617_s0 + $0x38] sm:$0xff] }
 0x2d3   :  { %1292 = vmatpush.msrb.mxu2 %v3737_v20  ;;  %v973_v20 = vsel %vm970_vm9, %v972_v22, %v968_v18  ;;  %v3744_v22 = vld [vmem:[%s6617_s0 + $0x28] sm:$0xff] }
 0x2d4   :  { %v995_v23 = vmul.f32 0.0, %v973_v20 }
 0x2d5   :  { %v3589_v39 = vpop.eup %3588  ;;  %1293 = vmatpush.msrb.mxu2 %v3738_v29 }
 0x2d6   :  { %v979_v60 = vadd.f32 1.0, %v3589_v39  ;;  %v3591_v34 = vpop.eup %3590  ;;  %v954_v39 = vsel %vm951_vm8, %v953_v26, %v949_v14  ;;  %v3743_v14 = vld [vmem:[%s6617_s0 + $0x30] sm:$0xff] }
 0x2d7   :  { %1294 = vmatpush.msrb.mxu2 %v3739_v8  ;;  %v996_v10 = vmul.f32 %v3591_v34, %v954_v39  ;;  %v5123_v39 = vld [vmem:[%s6617_s0 + $0x20] sm:$0xff] }
 0x2d8   :  { %3592 = vrcp.f32 %v979_v60  ;;  %v991_v18 = vand.u32 2147483648, %v979_v60  ;;  %v989_v26 = vand.u32 2147483647, %v979_v60  ;;  %vm985_vm11 = vweird.f32 %v979_v60  ;;  %6642 = vst [vmem:[#allocation34_spill] sm:$0xff] %v5123_v39 }
 0x2d9   :  { %1295 = vmatpush.msrb.mxu2 %v3740_v12  ;;  %v5108_v47 = vadd.f32 %v996_v10, %v995_v23  ;;  %v5129_v10 = vld [vmem:[%s6617_s0 + $0x18] sm:$0xff] }
 0x2da   :  { %v992_v20 = vor.u32 1.1754944e-38, %v991_v18  ;;  %vm990_vm13 = vcmp.eq.f32.partialorder %v989_v26, 8.507059e+37  ;;  %6643 = vst [vmem:[#allocation35_spill] sm:$0xff] %v5129_v10  ;;  %v3753_v18 = vld [vmem:[%s6473_s13] sm:$0xff]  ;;  %v5176_v26 = vld [vmem:[%s6480_s20 + $0x50] sm:$0xff] }
 0x2db   :  { %1296 = vmatpush.msrb.mxu2 %v3741_v52  ;;  %6641 = vst [vmem:[#allocation33_spill] sm:$0xff] %v5108_v47  ;;  %3594 = vtanh.f32 %v5108_v47  ;;  %v5137_v52 = vld [vmem:[%s6617_s0 + $0x10] sm:$0xff] }
 0x2dc   :  { %6644 = vst [vmem:[#allocation36_spill] sm:$0xff] %v5137_v52  ;;  %v3755_v47 = vld [vmem:[#allocation8 + $0x1c0] sm:$0xff] }
 0x2dd   :  { %1297 = vmatpush.msrb.mxu2 %v3742_v36  ;;  %v5156_v36 = vld [vmem:[%s6617_s0] sm:$0xff] }
 0x2de   :  { %v3593_v21 = vpop.eup %3592  ;;  %6646 = vst [vmem:[#allocation38_spill] sm:$0xff] %v5156_v36 }
 0x2df   :  { %v981_v58 = vmul.f32 %v3593_v21, %v979_v60  ;;  %1298 = vmatpush.msrb.mxu2 %v3743_v14  ;;  %vm986_vm10 = vweird.f32 %v3593_v21  ;;  %v3752_v14 = vld [vmem:[%s6473_s13 + $0x20] sm:$0xff] }
 0x2e0   :  { %vm987_vm12 = vmor %vm985_vm11, %vm986_vm10 }
 0x2e1   :  { %v982_v51 = vsub.f32 1.0, %v981_v58  ;;  %1299 = vmatpush.msrb.mxu2 %v3744_v22  ;;  %v3595_v12 = vpop.eup %3594  ;;  %v3749_v58 = vld [vmem:[%s6474_s14 + $0x28] sm:$0xff] }
 0x2e2   :  { %v5182_v22 = vld [vmem:[%s6480_s20 + $0x48] sm:$0xff] }
 0x2e3   :  { %v983_v34 = vmul.f32 %v3593_v21, %v982_v51  ;;  %1300 = vmatpush.msrb.mxu2 %v5123_v39  ;;  %v3751_v51 = vld [vmem:[%s6474_s14 + $0x8] sm:$0xff] }
 0x2e4   :  { %v3760_v39 = vld [vmem:[#allocation8 + $0x120] sm:$0xff] }
 0x2e5   :  { %v984_v29 = vadd.f32 %v3593_v21, %v983_v34  ;;  %1301 = vmatpush.msrb.mxu2 %v5129_v10  ;;  %v5171_v34 = vld [vmem:[%s6480_s20 + $0x58] sm:$0xff] }
 0x2e6   :  { %1243 = vmatpush.msra.mxu1 %v5171_v34 }
 0x2e7   :  { %v988_v8 = vsel %vm987_vm12, %v3593_v21, %v984_v29  ;;  %1302 = vmatpush.msrb.mxu2 %v5137_v52  ;;  %v5147_v21 = vld [vmem:[%s6617_s0 + $0x8] sm:$0xff]  ;;  %v5189_v29 = vld [vmem:[%s6480_s20 + $0x40] sm:$0xff]  ;;  %vm1263_vm12 = vcmask 523264  }
 0x2e8   :  { %v993_v60 = vsel %vm990_vm13, %v992_v20, %v988_v8  ;;  %6645 = vst [vmem:[#allocation37_spill] sm:$0xff] %v5147_v21  ;;  %1244 = vmatpush.msra.mxu1 %v5176_v26  ;;  %v5195_v20 = vld [vmem:[%s6480_s20 + $0x38] sm:$0xff]  ;;  %v5201_v8 = vld [vmem:[%s6480_s20 + $0x30] sm:$0xff]  ;;  %v405_v52 = vld [vmem:[%s6479_s19] sm:$0xf]  ;;  %v1077_v10 = vpop.f32.mrf.mxu3  ;;  %v1057_v30 = vpop.f32.mrf.mxu2 }
 0x2e9   :  { %v5132_v23 = vmul.f32 %v3595_v12, %v993_v60  ;;  %1303 = vmatpush.msrb.mxu2 %v5147_v21  ;;  %6647 = vst [vmem:[#allocation39_spill] sm:$0xff] %v5189_v29  ;;  %v5207_v12 = vld [vmem:[%s6480_s20 + $0x28] sm:$0xff]  ;;  %v5213_v60 = vld [vmem:[%s6480_s20 + $0x20] sm:$0xff] }
 0x2ea   :  { %1245 = vmatpush.msra.mxu1 %v5182_v22  ;;  %6648 = vst [vmem:[#allocation40_spill] sm:$0xff] %v5195_v20  ;;  %v3759_v21 = vld [vmem:[#allocation8 + $0x140] sm:$0xff] }
 0x2eb   :  { %1096 = vmatmul.f32.vlgmr.msrb.gmra.mxu1 %v5132_v23  ;;  %1116 = vmatmul.f32.vlgmr.msrb.gmra.mxu0 %v5132_v23  ;;  %6649 = vst [vmem:[#allocation41_spill] sm:$0xff] %v5201_v8 }
 0x2ec   :  { %1136 = vmatmul.f32.vlgmr.msra.gmra.mxu2 %v5132_v23  ;;  %1156 = vmatmul.f32.vlgmr.msrb.gmra.mxu3 %v5132_v23  ;;  %6650 = vst [vmem:[#allocation42_spill] sm:$0xff] %v5207_v12 }
 0x2ed   :  { %1455 = vmatpush.msrb.mxu3 %v3749_v58  ;;  %1304 = vmatpush.msrb.mxu2 %v5156_v36  ;;  %6651 = vst [vmem:[#allocation43_spill] sm:$0xff] %v5213_v60  ;;  %v5219_v58 = vld [vmem:[%s6480_s20 + $0x18] sm:$0xff]  ;;  %v3758_v36 = vld [vmem:[#allocation8 + $0x160] sm:$0xff] }
 0x2ee   :  { %1246 = vmatpush.msra.mxu1 %v5189_v29  ;;  %6652 = vst [vmem:[#allocation44_spill] sm:$0xff] %v5219_v58 }
 0x2ef   :  { %1456 = vmatpush.msrb.mxu3 %v3751_v51  ;;  %1520 = vmatpush.msra.mxu2 %v3752_v14  ;;  %v5225_v51 = vld [vmem:[%s6480_s20 + $0x10] sm:$0xff]  ;;  %v5231_v14 = vld [vmem:[%s6480_s20 + $0x8] sm:$0xff] }
 0x2f0   :  { %1247 = vmatpush.msra.mxu1 %v5195_v20  ;;  %6653 = vst [vmem:[#allocation45_spill] sm:$0xff] %v5225_v51 }
 0x2f1   :  { %1521 = vmatpush.msra.mxu2 %v3753_v18  ;;  %6654 = vst [vmem:[#allocation46_spill] sm:$0xff] %v5231_v14  ;;  %v5237_v18 = vld [vmem:[%s6480_s20] sm:$0xff] }
 0x2f2   :  { %1248 = vmatpush.msra.mxu1 %v5201_v8  ;;  %6655 = vst [vmem:[#allocation47_spill] sm:$0xff] %v5237_v18 }
 0x2f4   :  { %1249 = vmatpush.msra.mxu1 %v5207_v12 }
 0x2f6   :  { %1250 = vmatpush.msra.mxu1 %v5213_v60 }
 0x2f8   :  { %1251 = vmatpush.msra.mxu1 %v5219_v58  ;;  %v3765_v58 = vld [vmem:[#allocation8 + $0x80] sm:$0xff] }
 0x2fa   :  { %1252 = vmatpush.msra.mxu1 %v5225_v51  ;;  %v5249_v51 = vperm.slane %v405_v52, 3 }
 0x2fc   :  { %1253 = vmatpush.msra.mxu1 %v5231_v14  ;;  %v3764_v14 = vld [vmem:[#allocation8 + $0xa0] sm:$0xff]  ;;  %6658 = vst [vmem:[#allocation50_spill] sm:$0xff] %v5249_v51 }
 0x2fe   :  { %1254 = vmatpush.msra.mxu1 %v5237_v18 }
 0x300   :  { %1586 = vmatpush.msrb.mxu1 %v3754_v32  ;;  %v5243_v32 = vperm.slane %v405_v52, 0 }
 0x302   :  { %1587 = vmatpush.msrb.mxu1 %v3755_v47  ;;  %6656 = vst [vmem:[#allocation48_spill] sm:$0xff] %v5243_v32  ;;  %v5245_v47 = vperm.slane %v405_v52, 1 }
 0x304   :  { %1588 = vmatpush.msrb.mxu1 %v3756_v25  ;;  %6657 = vst [vmem:[#allocation49_spill] sm:$0xff] %v5245_v47  ;;  %v3761_v25 = vld [vmem:[#allocation8 + $0x100] sm:$0xff] }
 0x306   :  { %1589 = vmatpush.msrb.mxu1 %v3757_v2 }
 0x308   :  { %1590 = vmatpush.msrb.mxu1 %v3758_v36  ;;  %v3762_v36 = vld [vmem:[#allocation8 + $0xe0] sm:$0xff] }
 0x30a   :  { %1591 = vmatpush.msrb.mxu1 %v3759_v21 }
 0x30c   :  { %1592 = vmatpush.msrb.mxu1 %v3760_v39 }
 0x30e   :  { %1593 = vmatpush.msrb.mxu1 %v3761_v25 }
 0x310   :  { %1594 = vmatpush.msrb.mxu1 %v3762_v36 }
 0x312   :  { %1595 = vmatpush.msrb.mxu1 %v3763_v43 }
 0x314   :  { %1596 = vmatpush.msrb.mxu1 %v3764_v14 }
 0x316   :  { %1597 = vmatpush.msrb.mxu1 %v3765_v58  ;;  %v5252_v58 = vperm.slane %v405_v52, 2 }
 0x318   :  { %6659 = vst [vmem:[#allocation51_spill] sm:$0xff] %v5252_v58 }
 0x328   :  { %v1017_v45 = vpop.f32.mrf.mxu1 }
 0x336   :  { %v1037_v3 = vpop.f32.mrf.mxu0 }
 0x368   :  { %v1097_v62 = vpop.f32.mrf.mxu1  ;;  %v1117_v55 = vpop.f32.mrf.mxu0 }
 0x369   :  { %v1098_v2 = vadd.f32 %v1097_v62, %v1017_v45  ;;  %v1118_v50 = vadd.f32 %v1117_v55, %v1037_v3  ;;  %v3766_v62 = vld [vmem:[#allocation8 + $0x60] sm:$0xff] }
 0x36a   :  { %1598 = vmatpush.msrb.mxu1 %v3766_v62 }
 0x36b   :  { %v1169_v21 = vadd.f32 %v5243_v32, %v1098_v2  ;;  %v1170_v37 = vadd.f32 %v5245_v47, %v1118_v50  ;;  %v3767_v50 = vld [vmem:[#allocation8 + $0x40] sm:$0xff] }
 0x36c   :  { %1599 = vmatpush.msrb.mxu1 %v3767_v50  ;;  %v3768_v2 = vld [vmem:[#allocation8 + $0x20] sm:$0xff] }
 0x36d   :  { %v3497_v39 = vmul.f32 -1.442695, %v1169_v21  ;;  %v3498_v18 = vmul.f32 -1.442695, %v1170_v37 }
 0x36e   :  { %1600 = vmatpush.msrb.mxu1 %v3768_v2 }
 0x36f   :  { %3596 = vpow2.f32 %v3497_v39  ;;  %v1157_v25 = vpop.f32.mrf.mxu3  ;;  %v1137_v21 = vpop.f32.mrf.mxu2  ;;  %v3769_v39 = vld [vmem:[#allocation8] sm:$0xff] }
 0x370   :  { %3598 = vpow2.f32 %v3498_v18  ;;  %v1158_v55 = vadd.f32 %v1157_v25, %v1077_v10  ;;  %1601 = vmatpush.msrb.mxu1 %v3769_v39  ;;  %v1138_v10 = vadd.f32 %v1137_v21, %v1057_v30 }
 0x372   :  { %v1172_v3 = vadd.f32 %v5249_v51, %v1158_v55  ;;  %v1171_v62 = vadd.f32 %v5252_v58, %v1138_v10 }
 0x374   :  { %v3499_v43 = vmul.f32 -1.442695, %v1172_v3 }
 0x375   :  { %v3597_v45 = vpop.eup %3596 }
 0x376   :  { %v3599_v37 = vpop.eup %3598  ;;  %v1176_v14 = vadd.f32 1.0, %v3597_v45  ;;  %3600 = vpow2.f32 %v3499_v43 }
 0x377   :  { %v1195_v36 = vadd.f32 1.0, %v3599_v37 }
 0x378   :  { %3602 = vrcp.f32 %v1176_v14  ;;  %v1188_v37 = vand.u32 2147483648, %v1176_v14  ;;  %v1186_v47 = vand.u32 2147483647, %v1176_v14  ;;  %vm1182_vm2 = vweird.f32 %v1176_v14 }
 0x379   :  { %3604 = vrcp.f32 %v1195_v36  ;;  %v1207_v51 = vand.u32 2147483648, %v1195_v36  ;;  %v1205_v52 = vand.u32 2147483647, %v1195_v36  ;;  %vm1201_vm3 = vweird.f32 %v1195_v36 }
 0x37a   :  { %v1189_v10 = vor.u32 1.1754944e-38, %v1188_v37  ;;  %vm1187_vm5 = vcmp.eq.f32.partialorder %v1186_v47, 8.507059e+37  ;;  %v5283_v37 = vld [vmem:[%s6482_s22 + $0x20] sm:$0xff] }
 0x37b   :  { %v1208_v60 = vor.u32 1.1754944e-38, %v1207_v51  ;;  %vm1206_vm7 = vcmp.eq.f32.partialorder %v1205_v52, 8.507059e+37  ;;  %v5296_v52 = vld [vmem:[%s6482_s22 + $0x18] sm:$0xff] }
 0x37c   :  { %v3601_v18 = vpop.eup %3600 }
 0x37d   :  { %v1215_v25 = vadd.f32 1.0, %v3601_v18 }
 0x37e   :  { %v3603_v55 = vpop.eup %3602 }
 0x37f   :  { %v3605_v3 = vpop.eup %3604  ;;  %v1178_v50 = vmul.f32 %v3603_v55, %v1176_v14  ;;  %3606 = vrcp.f32 %v1215_v25  ;;  %vm1183_vm14 = vweird.f32 %v3603_v55  ;;  %vm1221_vm9 = vweird.f32 %v1215_v25 }
 0x380   :  { %v1197_v2 = vmul.f32 %v3605_v3, %v1195_v36  ;;  %3608 = vtanh.f32 %v1171_v62  ;;  %vm1202_vm15 = vweird.f32 %v3605_v3  ;;  %vm1184_vm4 = vmor %vm1182_vm2, %vm1183_vm14  ;;  %v1227_v36 = vand.u32 2147483648, %v1215_v25 }
 0x381   :  { %v1179_v45 = vsub.f32 1.0, %v1178_v50  ;;  %vm1203_vm6 = vmor %vm1201_vm3, %vm1202_vm15  ;;  %v1225_v51 = vand.u32 2147483647, %v1215_v25 }
 0x382   :  { %v1198_v43 = vsub.f32 1.0, %v1197_v2 }
 0x383   :  { %v1180_v39 = vmul.f32 %v3603_v55, %v1179_v45  ;;  %vm1226_vm11 = vcmp.eq.f32.partialorder %v1225_v51, 8.507059e+37 }
 0x384   :  { %v1199_v30 = vmul.f32 %v3605_v3, %v1198_v43 }
 0x385   :  { %v3607_v21 = vpop.eup %3606  ;;  %v1181_v18 = vadd.f32 %v3603_v55, %v1180_v39 }
 0x386   :  { %v1200_v58 = vadd.f32 %v3605_v3, %v1199_v30  ;;  %v1217_v32 = vmul.f32 %v3607_v21, %v1215_v25  ;;  %v3609_v62 = vpop.eup %3608  ;;  %vm1222_vm8 = vweird.f32 %v3607_v21  ;;  %v3771_v25 = vld [vmem:[#allocation11 + $0x1c0] sm:$0xff] }
 0x387   :  { %v1185_v50 = vsel %vm1184_vm4, %v3603_v55, %v1181_v18  ;;  %vm1223_vm10 = vmor %vm1221_vm9, %vm1222_vm8  ;;  %v1228_v55 = vor.u32 1.1754944e-38, %v1227_v36  ;;  %v5288_v30 = vld [vmem:[%s6473_s13 + $0x30] sm:$0xff] }
 0x388   :  { %v1190_v2 = vsel %vm1187_vm5, %v1189_v10, %v1185_v50  ;;  %v1204_v45 = vsel %vm1203_vm6, %v3605_v3, %v1200_v58  ;;  %v1218_v12 = vsub.f32 1.0, %v1217_v32  ;;  %v6672_v18 = vld [vmem:[#allocation23_spill] sm:$0xff] }
 0x389   :  { %v1209_v43 = vsel %vm1206_vm7, %v1208_v60, %v1204_v45  ;;  %v1232_v8 = vmul.f32 %v3609_v62, %v1190_v2  ;;  %v5277_v60 = vld [vmem:[%s6482_s22 + $0x28] sm:$0xff]  ;;  %v3780_v50 = vld [vmem:[%s6474_s14 + $0x38] sm:$0xff] }
 0x38a   :  { %v1231_v20 = vmul.f32 0.0, %v1209_v43  ;;  %v1219_v29 = vmul.f32 %v3607_v21, %v1218_v12  ;;  %v3770_v12 = vld [vmem:[#allocation11 + $0x1e0] sm:$0xff]  ;;  %v3781_v2 = vld [vmem:[%s6474_s14 + $0x18] sm:$0xff]  ;;  %v3571_v43 = vld [vmem:[%s6483_s23] ss:$0 sm:$0xff] }
 0x38c   :  { %v5255_v39 = vadd.f32 %v1232_v8, %v1231_v20  ;;  %v1220_v14 = vadd.f32 %v3607_v21, %v1219_v29  ;;  %v5266_v29 = vld [vmem:[%s6482_s22 + $0x38] sm:$0xff]  ;;  %v5271_v8 = vld [vmem:[%s6482_s22 + $0x30] sm:$0xff] }
 0x38d   :  { %1275 = vmatpush.msra.mxu0 %v5266_v29 }
 0x38e   :  { %3610 = vtanh.f32 %v5255_v39  ;;  %v1224_v47 = vsel %vm1223_vm10, %v3607_v21, %v1220_v14  ;;  %v5301_v21 = vld [vmem:[%s6473_s13 + $0x10] sm:$0xff] }
 0x38f   :  { %v1229_v3 = vsel %vm1226_vm11, %v1228_v55, %v1224_v47  ;;  %1276 = vmatpush.msra.mxu0 %v5271_v8  ;;  %v3782_v47 = vld [vmem:[#allocation7] ss:$0 sm:$0xff] }
 0x391   :  { %1277 = vmatpush.msra.mxu0 %v5277_v60 }
 0x393   :  { %1278 = vmatpush.msra.mxu0 %v5283_v37 }
 0x394   :  { %v3611_v58 = vpop.eup %3610 }
 0x395   :  { %v5258_v32 = vmul.f32 %v3611_v58, %v1229_v3  ;;  %1279 = vmatpush.msra.mxu0 %v5296_v52  ;;  %v6673_v3 = vld [vmem:[#allocation24_spill] sm:$0xff] }
 0x397   :  { %1255 = vmatmul.f32.vlgmr.msra.gmra.mxu1 %v5258_v32  ;;  %v1288_v20 = vadd.f32 %v5258_v32, %v5132_v23 }
 0x398   :  { %1737 = vmatpush.msra.mxu1 %v3770_v12  ;;  %v6674_v12 = vld [vmem:[#allocation25_spill] sm:$0xff] }
 0x399   :  { %1305 = vmatmul.f32.vlgmr.msrb.gmra.mxu2 %v1288_v20 }
 0x39a   :  { %1738 = vmatpush.msra.mxu1 %v3771_v25  ;;  %1560 = vmatpush.msrb.mxu2 %v5288_v30 }
 0x39c   :  { %1739 = vmatpush.msra.mxu1 %v4881_v54  ;;  %1561 = vmatpush.msrb.mxu2 %v5301_v21  ;;  %v6660_v54 = vld [vmem:[#allocation39_spill] sm:$0xff] }
 0x39e   :  { %1740 = vmatpush.msra.mxu1 %v4884_v59  ;;  %v6661_v59 = vld [vmem:[#allocation40_spill] sm:$0xff] }
 0x39f   :  { %1602 = vmatmul.f32.vlgmr.msrb.gmra.mxu1 %v5132_v23 }
 0x3a0   :  { %1741 = vmatpush.msra.mxu1 %v4891_v1  ;;  %v6662_v1 = vld [vmem:[#allocation41_spill] sm:$0xff] }
 0x3a2   :  { %1742 = vmatpush.msra.mxu1 %v4894_v6  ;;  %v6663_v6 = vld [vmem:[#allocation42_spill] sm:$0xff] }
 0x3a4   :  { %1743 = vmatpush.msra.mxu1 %v4897_v9  ;;  %v6664_v9 = vld [vmem:[#allocation43_spill] sm:$0xff] }
 0x3a6   :  { %1744 = vmatpush.msra.mxu1 %v4900_v13  ;;  %v6665_v13 = vld [vmem:[#allocation44_spill] sm:$0xff] }
 0x3a8   :  { %1745 = vmatpush.msra.mxu1 %v4903_v17  ;;  %v6666_v17 = vld [vmem:[#allocation45_spill] sm:$0xff] }
 0x3aa   :  { %1746 = vmatpush.msra.mxu1 %v4912_v24  ;;  %v6667_v24 = vld [vmem:[#allocation46_spill] sm:$0xff] }
 0x3ac   :  { %1747 = vmatpush.msra.mxu1 %v4915_v31  ;;  %v5355_v31 = vld [vmem:[%s6482_s22 + $0x10] sm:$0xff] }
 0x3ad   :  { %1280 = vmatpush.msra.mxu0 %v5355_v31 }
 0x3ae   :  { %1748 = vmatpush.msra.mxu1 %v4918_v38  ;;  %v6668_v38 = vld [vmem:[#allocation47_spill] sm:$0xff] }
 0x3b0   :  { %1749 = vmatpush.msra.mxu1 %v4921_v42  ;;  %v5362_v42 = vld [vmem:[%s6482_s22 + $0x8] sm:$0xff] }
 0x3b1   :  { %1281 = vmatpush.msra.mxu0 %v5362_v42 }
 0x3b2   :  { %1750 = vmatpush.msra.mxu1 %v4929_v49  ;;  %v5368_v49 = vld [vmem:[%s6482_s22] sm:$0xff] }
 0x3b3   :  { %1282 = vmatpush.msra.mxu0 %v5368_v49 }
 0x3b4   :  { %1751 = vmatpush.msra.mxu1 %v4940_v5  ;;  %v5374_v5 = vld [vmem:[%s6474_s14 + $0x20] sm:$0xff] }
 0x3b5   :  { %1435 = vmatpush.msrb.mxu0 %v5374_v5 }
 0x3b6   :  { %1752 = vmatpush.msra.mxu1 %v4943_v44  ;;  %v5380_v44 = vld [vmem:[%s6474_s14] sm:$0xff] }
 0x3b7   :  { %1753 = vmatmul.f32.vlgmr.msra.gmra.mxu1 %v5258_v32  ;;  %1436 = vmatpush.msrb.mxu0 %v5380_v44 }
 0x3b8   :  { %1817 = vmatpush.msrb.mxu1 %v4946_v15  ;;  %v3570_v15 = vld [vmem:[%s6481_s21] ss:$0 sm:$0xff] }
 0x3ba   :  { %1818 = vmatpush.msrb.mxu1 %v4951_v28 }
 0x3bc   :  { %1819 = vmatpush.msrb.mxu1 %v4954_v40 }
 0x3be   :  { %1820 = vmatpush.msrb.mxu1 %v4957_v48 }
 0x3c0   :  { %1821 = vmatpush.msrb.mxu1 %v4960_v56  ;;  %v3776_v56 = vld [vmem:[%s6474_s14 + $0x30] sm:$0xff] }
 0x3c2   :  { %1822 = vmatpush.msrb.mxu1 %v4963_v4 }
 0x3c4   :  { %1823 = vmatpush.msrb.mxu1 %v4966_v11  ;;  %v3777_v11 = vld [vmem:[%s6474_s14 + $0x10] sm:$0xff] }
 0x3c6   :  { %1824 = vmatpush.msrb.mxu1 %v4973_v19  ;;  %v3778_v19 = vld [vmem:[#allocation5] ss:$0 sm:$0xff] }
 0x3c8   :  { %1825 = vmatpush.msrb.mxu1 %v4976_v33 }
 0x3ca   :  { %1826 = vmatpush.msrb.mxu1 %v4981_v41  ;;  %v3779_v41 = vld [vmem:[%s6625_s29] ss:$0 sm:$0xff] }
 0x3cc   :  { %1827 = vmatpush.msrb.mxu1 %v4984_v57  ;;  %v6669_v57 = vld [vmem:[#allocation19_spill] sm:$0xff] }
 0x3ce   :  { %1828 = vmatpush.msrb.mxu1 %v4987_v7  ;;  %v493_v7 = vadd.f32 %v3779_v41, %v6669_v57 }
 0x3d0   :  { %1829 = vmatpush.msrb.mxu1 %v4994_v16 }
 0x3d2   :  { %1830 = vmatpush.msrb.mxu1 %v5008_v46 }
 0x3d4   :  { %1831 = vmatpush.msrb.mxu1 %v5012_v53  ;;  %v6670_v53 = vld [vmem:[#allocation26_spill] sm:$0xff] }
 0x3d6   :  { %1832 = vmatpush.msrb.mxu1 %v5019_v27  ;;  %v505_v27 = vadd.f32 %v3779_v41, %v6670_v53 }
 0x3d8   :  { %1964 = vmatpush.msra.mxu1 %v5025_v35 }
 0x3da   :  { %1965 = vmatpush.msra.mxu1 %v5034_v63 }
 0x3dc   :  { %1966 = vmatpush.msra.mxu1 %v5043_v61 }
 0x3de   :  { %1967 = vmatpush.msra.mxu1 %v5059_v0 }
 0x3e0   :  { %1968 = vmatpush.msra.mxu1 %v5171_v34  ;;  %v6671_v34 = vld [vmem:[#allocation22_spill] sm:$0xff] }
 0x3e2   :  { %1969 = vmatpush.msra.mxu1 %v5176_v26 }
 0x3e4   :  { %1970 = vmatpush.msra.mxu1 %v5182_v22 }
 0x3e6   :  { %1971 = vmatpush.msra.mxu1 %v6660_v54 }
 0x3e8   :  { %1972 = vmatpush.msra.mxu1 %v6661_v59 }
 0x3ea   :  { %1973 = vmatpush.msra.mxu1 %v6662_v1  ;;  %v3783_v1 = vld [vmem:[%s6472_s12] ss:$0 sm:$0xff] }
 0x3ec   :  { %1974 = vmatpush.msra.mxu1 %v6663_v6 }
 0x3ee   :  { %1975 = vmatpush.msra.mxu1 %v6664_v9 }
 0x3f0   :  { %1976 = vmatpush.msra.mxu1 %v6665_v13 }
 0x3f2   :  { %1977 = vmatpush.msra.mxu1 %v6666_v17 }
 0x3f4   :  { %1978 = vmatpush.msra.mxu1 %v6667_v24 }
 0x3f6   :  { %1979 = vmatpush.msra.mxu1 %v6668_v38 }
 0x414   :  { %v1256_v28 = vpop.f32.mrf.mxu1 }
 0x415   :  { %v1257_v40 = vadd.f32 %v3570_v15, %v1256_v28  ;;  %v441_v28 = vld [vmem:[#allocation2 + $0x2] sm:$0x3] }
 0x417   :  { %v1259_v48 = vmax.f32 %v1257_v40, 0.0 }
 0x419   :  { %3500 = vmatmul.msk.f32.vlgmr.msra.gmra.mxu0 %vm1263_vm12, %v1259_v48  ;;  %v3784_v48 = vld [vmem:[%s6473_s13 + $0x28] sm:$0xff] }
 0x41a   :  { %1475 = vmatpush.msra.mxu0 %v3776_v56  ;;  %v3785_v56 = vld [vmem:[%s6473_s13 + $0x38] sm:$0xff] }
 0x41c   :  { %v1306_v4 = vpop.f32.mrf.mxu2  ;;  %1476 = vmatpush.msra.mxu0 %v3777_v11  ;;  %v3786_v11 = vld [vmem:[%s6473_s13 + $0x8] sm:$0xff] }
 0x41d   :  { %v1307_v33 = vadd.f32 %v3778_v19, %v1306_v4  ;;  %v3787_v19 = vld [vmem:[%s6473_s13 + $0x18] sm:$0xff] }
 0x41f   :  { %v1310_v16 = vrot.slane %v1307_v33, 1  ;;  %v1311_v46 = vperm.slane %v1307_v33, 0 }
 0x421   :  { %v1312_v35 = vperm.slane %v1310_v16, 0  ;;  %v1315_v63 = vadd.f32 %v1311_v46, %v493_v7  ;;  %3503 = vmatmul.msk.f32.vlgmr.msrb.gmra.mxu0 %vm447_vm0, %v441_v28  ;;  %v3788_v16 = vld [vmem:[#allocation8 + $0x1e8] sm:$0xff]  ;;  %v3789_v46 = vld [vmem:[#allocation8 + $0x1f8] sm:$0xff] }
 0x422   :  { %1540 = vmatpush.msrb.mxu0 %v3784_v48  ;;  %v3808_v48 = vld [vmem:[#allocation8 + $0xa8] sm:$0xff] }
 0x423   :  { %v1316_v61 = vadd.f32 %v1312_v35, %v505_v27  ;;  %v1317_v0 = vmax.f32 %v1315_v63, 0.0  ;;  %v3790_v35 = vld [vmem:[#allocation8 + $0x1c8] sm:$0xff]  ;;  %v3791_v63 = vld [vmem:[#allocation8 + $0x1d8] sm:$0xff] }
 0x424   :  { %1541 = vmatpush.msrb.mxu0 %v3786_v11  ;;  %v3810_v11 = vld [vmem:[#allocation8 + $0x88] sm:$0xff] }
 0x425   :  { %v1319_v26 = vmul.f32 %v1317_v0, %v6671_v34  ;;  %v1318_v22 = vmax.f32 %v1316_v61, 0.0 }
 0x427   :  { %v1321_v10 = vadd.f32 %v1319_v26, %v6672_v18  ;;  %v1320_v62 = vmul.f32 %v1318_v22, %v6671_v34  ;;  %v3792_v26 = vld [vmem:[#allocation8 + $0x1a8] sm:$0xff]  ;;  %v3793_v22 = vld [vmem:[#allocation8 + $0x1b8] sm:$0xff] }
 0x429   :  { %3501 = vmatmul.msk.f32.vlgmr.msra.gmra.mxu3 %vm447_vm0, %v1321_v10  ;;  %v1322_v45 = vadd.f32 %v1320_v62, %v6672_v18  ;;  %3505 = vmatmul.msk.f32.vlgmr.msra.gmra.mxu0 %vm447_vm0, %v441_v28  ;;  %v3794_v62 = vld [vmem:[#allocation8 + $0x188] sm:$0xff] }
 0x42a   :  { %1495 = vmatpush.msra.mxu3 %v3780_v50  ;;  %1606 = vmatpush.msra.mxu0 %v3788_v16  ;;  %v3813_v16 = vld [vmem:[#allocation8 + $0x78] sm:$0xff] }
 0x42c   :  { %1496 = vmatpush.msra.mxu3 %v3781_v2  ;;  %1607 = vmatpush.msra.mxu0 %v3790_v35  ;;  %v3795_v2 = vld [vmem:[#allocation8 + $0x198] sm:$0xff] }
 0x42d   :  { %v3815_v35 = vld [vmem:[#allocation8 + $0x58] sm:$0xff] }
 0x42e   :  { %1608 = vmatpush.msra.mxu0 %v3792_v26 }
 0x430   :  { %1609 = vmatpush.msra.mxu0 %v3794_v62 }
 0x431   :  { %3502 = vmatmul.msk.f32.gmra.mxu3 %vm447_vm0, %v1322_v45 }
 0x439   :  { %3504 = vmatmul.msk.f32.vlgmr.msrb.gmra.mxu3 %vm447_vm0, %v441_v28 }
 0x43a   :  { %1580 = vmatpush.msrb.mxu3 %v3785_v56  ;;  %v3809_v56 = vld [vmem:[#allocation8 + $0xb8] sm:$0xff] }
 0x43c   :  { %1581 = vmatpush.msrb.mxu3 %v3787_v19  ;;  %v3811_v19 = vld [vmem:[#allocation8 + $0x98] sm:$0xff] }
 0x441   :  { %3506 = vmatmul.msk.f32.vlgmr.msra.gmra.mxu3 %vm447_vm0, %v441_v28  ;;  %v3807_v28 = vld [vmem:[#allocation8 + $0xd8] sm:$0xff] }
 0x442   :  { %1646 = vmatpush.msra.mxu3 %v3789_v46 }
 0x444   :  { %1647 = vmatpush.msra.mxu3 %v3791_v63 }
 0x446   :  { %1648 = vmatpush.msra.mxu3 %v3793_v22  ;;  %v3818_v22 = vld [vmem:[#allocation8 + $0x8] sm:$0xff] }
 0x448   :  { %1649 = vmatpush.msra.mxu3 %v3795_v2 }
 0x496   :  { %v1284_v14 = vpop.f32.mrf.mxu0 }
 0x497   :  { %v1285_v36 = vadd.f32 %v3571_v43, %v1284_v14  ;;  %v3796_v14 = vld [vmem:[#allocation8 + $0x168] sm:$0xff] }
 0x498   :  { %1610 = vmatpush.msra.mxu0 %v3796_v14 }
 0x499   :  { %1287 = vst [vmem:[#allocation13] sm:$0x3] %v1285_v36  ;;  %v3797_v36 = vld [vmem:[#allocation8 + $0x178] sm:$0xff] }
 0x49a   :  { %1650 = vmatpush.msra.mxu3 %v3797_v36 }
 0x4ac   :  { %v1346_v51 = vpop.f32.mrf.mxu3 }
 0x4ad   :  { %v1352_v55 = vadd.f32 %v3782_v47, %v1346_v51 }
 0x4af   :  { %v1354_v58 = vmax.f32 %v1352_v55, 0.0  ;;  %v3799_v55 = vld [vmem:[#allocation8 + $0x158] sm:$0xff] }
 0x4b0   :  { %1651 = vmatpush.msra.mxu3 %v3799_v55 }
 0x4b1   :  { %v1356_v20 = vmul.f32 %v1354_v58, %v6673_v3 }
 0x4b3   :  { %v1358_v25 = vadd.f32 %v1356_v20, %v6674_v12  ;;  %v3800_v20 = vld [vmem:[#allocation8 + $0x128] sm:$0xff] }
 0x4b4   :  { %v1349_v54 = vpop.f32.mrf.mxu3 }
 0x4b5   :  { %v1353_v59 = vadd.f32 %v3782_v47, %v1349_v54  ;;  %v1360_v6 = vmul.f32 %v3783_v1, %v1358_v25  ;;  %v3798_v47 = vld [vmem:[#allocation8 + $0x148] sm:$0xff]  ;;  %v3801_v25 = vld [vmem:[#allocation8 + $0x138] sm:$0xff] }
 0x4b6   :  { %1611 = vmatpush.msra.mxu0 %v3798_v47  ;;  %1652 = vmatpush.msra.mxu3 %v3801_v25 }
 0x4b7   :  { %v1355_v9 = vmax.f32 %v1353_v59, 0.0  ;;  %v1362_v13 = vsel %vm447_vm0, %v1360_v6, 0.0  ;;  %v3802_v59 = vld [vmem:[#allocation8 + $0x108] sm:$0xff] }
 0x4b8   :  { %1363 = vadd.xlane.f32.xlu0 %v1362_v13  ;;  %1612 = vmatpush.msra.mxu0 %v3800_v20  ;;  %v3821_v20 = vld [vmem:[%s6618_s27 + $0x28] sm:$0xff] }
 0x4b9   :  { %v1357_v17 = vmul.f32 %v1355_v9, %v6673_v3 }
 0x4ba   :  { %1613 = vmatpush.msra.mxu0 %v3802_v59 }
 0x4bb   :  { %v1359_v24 = vadd.f32 %v1357_v17, %v6674_v12  ;;  %v3804_v17 = vld [vmem:[#allocation8 + $0xe8] sm:$0xff] }
 0x4bc   :  { %1614 = vmatpush.msra.mxu0 %v3804_v17 }
 0x4bd   :  { %v1361_v38 = vmul.f32 %v3783_v1, %v1359_v24  ;;  %v3803_v1 = vld [vmem:[#allocation8 + $0x118] sm:$0xff] }
 0x4be   :  { %1653 = vmatpush.msra.mxu3 %v3803_v1  ;;  %v3805_v24 = vld [vmem:[#allocation8 + $0xf8] sm:$0xff] }
 0x4bf   :  { %v1365_v15 = vsel %vm447_vm0, %v1361_v38, 0.0 }
 0x4c0   :  { %1366 = vadd.xlane.f32.xlu1 %v1365_v15  ;;  %1654 = vmatpush.msra.mxu3 %v3805_v24  ;;  %v3806_v15 = vld [vmem:[#allocation8 + $0xc8] sm:$0xff] }
 0x4c1   :  { %1615 = vmatpush.msra.mxu0 %v3806_v15 }
 0x4c2   :  { %1655 = vmatpush.msra.mxu3 %v3807_v28 }
 0x4c3   :  { %1616 = vmatpush.msra.mxu0 %v3808_v48  ;;  %v5450_v48 = vld [vmem:[#allocation8 + $0x1f0] sm:$0xff] }
 0x4c4   :  { %1656 = vmatpush.msra.mxu3 %v3809_v56  ;;  %v3823_v56 = vld [vmem:[#allocation11 + $0x1e8] sm:$0xff] }
 0x4c5   :  { %1617 = vmatpush.msra.mxu0 %v3810_v11  ;;  %v5453_v11 = vld [vmem:[#allocation8 + $0x1d0] sm:$0xff] }
 0x4c6   :  { %1657 = vmatpush.msra.mxu3 %v3811_v19  ;;  %v3826_v19 = vld [vmem:[#allocation11 + $0x1c8] sm:$0xff] }
 0x4c8   :  { %1658 = vmatpush.msra.mxu3 %v3813_v16  ;;  %v5459_v16 = vld [vmem:[#allocation8 + $0x190] sm:$0xff] }
 0x4ca   :  { %1659 = vmatpush.msra.mxu3 %v3815_v35  ;;  %v3835_v35 = vld [vmem:[#allocation11 + $0x168] sm:$0xff] }
 0x52b   :  { %v1364_v40 = vpop.xlane.xlu0 %1363 }
 0x52c   :  { %v1368_v4 = vrot.slane %v1364_v40, 4 }
 0x52e   :  { %v1369_v33 = vmax.f32 %v1364_v40, %v1368_v4 }
 0x530   :  { %v1370_v41 = vrot.slane %v1369_v33, 2 }
 0x532   :  { %v1371_v57 = vmax.f32 %v1369_v33, %v1370_v41 }
 0x533   :  { %v1367_v7 = vpop.xlane.xlu1 %1366 }
 0x534   :  { %v1372_v53 = vrot.slane %v1371_v57, 1  ;;  %v1374_v27 = vrot.slane %v1367_v7, 4 }
 0x536   :  { %v1373_v61 = vmax.f32 %v1371_v57, %v1372_v53  ;;  %v1375_v0 = vmax.f32 %v1367_v7, %v1374_v27  ;;  %v3814_v27 = vld [vmem:[#allocation8 + $0x48] sm:$0xff] }
 0x538   :  { %v1380_v10 = vsub.f32 %v1364_v40, %v1373_v61  ;;  %v1376_v50 = vrot.slane %v1375_v0, 2  ;;  %v3816_v61 = vld [vmem:[#allocation8 + $0x28] sm:$0xff] }
 0x53a   :  { %v1382_v45 = vmul.f32 1.442695, %v1380_v10  ;;  %v1377_v43 = vmax.f32 %v1375_v0, %v1376_v50  ;;  %v3817_v0 = vld [vmem:[#allocation8 + $0x38] sm:$0xff] }
 0x53b   :  { %1660 = vmatpush.msra.mxu3 %v3817_v0  ;;  %v3819_v10 = vld [vmem:[#allocation8 + $0x18] sm:$0xff]  ;;  %v3838_v0 = vld [vmem:[#allocation11 + $0x148] sm:$0xff] }
 0x53c   :  { %3612 = vpow2.f32 %v1382_v45  ;;  %v1378_v51 = vrot.slane %v1377_v43, 1 }
 0x53d   :  { %1661 = vmatpush.msra.mxu3 %v3819_v10  ;;  %v3841_v10 = vld [vmem:[#allocation11 + $0x128] sm:$0xff] }
 0x53e   :  { %v1379_v58 = vmax.f32 %v1377_v43, %v1378_v51  ;;  %v3820_v43 = vld [vmem:[%s6618_s27 + $0x8] sm:$0xff] }
 0x540   :  { %v1381_v54 = vsub.f32 %v1367_v7, %v1379_v58  ;;  %v3812_v7 = vld [vmem:[#allocation8 + $0x68] sm:$0xff] }
 0x541   :  { %1618 = vmatpush.msra.mxu0 %v3812_v7  ;;  %v3830_v7 = vld [vmem:[#allocation11 + $0x1b8] sm:$0xff] }
 0x542   :  { %v3613_v6 = vpop.eup %3612  ;;  %v1384_v9 = vmul.f32 1.442695, %v1381_v54 }
 0x543   :  { %v1386_v13 = vrot.slane %v3613_v6, 4  ;;  %1619 = vmatpush.msra.mxu0 %v3814_v27  ;;  %v5464_v27 = vld [vmem:[#allocation8 + $0x170] sm:$0xff] }
 0x544   :  { %3614 = vpow2.f32 %v1384_v9 }
 0x545   :  { %v1387_v38 = vadd.f32 %v3613_v6, %v1386_v13  ;;  %1620 = vmatpush.msra.mxu0 %v3816_v61  ;;  %v5468_v61 = vld [vmem:[#allocation8 + $0x150] sm:$0xff] }
 0x547   :  { %v1388_v40 = vrot.slane %v1387_v38, 2  ;;  %1621 = vmatpush.msra.mxu0 %v3818_v22  ;;  %v5471_v22 = vld [vmem:[#allocation8 + $0x130] sm:$0xff] }
 0x549   :  { %v1389_v4 = vadd.f32 %v1388_v40, %v1387_v38 }
 0x54a   :  { %v3615_v33 = vpop.eup %3614 }
 0x54b   :  { %v1390_v41 = vrot.slane %v1389_v4, 1  ;;  %v1392_v57 = vrot.slane %v3615_v33, 4 }
 0x54d   :  { %v1391_v46 = vadd.f32 %v1390_v41, %v1389_v4  ;;  %v1393_v53 = vadd.f32 %v3615_v33, %v1392_v57  ;;  %v3824_v4 = vld [vmem:[#allocation11 + $0x1f8] sm:$0xff]  ;;  %v5456_v41 = vld [vmem:[#allocation8 + $0x1b0] sm:$0xff]  ;;  %v3829_v57 = vld [vmem:[#allocation11 + $0x1a8] sm:$0xff] }
 0x54f   :  { %3616 = vrcp.f32 %v1391_v46  ;;  %v1394_v63 = vrot.slane %v1393_v53, 2  ;;  %v3832_v46 = vld [vmem:[#allocation11 + $0x188] sm:$0xff] }
 0x551   :  { %v1395_v26 = vadd.f32 %v1394_v63, %v1393_v53  ;;  %v3833_v53 = vld [vmem:[#allocation11 + $0x198] sm:$0xff] }
 0x552   :  { %v3836_v63 = vld [vmem:[#allocation11 + $0x178] sm:$0xff] }
 0x553   :  { %v1396_v50 = vrot.slane %v1395_v26, 1 }
 0x555   :  { %v3617_v62 = vpop.eup %3616  ;;  %v1397_v2 = vadd.f32 %v1396_v50, %v1395_v26  ;;  %v3839_v26 = vld [vmem:[#allocation11 + $0x158] sm:$0xff] }
 0x556   :  { %v1400_v45 = vmul.f32 %v3617_v62, %v3613_v6  ;;  %v3842_v50 = vld [vmem:[#allocation11 + $0x138] sm:$0xff]  ;;  %v5474_v62 = vld [vmem:[#allocation8 + $0x110] sm:$0xff] }
 0x557   :  { %3618 = vrcp.f32 %v1397_v2  ;;  %v3844_v2 = vld [vmem:[#allocation11 + $0x108] sm:$0xff] }
 0x558   :  { %v1402_v14 = vmul.f32 %v3820_v43, %v1400_v45  ;;  %v3845_v45 = vld [vmem:[#allocation11 + $0x118] sm:$0xff]  ;;  %v5477_v43 = vld [vmem:[#allocation8 + $0xf0] sm:$0xff] }
 0x55a   :  { %v1404_v36 = vsel %vm447_vm0, %v1402_v14, 0.0  ;;  %v3847_v14 = vld [vmem:[#allocation11 + $0xe8] sm:$0xff] }
 0x55b   :  { %v1405_v51 = vrot.slane %v1404_v36, 4 }
 0x55d   :  { %v3619_v47 = vpop.eup %3618  ;;  %v1406_v55 = vadd.f32 %v1405_v51, %v1404_v36  ;;  %v3848_v36 = vld [vmem:[#allocation11 + $0xf8] sm:$0xff]  ;;  %v5480_v51 = vld [vmem:[#allocation8 + $0xd0] sm:$0xff] }
 0x55e   :  { %v1401_v58 = vmul.f32 %v3619_v47, %v3615_v33  ;;  %v3827_v33 = vld [vmem:[#allocation11 + $0x1d8] sm:$0xff]  ;;  %v3850_v47 = vld [vmem:[#allocation11 + $0xc8] sm:$0xff] }
 0x55f   :  { %v1407_v54 = vrot.slane %v1406_v55, 2 }
 0x560   :  { %v1403_v25 = vmul.f32 %v3821_v20, %v1401_v58  ;;  %v5483_v58 = vld [vmem:[#allocation8 + $0xb0] sm:$0xff]  ;;  %v3853_v20 = vld [vmem:[#allocation11 + $0xa8] sm:$0xff] }
 0x561   :  { %v1408_v6 = vadd.f32 %v1407_v54, %v1406_v55  ;;  %v3851_v55 = vld [vmem:[#allocation11 + $0xd8] sm:$0xff]  ;;  %v5486_v54 = vld [vmem:[#allocation8 + $0x90] sm:$0xff] }
 0x562   :  { %v1411_v59 = vsel %vm447_vm0, %v1403_v25, 0.0  ;;  %v3854_v25 = vld [vmem:[#allocation11 + $0xb8] sm:$0xff] }
 0x563   :  { %v1412_v1 = vrot.slane %v1411_v59, 4  ;;  %v1409_v17 = vrot.slane %v1408_v6, 1 }
 0x565   :  { %v1413_v9 = vadd.f32 %v1412_v1, %v1411_v59  ;;  %v1410_v15 = vadd.f32 %v1409_v17, %v1408_v6  ;;  %v3856_v59 = vld [vmem:[#allocation11 + $0x88] sm:$0xff]  ;;  %v3857_v1 = vld [vmem:[#allocation11 + $0x98] sm:$0xff]  ;;  %v5489_v6 = vld [vmem:[#allocation8 + $0x70] sm:$0xff] }
 0x566   :  { %v5492_v17 = vld [vmem:[#allocation8 + $0x50] sm:$0xff] }
 0x567   :  { %v1414_v13 = vrot.slane %v1413_v9, 2 }
 0x569   :  { %v1415_v24 = vadd.f32 %v1414_v13, %v1413_v9  ;;  %v3859_v9 = vld [vmem:[#allocation11 + $0x68] sm:$0xff]  ;;  %v3860_v13 = vld [vmem:[#allocation11 + $0x78] sm:$0xff] }
 0x56b   :  { %v1416_v38 = vrot.slane %v1415_v24, 1 }
 0x56d   :  { %v1417_v28 = vadd.f32 %v1416_v38, %v1415_v24  ;;  %v3862_v24 = vld [vmem:[#allocation11 + $0x48] sm:$0xff]  ;;  %v3863_v38 = vld [vmem:[#allocation11 + $0x58] sm:$0xff] }
 0x56f   :  { %v1503_v40 = vsel %vm756_vm1, %v1417_v28, %v1410_v15  ;;  %v5495_v15 = vld [vmem:[#allocation8 + $0x30] sm:$0xff]  ;;  %v3865_v28 = vld [vmem:[#allocation11 + $0x28] sm:$0xff] }
 0x570   :  { %3507 = vmatmul.msk.f32.vlgmr.msra.gmra.mxu2 %vm447_vm0, %v1503_v40  ;;  %3508 = vmatmul.msk.f32.vlgmr.msrb.gmra.mxu0 %vm447_vm0, %v1503_v40 }
 0x571   :  { %3510 = vmatmul.msk.f32.vlgmr.msrb.gmra.mxu3 %vm447_vm0, %v1503_v40  ;;  %1626 = vmatpush.msra.mxu2 %v5450_v48 }
 0x572   :  { %1757 = vmatpush.msrb.mxu0 %v3823_v56  ;;  %1797 = vmatpush.msrb.mxu3 %v3824_v4  ;;  %v5498_v56 = vld [vmem:[#allocation8 + $0x10] sm:$0xff]  ;;  %v3868_v4 = vld [vmem:[#allocation11 + $0x8] sm:$0xff] }
 0x573   :  { %1627 = vmatpush.msra.mxu2 %v5453_v11 }
 0x574   :  { %1758 = vmatpush.msrb.mxu0 %v3826_v19  ;;  %1798 = vmatpush.msrb.mxu3 %v3827_v33  ;;  %v3869_v19 = vld [vmem:[#allocation11 + $0x18] sm:$0xff]  ;;  %v5503_v33 = vld [vmem:[#allocation11 + $0x1f0] sm:$0xff] }
 0x575   :  { %1628 = vmatpush.msra.mxu2 %v5456_v41 }
 0x576   :  { %1759 = vmatpush.msrb.mxu0 %v3829_v57  ;;  %1799 = vmatpush.msrb.mxu3 %v3830_v7  ;;  %v3871_v57 = vld [vmem:[#allocation10 + $0x1e8] sm:$0xff]  ;;  %v3872_v7 = vld [vmem:[#allocation10 + $0x1f8] sm:$0xff] }
 0x577   :  { %1629 = vmatpush.msra.mxu2 %v5459_v16 }
 0x578   :  { %1760 = vmatpush.msrb.mxu0 %v3832_v46  ;;  %1800 = vmatpush.msrb.mxu3 %v3833_v53  ;;  %v5507_v46 = vld [vmem:[#allocation11 + $0x1d0] sm:$0xff]  ;;  %v3874_v53 = vld [vmem:[#allocation10 + $0x1c8] sm:$0xff] }
 0x579   :  { %3509 = vmatmul.msk.f32.vlgmr.msrb.gmra.mxu2 %vm447_vm0, %v1503_v40  ;;  %1622 = vmatmul.f32.vlgmr.msra.gmra.mxu0 %v5132_v23  ;;  %v3866_v40 = vld [vmem:[#allocation11 + $0x38] sm:$0xff] }
 0x57a   :  { %1630 = vmatpush.msra.mxu2 %v5464_v27  ;;  %1662 = vmatmul.f32.vlgmr.msra.gmra.mxu3 %v5132_v23 }
 0x57b   :  { %1761 = vmatpush.msrb.mxu0 %v3835_v35  ;;  %1801 = vmatpush.msrb.mxu3 %v3836_v63  ;;  %v3875_v35 = vld [vmem:[#allocation10 + $0x1d8] sm:$0xff]  ;;  %v3877_v63 = vld [vmem:[#allocation10 + $0x1a8] sm:$0xff] }
 0x57c   :  { %1631 = vmatpush.msra.mxu2 %v5468_v61 }
 0x57d   :  { %1762 = vmatpush.msrb.mxu0 %v3838_v0  ;;  %1802 = vmatpush.msrb.mxu3 %v3839_v26  ;;  %v3878_v0 = vld [vmem:[#allocation10 + $0x1b8] sm:$0xff]  ;;  %v5513_v26 = vld [vmem:[#allocation11 + $0x190] sm:$0xff] }
 0x57e   :  { %1632 = vmatpush.msra.mxu2 %v5471_v22 }
 0x57f   :  { %1763 = vmatpush.msrb.mxu0 %v3841_v10  ;;  %1803 = vmatpush.msrb.mxu3 %v3842_v50  ;;  %v3880_v10 = vld [vmem:[#allocation10 + $0x188] sm:$0xff]  ;;  %v3881_v50 = vld [vmem:[#allocation10 + $0x198] sm:$0xff] }
 0x580   :  { %1633 = vmatpush.msra.mxu2 %v5474_v62 }
 0x581   :  { %1764 = vmatpush.msrb.mxu0 %v3844_v2  ;;  %1804 = vmatpush.msrb.mxu3 %v3845_v45  ;;  %v5516_v2 = vld [vmem:[#allocation11 + $0x170] sm:$0xff]  ;;  %v3883_v45 = vld [vmem:[#allocation10 + $0x168] sm:$0xff] }
 0x582   :  { %1634 = vmatpush.msra.mxu2 %v5477_v43 }
 0x583   :  { %1765 = vmatpush.msrb.mxu0 %v3847_v14  ;;  %1805 = vmatpush.msrb.mxu3 %v3848_v36  ;;  %v3884_v14 = vld [vmem:[#allocation10 + $0x178] sm:$0xff]  ;;  %v5519_v36 = vld [vmem:[#allocation11 + $0x150] sm:$0xff] }
 0x584   :  { %1635 = vmatpush.msra.mxu2 %v5480_v51 }
 0x585   :  { %1766 = vmatpush.msrb.mxu0 %v3850_v47  ;;  %1806 = vmatpush.msrb.mxu3 %v3851_v55  ;;  %v3886_v47 = vld [vmem:[#allocation10 + $0x148] sm:$0xff]  ;;  %v3887_v55 = vld [vmem:[#allocation10 + $0x158] sm:$0xff] }
 0x586   :  { %1636 = vmatpush.msra.mxu2 %v5483_v58 }
 0x587   :  { %1767 = vmatpush.msrb.mxu0 %v3853_v20  ;;  %1807 = vmatpush.msrb.mxu3 %v3854_v25  ;;  %v5522_v20 = vld [vmem:[#allocation11 + $0x130] sm:$0xff]  ;;  %v3889_v25 = vld [vmem:[#allocation10 + $0x128] sm:$0xff] }
 0x588   :  { %1637 = vmatpush.msra.mxu2 %v5486_v54 }
 0x589   :  { %1768 = vmatpush.msrb.mxu0 %v3856_v59  ;;  %1808 = vmatpush.msrb.mxu3 %v3857_v1  ;;  %v3890_v59 = vld [vmem:[#allocation10 + $0x138] sm:$0xff]  ;;  %v5525_v1 = vld [vmem:[#allocation11 + $0x110] sm:$0xff] }
 0x58a   :  { %1638 = vmatpush.msra.mxu2 %v5489_v6 }
 0x58b   :  { %1769 = vmatpush.msrb.mxu0 %v3859_v9  ;;  %1809 = vmatpush.msrb.mxu3 %v3860_v13  ;;  %v3892_v9 = vld [vmem:[#allocation10 + $0x108] sm:$0xff]  ;;  %v3893_v13 = vld [vmem:[#allocation10 + $0x118] sm:$0xff] }
 0x58c   :  { %1639 = vmatpush.msra.mxu2 %v5492_v17 }
 0x58d   :  { %1770 = vmatpush.msrb.mxu0 %v3862_v24  ;;  %1810 = vmatpush.msrb.mxu3 %v3863_v38  ;;  %v5528_v24 = vld [vmem:[#allocation11 + $0xf0] sm:$0xff]  ;;  %v3895_v38 = vld [vmem:[#allocation10 + $0xe8] sm:$0xff] }
 0x58e   :  { %1640 = vmatpush.msra.mxu2 %v5495_v15 }
 0x58f   :  { %1771 = vmatpush.msrb.mxu0 %v3865_v28  ;;  %1811 = vmatpush.msrb.mxu3 %v3866_v40  ;;  %v3896_v28 = vld [vmem:[#allocation10 + $0xf8] sm:$0xff]  ;;  %v5531_v40 = vld [vmem:[#allocation11 + $0xd0] sm:$0xff] }
 0x590   :  { %1641 = vmatpush.msra.mxu2 %v5498_v56 }
 0x591   :  { %1772 = vmatpush.msrb.mxu0 %v3868_v4  ;;  %1812 = vmatpush.msrb.mxu3 %v3869_v19  ;;  %v3898_v4 = vld [vmem:[#allocation10 + $0xc8] sm:$0xff]  ;;  %v3899_v19 = vld [vmem:[#allocation10 + $0xd8] sm:$0xff] }
 0x592   :  { %1642 = vmatmul.f32.vlgmr.msra.gmra.mxu2 %v5132_v23  ;;  %1773 = vmatmul.f32.vlgmr.msrb.gmra.mxu0 %v5258_v32  ;;  %v5510_v23 = vld [vmem:[#allocation11 + $0x1b0] sm:$0xff] }
 0x593   :  { %1777 = vmatpush.msrb.mxu2 %v5503_v33  ;;  %1813 = vmatmul.f32.vlgmr.msrb.gmra.mxu3 %v5258_v32 }
 0x594   :  { %1837 = vmatpush.msra.mxu0 %v3871_v57  ;;  %1877 = vmatpush.msra.mxu3 %v3872_v7  ;;  %v5534_v57 = vld [vmem:[#allocation11 + $0xb0] sm:$0xff]  ;;  %v3901_v7 = vld [vmem:[#allocation10 + $0xa8] sm:$0xff] }
 0x595   :  { %1778 = vmatpush.msrb.mxu2 %v5507_v46 }
 0x596   :  { %1838 = vmatpush.msra.mxu0 %v3874_v53  ;;  %1878 = vmatpush.msra.mxu3 %v3875_v35  ;;  %v3902_v53 = vld [vmem:[#allocation10 + $0xb8] sm:$0xff]  ;;  %v5537_v35 = vld [vmem:[#allocation11 + $0x90] sm:$0xff] }
 0x597   :  { %1779 = vmatpush.msrb.mxu2 %v5510_v23 }
 0x598   :  { %1839 = vmatpush.msra.mxu0 %v3877_v63  ;;  %1879 = vmatpush.msra.mxu3 %v3878_v0  ;;  %v3904_v63 = vld [vmem:[#allocation10 + $0x88] sm:$0xff]  ;;  %v3905_v0 = vld [vmem:[#allocation10 + $0x98] sm:$0xff] }
 0x599   :  { %1780 = vmatpush.msrb.mxu2 %v5513_v26 }
 0x59a   :  { %1840 = vmatpush.msra.mxu0 %v3880_v10  ;;  %1880 = vmatpush.msra.mxu3 %v3881_v50  ;;  %v5540_v10 = vld [vmem:[#allocation11 + $0x70] sm:$0xff]  ;;  %v3907_v50 = vld [vmem:[#allocation10 + $0x68] sm:$0xff] }
 0x59b   :  { %1781 = vmatpush.msrb.mxu2 %v5516_v2 }
 0x59c   :  { %1841 = vmatpush.msra.mxu0 %v3883_v45  ;;  %1881 = vmatpush.msra.mxu3 %v3884_v14  ;;  %v3908_v45 = vld [vmem:[#allocation10 + $0x78] sm:$0xff]  ;;  %v5543_v14 = vld [vmem:[#allocation11 + $0x50] sm:$0xff] }
 0x59d   :  { %1782 = vmatpush.msrb.mxu2 %v5519_v36  ;;  %6675 = vst [vmem:[#allocation39_spill] sm:$0xff] %v5543_v14 }
 0x59e   :  { %1842 = vmatpush.msra.mxu0 %v3886_v47  ;;  %1882 = vmatpush.msra.mxu3 %v3887_v55  ;;  %v3910_v47 = vld [vmem:[#allocation10 + $0x48] sm:$0xff]  ;;  %v3911_v55 = vld [vmem:[#allocation10 + $0x58] sm:$0xff] }
 0x59f   :  { %1783 = vmatpush.msrb.mxu2 %v5522_v20 }
 0x5a0   :  { %1843 = vmatpush.msra.mxu0 %v3889_v25  ;;  %1883 = vmatpush.msra.mxu3 %v3890_v59  ;;  %v5546_v25 = vld [vmem:[#allocation11 + $0x30] sm:$0xff]  ;;  %v3913_v59 = vld [vmem:[#allocation10 + $0x28] sm:$0xff] }
 0x5a1   :  { %1784 = vmatpush.msrb.mxu2 %v5525_v1  ;;  %6676 = vst [vmem:[#allocation40_spill] sm:$0xff] %v5546_v25 }
 0x5a2   :  { %1844 = vmatpush.msra.mxu0 %v3892_v9  ;;  %1884 = vmatpush.msra.mxu3 %v3893_v13  ;;  %v3914_v9 = vld [vmem:[#allocation10 + $0x38] sm:$0xff]  ;;  %v5549_v13 = vld [vmem:[#allocation11 + $0x10] sm:$0xff] }
 0x5a3   :  { %1785 = vmatpush.msrb.mxu2 %v5528_v24  ;;  %6677 = vst [vmem:[#allocation41_spill] sm:$0xff] %v5549_v13 }
 0x5a4   :  { %1845 = vmatpush.msra.mxu0 %v3895_v38  ;;  %1885 = vmatpush.msra.mxu3 %v3896_v28  ;;  %v3916_v38 = vld [vmem:[#allocation10 + $0x8] sm:$0xff]  ;;  %v5553_v28 = vld [vmem:[#allocation10 + $0x1f0] sm:$0xff] }
 0x5a5   :  { %1786 = vmatpush.msrb.mxu2 %v5531_v40  ;;  %6678 = vst [vmem:[#allocation42_spill] sm:$0xff] %v5553_v28 }
 0x5a6   :  { %1846 = vmatpush.msra.mxu0 %v3898_v4  ;;  %1886 = vmatpush.msra.mxu3 %v3899_v19  ;;  %v3918_v4 = vld [vmem:[#allocation10 + $0x18] sm:$0xff] }
 0x5a7   :  { %1787 = vmatpush.msrb.mxu2 %v5534_v57  ;;  %v3919_v19 = vld [vmem:[%s6621_s5 + $0x8] sm:$0xff] }
 0x5a8   :  { %1847 = vmatpush.msra.mxu0 %v3901_v7  ;;  %1887 = vmatpush.msra.mxu3 %v3902_v53  ;;  %v5560_v7 = vld [vmem:[#allocation10 + $0x1d0] sm:$0xff] }
 0x5a9   :  { %1788 = vmatpush.msrb.mxu2 %v5537_v35  ;;  %6679 = vst [vmem:[#allocation43_spill] sm:$0xff] %v5560_v7  ;;  %v5567_v53 = vld [vmem:[#allocation10 + $0x1b0] sm:$0xff] }
 0x5aa   :  { %1848 = vmatpush.msra.mxu0 %v3904_v63  ;;  %1888 = vmatpush.msra.mxu3 %v3905_v0  ;;  %6680 = vst [vmem:[#allocation44_spill] sm:$0xff] %v5567_v53  ;;  %v5575_v63 = vld [vmem:[#allocation10 + $0x170] sm:$0xff] }
 0x5ab   :  { %1789 = vmatpush.msrb.mxu2 %v5540_v10  ;;  %6682 = vst [vmem:[#allocation46_spill] sm:$0xff] %v5575_v63  ;;  %v5583_v0 = vld [vmem:[#allocation10 + $0x130] sm:$0xff] }
 0x5ac   :  { %1849 = vmatpush.msra.mxu0 %v3907_v50  ;;  %1889 = vmatpush.msra.mxu3 %v3908_v45  ;;  %6684 = vst [vmem:[#allocation19_spill] sm:$0xff] %v5583_v0  ;;  %v5600_v50 = vld [vmem:[#allocation10 + $0x90] sm:$0xff] }
 0x5ad   :  { %1790 = vmatpush.msrb.mxu2 %v5543_v14  ;;  %6689 = vst [vmem:[#allocation25_spill] sm:$0xff] %v5600_v50  ;;  %v3934_v45 = vld [vmem:[#allocation10 + $0x30] sm:$0xff] }
 0x5ae   :  { %1850 = vmatpush.msra.mxu0 %v3910_v47  ;;  %1890 = vmatpush.msra.mxu3 %v3911_v55  ;;  %v3935_v47 = vld [vmem:[#allocation10 + $0x10] sm:$0xff] }
 0x5af   :  { %1791 = vmatpush.msrb.mxu2 %v5546_v25  ;;  %v3936_v55 = vld [vmem:[%s6617_s0 + $0x78] sm:$0xff] }
 0x5b0   :  { %1851 = vmatpush.msra.mxu0 %v3913_v59  ;;  %1891 = vmatpush.msra.mxu3 %v3914_v9  ;;  %v3937_v59 = vld [vmem:[%s6617_s0 + $0x70] sm:$0xff]  ;;  %v3938_v9 = vld [vmem:[%s6617_s0 + $0x68] sm:$0xff] }
 0x5b1   :  { %1792 = vmatpush.msrb.mxu2 %v5549_v13 }
 0x5b2   :  { %1793 = vmatmul.f32.vlgmr.msrb.gmra.mxu2 %v5258_v32  ;;  %1852 = vmatpush.msra.mxu0 %v3916_v38  ;;  %v3921_v32 = vld [vmem:[%s6621_s5] sm:$0xff] }
 0x5b3   :  { %1857 = vmatpush.msra.mxu2 %v5553_v28  ;;  %1892 = vmatpush.msra.mxu3 %v3918_v4  ;;  %v3939_v38 = vld [vmem:[%s6617_s0 + $0x60] sm:$0xff]  ;;  %v3940_v4 = vld [vmem:[%s6617_s0 + $0x58] sm:$0xff] }
 0x5b4   :  { %1996 = vmatpush.msrb.mxu0 %v5266_v29  ;;  %v5571_v29 = vld [vmem:[#allocation10 + $0x190] sm:$0xff] }
 0x5b5   :  { %2065 = vmatpush.msrb.mxu3 %v3919_v19  ;;  %1858 = vmatpush.msra.mxu2 %v5560_v7  ;;  %6681 = vst [vmem:[#allocation45_spill] sm:$0xff] %v5571_v29  ;;  %v1438_v19 = vpop.f32.mrf.mxu0 }
 0x5b6   :  { %1997 = vmatpush.msrb.mxu0 %v5271_v8  ;;  %v5579_v8 = vld [vmem:[#allocation10 + $0x150] sm:$0xff] }
 0x5b7   :  { %2066 = vmatpush.msrb.mxu3 %v3921_v32  ;;  %1859 = vmatpush.msra.mxu2 %v5567_v53  ;;  %6683 = vst [vmem:[#allocation47_spill] sm:$0xff] %v5579_v8  ;;  %v3941_v32 = vld [vmem:[%s6617_s0 + $0x50] sm:$0xff] }
 0x5b8   :  { %1998 = vmatpush.msrb.mxu0 %v5277_v60  ;;  %v5587_v60 = vld [vmem:[#allocation10 + $0x110] sm:$0xff] }
 0x5b9   :  { %1860 = vmatpush.msra.mxu2 %v5571_v29  ;;  %6685 = vst [vmem:[#allocation26_spill] sm:$0xff] %v5587_v60  ;;  %v6698_v29 = vld [vmem:[#allocation30_spill] sm:$0xff] }
 0x5ba   :  { %1999 = vmatpush.msrb.mxu0 %v5283_v37  ;;  %v5591_v37 = vld [vmem:[#allocation10 + $0xf0] sm:$0xff] }
 0x5bb   :  { %1861 = vmatpush.msra.mxu2 %v5575_v63  ;;  %6686 = vst [vmem:[#allocation22_spill] sm:$0xff] %v5591_v37  ;;  %v6697_v63 = vld [vmem:[#allocation29_spill] sm:$0xff] }
 0x5bc   :  { %2000 = vmatpush.msrb.mxu0 %v5296_v52  ;;  %v5594_v52 = vld [vmem:[#allocation10 + $0xd0] sm:$0xff] }
 0x5bd   :  { %1862 = vmatpush.msra.mxu2 %v5579_v8  ;;  %6687 = vst [vmem:[#allocation23_spill] sm:$0xff] %v5594_v52 }
 0x5be   :  { %2001 = vmatpush.msrb.mxu0 %v5355_v31  ;;  %v5597_v31 = vld [vmem:[#allocation10 + $0xb0] sm:$0xff] }
 0x5bf   :  { %1863 = vmatpush.msra.mxu2 %v5583_v0  ;;  %6688 = vst [vmem:[#allocation24_spill] sm:$0xff] %v5597_v31 }
 0x5c0   :  { %2002 = vmatpush.msrb.mxu0 %v5362_v42  ;;  %v5603_v42 = vld [vmem:[#allocation10 + $0x70] sm:$0xff] }
 0x5c1   :  { %1864 = vmatpush.msra.mxu2 %v5587_v60  ;;  %6690 = vst [vmem:[#allocation52_spill] sm:$0xff] %v5603_v42 }
 0x5c2   :  { %2003 = vmatpush.msrb.mxu0 %v5368_v49  ;;  %v5606_v49 = vld [vmem:[#allocation10 + $0x50] sm:$0xff] }
 0x5c3   :  { %1865 = vmatpush.msra.mxu2 %v5591_v37  ;;  %6691 = vst [vmem:[#allocation53_spill] sm:$0xff] %v5606_v49  ;;  %v1603_v37 = vpop.f32.mrf.mxu1 }
 0x5c5   :  { %1866 = vmatpush.msra.mxu2 %v5594_v52 }
 0x5c7   :  { %1867 = vmatpush.msra.mxu2 %v5597_v31 }
 0x5c9   :  { %1868 = vmatpush.msra.mxu2 %v5600_v50  ;;  %v6696_v50 = vld [vmem:[#allocation38_spill] sm:$0xff] }
 0x5cb   :  { %1869 = vmatpush.msra.mxu2 %v5603_v42 }
 0x5cd   :  { %1870 = vmatpush.msra.mxu2 %v5606_v49  ;;  %v6694_v49 = vld [vmem:[#allocation36_spill] sm:$0xff] }
 0x5cf   :  { %1871 = vmatpush.msra.mxu2 %v3934_v45  ;;  %v3942_v45 = vld [vmem:[%s6617_s0 + $0x48] sm:$0xff] }
 0x5d1   :  { %1872 = vmatpush.msra.mxu2 %v3935_v47  ;;  %v3943_v47 = vld [vmem:[%s6617_s0 + $0x40] sm:$0xff] }
 0x5d3   :  { %2011 = vmatpush.msrb.mxu2 %v3936_v55  ;;  %v1458_v55 = vpop.f32.mrf.mxu3 }
 0x5d5   :  { %2012 = vmatpush.msrb.mxu2 %v3937_v59  ;;  %v3944_v59 = vld [vmem:[%s6617_s0 + $0x38] sm:$0xff] }
 0x5d7   :  { %2013 = vmatpush.msrb.mxu2 %v3938_v9  ;;  %v3945_v9 = vld [vmem:[%s6617_s0 + $0x30] sm:$0xff] }
 0x5d9   :  { %2014 = vmatpush.msrb.mxu2 %v3939_v38  ;;  %v1478_v38 = vpop.f32.mrf.mxu0 }
 0x5db   :  { %2015 = vmatpush.msrb.mxu2 %v3940_v4  ;;  %v3946_v4 = vld [vmem:[%s6617_s0 + $0x28] sm:$0xff] }
 0x5dd   :  { %2016 = vmatpush.msrb.mxu2 %v3941_v32  ;;  %v6692_v32 = vld [vmem:[#allocation34_spill] sm:$0xff] }
 0x5df   :  { %2017 = vmatpush.msrb.mxu2 %v3942_v45  ;;  %v6693_v45 = vld [vmem:[#allocation35_spill] sm:$0xff] }
 0x5e1   :  { %2018 = vmatpush.msrb.mxu2 %v3943_v47  ;;  %v1498_v47 = vpop.f32.mrf.mxu3 }
 0x5e3   :  { %2019 = vmatpush.msrb.mxu2 %v3944_v59  ;;  %v6695_v59 = vld [vmem:[#allocation37_spill] sm:$0xff] }
 0x5e5   :  { %2020 = vmatpush.msrb.mxu2 %v3945_v9 }
 0x5e7   :  { %2021 = vmatpush.msrb.mxu2 %v3946_v4 }
 0x5e9   :  { %2022 = vmatpush.msrb.mxu2 %v6692_v32 }
 0x5eb   :  { %2023 = vmatpush.msrb.mxu2 %v6693_v45 }
 0x5ed   :  { %2024 = vmatpush.msrb.mxu2 %v6694_v49  ;;  %v1543_v42 = vpop.f32.mrf.mxu0 }
 0x5ee   :  { %v1544_v60 = vadd.f32 %v1543_v42, %v1458_v55 }
 0x5ef   :  { %2025 = vmatpush.msrb.mxu2 %v6695_v59 }
 0x5f1   :  { %2026 = vmatpush.msrb.mxu2 %v6696_v50  ;;  %v6699_v50 = vld [vmem:[#allocation31_spill] sm:$0xff] }
 0x5f3   :  { %v1523_v31 = vpop.f32.mrf.mxu2 }
 0x5f4   :  { %v1524_v9 = vadd.f32 %v1523_v31, %v1438_v19  ;;  %v1583_v52 = vpop.f32.mrf.mxu3 }
 0x5f5   :  { %v1584_v49 = vadd.f32 %v1583_v52, %v1498_v47 }
 0x5f6   :  { %v1666_v0 = vadd.f32 %v1603_v37, %v1524_v9  ;;  %v1623_v8 = vpop.f32.mrf.mxu0 }
 0x5f7   :  { %v1667_v4 = vadd.f32 %v1623_v8, %v1544_v60 }
 0x5f8   :  { %v1670_v32 = vadd.f32 %v1666_v0, %v6697_v63 }
 0x5f9   :  { %v1671_v45 = vadd.f32 %v1667_v4, %v6698_v29 }
 0x5fa   :  { %v3511_v53 = vmul.f32 -1.442695, %v1670_v32 }
 0x5fb   :  { %v3512_v7 = vmul.f32 -1.442695, %v1671_v45 }
 0x5fc   :  { %3620 = vpow2.f32 %v3511_v53  ;;  %v1563_v52 = vpop.f32.mrf.mxu2 }
 0x5fd   :  { %3622 = vpow2.f32 %v3512_v7  ;;  %v1663_v59 = vpop.f32.mrf.mxu3 }
 0x5fe   :  { %v1669_v28 = vadd.f32 %v1663_v59, %v1584_v49 }
 0x600   :  { %v1673_v13 = vadd.f32 %v1669_v28, %v6699_v50  ;;  %v1564_v28 = vadd.f32 %v1563_v52, %v1478_v38 }
 0x602   :  { %v3621_v31 = vpop.eup %3620  ;;  %v3513_v19 = vmul.f32 -1.442695, %v1673_v13 }
 0x603   :  { %v3623_v25 = vpop.eup %3622  ;;  %v1677_v42 = vadd.f32 1.0, %v3621_v31 }
 0x604   :  { %v1696_v37 = vadd.f32 1.0, %v3623_v25  ;;  %3624 = vpow2.f32 %v3513_v19  ;;  %v6700_v19 = vld [vmem:[#allocation32_spill] sm:$0xff] }
 0x605   :  { %3626 = vrcp.f32 %v1677_v42  ;;  %vm1683_vm3 = vweird.f32 %v1677_v42 }
 0x606   :  { %3628 = vrcp.f32 %v1696_v37  ;;  %v1708_v59 = vand.u32 2147483648, %v1696_v37  ;;  %vm1702_vm14 = vweird.f32 %v1696_v37  ;;  %v1706_v29 = vand.u32 2147483647, %v1696_v37 }
 0x608   :  { %v1709_v52 = vor.u32 1.1754944e-38, %v1708_v59  ;;  %vm1707_vm5 = vcmp.eq.f32.partialorder %v1706_v29, 8.507059e+37 }
 0x60a   :  { %v3625_v8 = vpop.eup %3624 }
 0x60b   :  { %v3627_v0 = vpop.eup %3626  ;;  %v1716_v60 = vadd.f32 1.0, %v3625_v8 }
 0x60c   :  { %v3629_v55 = vpop.eup %3628  ;;  %v1679_v9 = vmul.f32 %v3627_v0, %v1677_v42  ;;  %vm1684_vm15 = vweird.f32 %v3627_v0 }
 0x60d   :  { %v1698_v53 = vmul.f32 %v3629_v55, %v1696_v37  ;;  %3630 = vrcp.f32 %v1716_v60  ;;  %vm1703_vm13 = vweird.f32 %v3629_v55  ;;  %vm1685_vm4 = vmor %vm1683_vm3, %vm1684_vm15  ;;  %vm1722_vm8 = vweird.f32 %v1716_v60 }
 0x60e   :  { %v1680_v47 = vsub.f32 1.0, %v1679_v9  ;;  %vm1704_vm2 = vmor %vm1702_vm14, %vm1703_vm13  ;;  %v1687_v9 = vand.u32 2147483647, %v1677_v42 }
 0x60f   :  { %v1699_v7 = vsub.f32 1.0, %v1698_v53  ;;  %v1689_v53 = vand.u32 2147483648, %v1677_v42  ;;  %v1728_v42 = vand.u32 2147483648, %v1716_v60 }
 0x610   :  { %v1681_v45 = vmul.f32 %v3627_v0, %v1680_v47  ;;  %vm1688_vm6 = vcmp.eq.f32.partialorder %v1687_v9, 8.507059e+37  ;;  %v3955_v9 = vld [vmem:[#allocation8 + $0x120] sm:$0xff] }
 0x611   :  { %v1700_v4 = vmul.f32 %v3629_v55, %v1699_v7 }
 0x612   :  { %v1682_v8 = vadd.f32 %v3627_v0, %v1681_v45  ;;  %v6701_v45 = vld [vmem:[#allocation33_spill] sm:$0xff] }
 0x613   :  { %v3631_v32 = vpop.eup %3630  ;;  %v1701_v25 = vadd.f32 %v3629_v55, %v1700_v4  ;;  %v1690_v4 = vor.u32 1.1754944e-38, %v1689_v53  ;;  %v3954_v53 = vld [vmem:[#allocation8 + $0x140] sm:$0xff] }
 0x614   :  { %v1718_v31 = vmul.f32 %v3631_v32, %v1716_v60  ;;  %v1686_v47 = vsel %vm1685_vm4, %v3627_v0, %v1682_v8  ;;  %vm1723_vm7 = vweird.f32 %v3631_v32  ;;  %v1729_v0 = vor.u32 1.1754944e-38, %v1728_v42  ;;  %v3951_v8 = vld [vmem:[#allocation8 + $0x1a0] sm:$0xff] }
 0x615   :  { %v1643_v13 = vpop.f32.mrf.mxu2  ;;  %v1705_v38 = vsel %vm1704_vm2, %v3629_v55, %v1701_v25  ;;  %v1726_v55 = vand.u32 2147483647, %v1716_v60  ;;  %vm1724_vm9 = vmor %vm1722_vm8, %vm1723_vm7  ;;  %v3948_v60 = vld [vmem:[%s6474_s14 + $0x28] sm:$0xff] }
 0x616   :  { %v1668_v49 = vadd.f32 %v1643_v13, %v1564_v28  ;;  %v1719_v7 = vsub.f32 1.0, %v1718_v31  ;;  %v1710_v28 = vsel %vm1707_vm5, %v1709_v52, %v1705_v38  ;;  %v3956_v38 = vld [vmem:[#allocation8 + $0x100] sm:$0xff] }
 0x617   :  { %v1732_v63 = vmul.f32 %v1710_v28, %v6701_v45  ;;  %vm1727_vm10 = vcmp.eq.f32.partialorder %v1726_v55, 8.507059e+37  ;;  %v3959_v52 = vld [vmem:[#allocation8 + $0xa0] sm:$0xff]  ;;  %v1774_v45 = vpop.f32.mrf.mxu0 }
 0x618   :  { %v1672_v50 = vadd.f32 %v1668_v49, %v6700_v19  ;;  %v1720_v49 = vmul.f32 %v3631_v32, %v1719_v7  ;;  %v1691_v19 = vsel %vm1688_vm6, %v1690_v4, %v1686_v47  ;;  %v3960_v7 = vld [vmem:[#allocation8 + $0x80] sm:$0xff] }
 0x619   :  { %v3961_v47 = vld [vmem:[#allocation8 + $0x60] sm:$0xff] }
 0x61a   :  { %3632 = vtanh.f32 %v1672_v50  ;;  %v1721_v50 = vadd.f32 %v3631_v32, %v1720_v49  ;;  %v3962_v4 = vld [vmem:[#allocation8 + $0x40] sm:$0xff]  ;;  %v1754_v49 = vpop.f32.mrf.mxu1 }
 0x61b   :  { %v3963_v28 = vld [vmem:[#allocation8 + $0x20] sm:$0xff] }
 0x61c   :  { %v1725_v29 = vsel %vm1724_vm9, %v3631_v32, %v1721_v50  ;;  %v3949_v32 = vld [vmem:[#allocation8 + $0x1c0] sm:$0xff] }
 0x61d   :  { %v1730_v59 = vsel %vm1727_vm10, %v1729_v0, %v1725_v29  ;;  %v6702_v0 = vld [vmem:[#allocation48_spill] sm:$0xff] }
 0x620   :  { %v3633_v13 = vpop.eup %3632 }
 0x621   :  { %v1733_v37 = vmul.f32 %v3633_v13, %v1691_v19  ;;  %v3950_v19 = vld [vmem:[%s6474_s14 + $0x8] sm:$0xff] }
 0x622   :  { %v3964_v13 = vld [vmem:[#allocation8] sm:$0xff] }
 0x623   :  { %v5652_v14 = vadd.f32 %v1733_v37, %v1732_v63  ;;  %v3947_v63 = vld [vmem:[#allocation8 + $0x1e0] sm:$0xff]  ;;  %v1814_v37 = vpop.f32.mrf.mxu3 }
 0x625   :  { %3634 = vtanh.f32 %v5652_v14 }
 0x62b   :  { %v3635_v25 = vpop.eup %3634 }
 0x62c   :  { %v5655_v31 = vmul.f32 %v3635_v25, %v1730_v59  ;;  %v6703_v59 = vld [vmem:[#allocation49_spill] sm:$0xff] }
 0x62e   :  { %1833 = vmatmul.f32.vlgmr.msrb.gmra.mxu1 %v5655_v31  ;;  %1853 = vmatmul.f32.vlgmr.msra.gmra.mxu0 %v5655_v31 }
 0x62f   :  { %1873 = vmatmul.f32.vlgmr.msra.gmra.mxu2 %v5655_v31  ;;  %1893 = vmatmul.f32.vlgmr.msra.gmra.mxu3 %v5655_v31 }
 0x630   :  { %2308 = vmatpush.msrb.mxu1 %v3947_v63  ;;  %2157 = vmatpush.msra.mxu0 %v5374_v5  ;;  %v3952_v5 = vld [vmem:[#allocation8 + $0x180] sm:$0xff] }
 0x631   :  { %2282 = vmatpush.msra.mxu2 %v5288_v30  ;;  %2177 = vmatpush.msra.mxu3 %v3948_v60  ;;  %v3953_v30 = vld [vmem:[#allocation8 + $0x160] sm:$0xff] }
 0x632   :  { %2309 = vmatpush.msrb.mxu1 %v3949_v32  ;;  %2158 = vmatpush.msra.mxu0 %v5380_v44  ;;  %v3957_v44 = vld [vmem:[#allocation8 + $0xe0] sm:$0xff] }
 0x633   :  { %2283 = vmatpush.msra.mxu2 %v5301_v21  ;;  %2178 = vmatpush.msra.mxu3 %v3950_v19  ;;  %v3958_v21 = vld [vmem:[#allocation8 + $0xc0] sm:$0xff] }
 0x634   :  { %2310 = vmatpush.msrb.mxu1 %v3951_v8 }
 0x635   :  { %v1794_v19 = vpop.f32.mrf.mxu2 }
 0x636   :  { %2311 = vmatpush.msrb.mxu1 %v3952_v5 }
 0x638   :  { %2312 = vmatpush.msrb.mxu1 %v3953_v30  ;;  %v6704_v30 = vld [vmem:[#allocation50_spill] sm:$0xff] }
 0x63a   :  { %2313 = vmatpush.msrb.mxu1 %v3954_v53 }
 0x63c   :  { %2314 = vmatpush.msrb.mxu1 %v3955_v9 }
 0x63e   :  { %2315 = vmatpush.msrb.mxu1 %v3956_v38 }
 0x640   :  { %2316 = vmatpush.msrb.mxu1 %v3957_v44 }
 0x642   :  { %2317 = vmatpush.msrb.mxu1 %v3958_v21 }
 0x644   :  { %2318 = vmatpush.msrb.mxu1 %v3959_v52 }
 0x646   :  { %2319 = vmatpush.msrb.mxu1 %v3960_v7 }
 0x648   :  { %2320 = vmatpush.msrb.mxu1 %v3961_v47 }
 0x64a   :  { %2321 = vmatpush.msrb.mxu1 %v3962_v4 }
 0x64c   :  { %2322 = vmatpush.msrb.mxu1 %v3963_v28 }
 0x64e   :  { %2323 = vmatpush.msrb.mxu1 %v3964_v13 }
 0x6ab   :  { %v1834_v50 = vpop.f32.mrf.mxu1  ;;  %v1854_v42 = vpop.f32.mrf.mxu0 }
 0x6ac   :  { %v1835_v55 = vadd.f32 %v1834_v50, %v1754_v49  ;;  %v1855_v29 = vadd.f32 %v1854_v42, %v1774_v45  ;;  %v6705_v49 = vld [vmem:[#allocation51_spill] sm:$0xff] }
 0x6ae   :  { %v1897_v25 = vadd.f32 %v1835_v55, %v6702_v0  ;;  %v1898_v63 = vadd.f32 %v1855_v29, %v6703_v59 }
 0x6b0   :  { %v3514_v60 = vmul.f32 -1.442695, %v1897_v25  ;;  %v3515_v32 = vmul.f32 -1.442695, %v1898_v63 }
 0x6b2   :  { %3636 = vpow2.f32 %v3514_v60  ;;  %v1894_v8 = vpop.f32.mrf.mxu3  ;;  %v1874_v7 = vpop.f32.mrf.mxu2 }
 0x6b3   :  { %3638 = vpow2.f32 %v3515_v32  ;;  %v1895_v5 = vadd.f32 %v1894_v8, %v1814_v37  ;;  %v1875_v47 = vadd.f32 %v1874_v7, %v1794_v19 }
 0x6b5   :  { %v1900_v53 = vadd.f32 %v1895_v5, %v6704_v30  ;;  %v1899_v45 = vadd.f32 %v1875_v47, %v6705_v49 }
 0x6b7   :  { %v3516_v9 = vmul.f32 -1.442695, %v1900_v53 }
 0x6b8   :  { %v3637_v38 = vpop.eup %3636 }
 0x6b9   :  { %v3639_v44 = vpop.eup %3638  ;;  %v1904_v21 = vadd.f32 1.0, %v3637_v38  ;;  %3640 = vpow2.f32 %v3516_v9 }
 0x6ba   :  { %v1923_v52 = vadd.f32 1.0, %v3639_v44 }
 0x6bb   :  { %3642 = vrcp.f32 %v1904_v21  ;;  %v1916_v25 = vand.u32 2147483648, %v1904_v21  ;;  %v1914_v32 = vand.u32 2147483647, %v1904_v21  ;;  %vm1910_vm14 = vweird.f32 %v1904_v21 }
 0x6bc   :  { %3644 = vrcp.f32 %v1923_v52  ;;  %v1935_v63 = vand.u32 2147483648, %v1923_v52  ;;  %v1933_v19 = vand.u32 2147483647, %v1923_v52  ;;  %vm1929_vm15 = vweird.f32 %v1923_v52 }
 0x6bd   :  { %v1917_v9 = vor.u32 1.1754944e-38, %v1916_v25  ;;  %vm1915_vm4 = vcmp.eq.f32.partialorder %v1914_v32, 8.507059e+37 }
 0x6be   :  { %v1936_v7 = vor.u32 1.1754944e-38, %v1935_v63  ;;  %vm1934_vm5 = vcmp.eq.f32.partialorder %v1933_v19, 8.507059e+37 }
 0x6bf   :  { %v3641_v4 = vpop.eup %3640 }
 0x6c0   :  { %v1943_v28 = vadd.f32 1.0, %v3641_v4 }
 0x6c1   :  { %v3643_v13 = vpop.eup %3642 }
 0x6c2   :  { %v3645_v50 = vpop.eup %3644  ;;  %v1906_v42 = vmul.f32 %v3643_v13, %v1904_v21  ;;  %3646 = vrcp.f32 %v1943_v28  ;;  %vm1911_vm11 = vweird.f32 %v3643_v13  ;;  %v1955_v25 = vand.u32 2147483648, %v1943_v28 }
 0x6c3   :  { %v1925_v37 = vmul.f32 %v3645_v50, %v1923_v52  ;;  %3648 = vtanh.f32 %v1899_v45  ;;  %vm1930_vm13 = vweird.f32 %v3645_v50  ;;  %vm1912_vm2 = vmor %vm1910_vm14, %vm1911_vm11  ;;  %vm1949_vm7 = vweird.f32 %v1943_v28 }
 0x6c4   :  { %v1907_v55 = vsub.f32 1.0, %v1906_v42  ;;  %vm1931_vm3 = vmor %vm1929_vm15, %vm1930_vm13  ;;  %v1956_v32 = vor.u32 1.1754944e-38, %v1955_v25  ;;  %v3998_v25 = vld [vmem:[%s6480_s20 + $0x70] sm:$0xff] }
 0x6c5   :  { %v1926_v29 = vsub.f32 1.0, %v1925_v37 }
 0x6c6   :  { %v1908_v60 = vmul.f32 %v3643_v13, %v1907_v55 }
 0x6c7   :  { %v1927_v8 = vmul.f32 %v3645_v50, %v1926_v29 }
 0x6c8   :  { %v3647_v5 = vpop.eup %3646  ;;  %v1909_v53 = vadd.f32 %v3643_v13, %v1908_v60 }
 0x6c9   :  { %v1928_v38 = vadd.f32 %v3645_v50, %v1927_v8  ;;  %v1945_v44 = vmul.f32 %v3647_v5, %v1943_v28  ;;  %v3649_v4 = vpop.eup %3648  ;;  %vm1950_vm6 = vweird.f32 %v3647_v5 }
 0x6ca   :  { %v1913_v47 = vsel %vm1912_vm2, %v3643_v13, %v1909_v53  ;;  %v1953_v13 = vand.u32 2147483647, %v1943_v28  ;;  %vm1951_vm8 = vmor %vm1949_vm7, %vm1950_vm6  ;;  %v3966_v53 = vld [vmem:[#allocation11 + $0x1c0] sm:$0xff] }
 0x6cb   :  { %v1918_v45 = vsel %vm1915_vm4, %v1917_v9, %v1913_v47  ;;  %v1932_v42 = vsel %vm1931_vm3, %v3645_v50, %v1928_v38  ;;  %v1946_v37 = vsub.f32 1.0, %v1945_v44  ;;  %v3967_v28 = vld [vmem:[#allocation11 + $0x1a0] sm:$0xff] }
 0x6cc   :  { %v1937_v55 = vsel %vm1934_vm5, %v1936_v7, %v1932_v42  ;;  %v1960_v29 = vmul.f32 %v3649_v4, %v1918_v45  ;;  %vm1954_vm9 = vcmp.eq.f32.partialorder %v1953_v13, 8.507059e+37  ;;  %v3969_v9 = vld [vmem:[#allocation11 + $0x160] sm:$0xff] }
 0x6cd   :  { %v1959_v49 = vmul.f32 %v1937_v55, %v5255_v39  ;;  %v1947_v60 = vmul.f32 %v3647_v5, %v1946_v37  ;;  %v3970_v38 = vld [vmem:[#allocation11 + $0x140] sm:$0xff] }
 0x6ce   :  { %v3971_v44 = vld [vmem:[#allocation11 + $0x120] sm:$0xff] }
 0x6cf   :  { %v5676_v21 = vadd.f32 %v1960_v29, %v1959_v49  ;;  %v1948_v52 = vadd.f32 %v3647_v5, %v1947_v60  ;;  %v3965_v49 = vld [vmem:[#allocation11 + $0x1e0] sm:$0xff] }
 0x6d0   :  { %v3984_v7 = vld [vmem:[#allocation10 + $0x180] sm:$0xff] }
 0x6d1   :  { %3650 = vtanh.f32 %v5676_v21  ;;  %v1952_v63 = vsel %vm1951_vm8, %v3647_v5, %v1948_v52  ;;  %v3968_v5 = vld [vmem:[#allocation11 + $0x180] sm:$0xff]  ;;  %v3997_v52 = vld [vmem:[%s6480_s20 + $0x78] sm:$0xff] }
 0x6d2   :  { %v1957_v8 = vsel %vm1954_vm9, %v1956_v32, %v1952_v63  ;;  %v3986_v47 = vld [vmem:[#allocation10 + $0x140] sm:$0xff]  ;;  %v4000_v63 = vld [vmem:[%s6480_s20 + $0x60] sm:$0xff]  ;;  %v4001_v32 = vld [vmem:[%s6480_s20 + $0x58] sm:$0xff] }
 0x6d3   :  { %v3988_v4 = vld [vmem:[#allocation10 + $0x100] sm:$0xff] }
 0x6d4   :  { %v3990_v45 = vld [vmem:[#allocation10 + $0xc0] sm:$0xff] }
 0x6d5   :  { %v3992_v42 = vld [vmem:[#allocation10 + $0x80] sm:$0xff] }
 0x6d6   :  { %v3993_v37 = vld [vmem:[#allocation10 + $0x60] sm:$0xff] }
 0x6d7   :  { %v3651_v50 = vpop.eup %3650  ;;  %v3994_v55 = vld [vmem:[#allocation10 + $0x40] sm:$0xff] }
 0x6d8   :  { %v5679_v19 = vmul.f32 %v3651_v50, %v1957_v8  ;;  %v3995_v29 = vld [vmem:[#allocation10 + $0x20] sm:$0xff] }
 0x6d9   :  { %v3996_v60 = vld [vmem:[#allocation10] sm:$0xff] }
 0x6da   :  { %1980 = vmatmul.f32.vlgmr.msra.gmra.mxu1 %v5679_v19  ;;  %v2010_v39 = vadd.f32 %v5679_v19, %v5655_v31  ;;  %v3999_v13 = vld [vmem:[%s6480_s20 + $0x68] sm:$0xff]  ;;  %v4002_v50 = vld [vmem:[%s6480_s20 + $0x50] sm:$0xff] }
 0x6db   :  { %2459 = vmatpush.msra.mxu1 %v3965_v49  ;;  %v4003_v8 = vld [vmem:[%s6480_s20 + $0x48] sm:$0xff]  ;;  %v4005_v49 = vld [vmem:[%s6480_s20 + $0x38] sm:$0xff] }
 0x6dc   :  { %2027 = vmatmul.f32.vlgmr.msrb.gmra.mxu2 %v2010_v39  ;;  %v4004_v39 = vld [vmem:[%s6480_s20 + $0x40] sm:$0xff] }
 0x6dd   :  { %2460 = vmatpush.msra.mxu1 %v3966_v53  ;;  %2348 = vmatpush.msrb.mxu2 %v5450_v48  ;;  %v3972_v48 = vld [vmem:[#allocation11 + $0x100] sm:$0xff] }
 0x6de   :  { %v4006_v53 = vld [vmem:[%s6480_s20 + $0x30] sm:$0xff] }
 0x6df   :  { %2461 = vmatpush.msra.mxu1 %v3967_v28  ;;  %2349 = vmatpush.msrb.mxu2 %v5453_v11  ;;  %v3973_v11 = vld [vmem:[#allocation11 + $0xe0] sm:$0xff] }
 0x6e0   :  { %v4007_v28 = vld [vmem:[%s6480_s20 + $0x28] sm:$0xff] }
 0x6e1   :  { %2462 = vmatpush.msra.mxu1 %v3968_v5  ;;  %2350 = vmatpush.msrb.mxu2 %v5456_v41  ;;  %v3974_v41 = vld [vmem:[#allocation11 + $0xc0] sm:$0xff]  ;;  %v4008_v5 = vld [vmem:[%s6480_s20 + $0x20] sm:$0xff] }
 0x6e2   :  { %2324 = vmatmul.f32.vlgmr.msrb.gmra.mxu1 %v5655_v31 }
 0x6e3   :  { %2463 = vmatpush.msra.mxu1 %v3969_v9  ;;  %2351 = vmatpush.msrb.mxu2 %v5459_v16  ;;  %v3975_v16 = vld [vmem:[#allocation11 + $0xa0] sm:$0xff]  ;;  %v4009_v9 = vld [vmem:[%s6480_s20 + $0x18] sm:$0xff] }
 0x6e5   :  { %2464 = vmatpush.msra.mxu1 %v3970_v38  ;;  %2352 = vmatpush.msrb.mxu2 %v5464_v27  ;;  %v3976_v27 = vld [vmem:[#allocation11 + $0x80] sm:$0xff] }
 0x6e6   :  { %v4010_v38 = vld [vmem:[%s6480_s20 + $0x10] sm:$0xff] }
 0x6e7   :  { %2465 = vmatpush.msra.mxu1 %v3971_v44  ;;  %2353 = vmatpush.msrb.mxu2 %v5468_v61  ;;  %v3977_v61 = vld [vmem:[#allocation11 + $0x60] sm:$0xff] }
 0x6e8   :  { %v4011_v44 = vld [vmem:[%s6480_s20 + $0x8] sm:$0xff] }
 0x6e9   :  { %2466 = vmatpush.msra.mxu1 %v3972_v48  ;;  %2354 = vmatpush.msrb.mxu2 %v5471_v22  ;;  %v3978_v22 = vld [vmem:[#allocation11 + $0x40] sm:$0xff]  ;;  %v4012_v48 = vld [vmem:[%s6480_s20] sm:$0xff] }
 0x6eb   :  { %2467 = vmatpush.msra.mxu1 %v3973_v11  ;;  %2355 = vmatpush.msrb.mxu2 %v5474_v62  ;;  %v3979_v62 = vld [vmem:[#allocation11 + $0x20] sm:$0xff] }
 0x6ed   :  { %2468 = vmatpush.msra.mxu1 %v3974_v41  ;;  %2356 = vmatpush.msrb.mxu2 %v5477_v43  ;;  %v3980_v43 = vld [vmem:[#allocation11] sm:$0xff]  ;;  %v5753_v41 = vld [vmem:[%s6481_s21] ss:$0 sm:$0xff] }
 0x6ef   :  { %2469 = vmatpush.msra.mxu1 %v3975_v16  ;;  %2357 = vmatpush.msrb.mxu2 %v5480_v51  ;;  %v3981_v51 = vld [vmem:[#allocation10 + $0x1e0] sm:$0xff] }
 0x6f1   :  { %2470 = vmatpush.msra.mxu1 %v3976_v27  ;;  %2358 = vmatpush.msrb.mxu2 %v5483_v58  ;;  %v3982_v58 = vld [vmem:[#allocation10 + $0x1c0] sm:$0xff] }
 0x6f3   :  { %2471 = vmatpush.msra.mxu1 %v3977_v61  ;;  %2359 = vmatpush.msrb.mxu2 %v5486_v54  ;;  %v3983_v54 = vld [vmem:[#allocation10 + $0x1a0] sm:$0xff] }
 0x6f4   :  { %v5760_v61 = vld [vmem:[%s6474_s14 + $0x30] sm:$0xff] }
 0x6f5   :  { %2472 = vmatpush.msra.mxu1 %v3978_v22  ;;  %2360 = vmatpush.msrb.mxu2 %v5489_v6  ;;  %v3985_v6 = vld [vmem:[#allocation10 + $0x160] sm:$0xff] }
 0x6f7   :  { %2473 = vmatpush.msra.mxu1 %v3979_v62  ;;  %2361 = vmatpush.msrb.mxu2 %v5492_v17  ;;  %v3987_v17 = vld [vmem:[#allocation10 + $0x120] sm:$0xff] }
 0x6f8   :  { %v5766_v62 = vld [vmem:[%s6474_s14 + $0x10] sm:$0xff] }
 0x6f9   :  { %2474 = vmatpush.msra.mxu1 %v3980_v43  ;;  %2362 = vmatpush.msrb.mxu2 %v5495_v15  ;;  %v3989_v15 = vld [vmem:[#allocation10 + $0xe0] sm:$0xff]  ;;  %v5769_v43 = vld [vmem:[#allocation5] ss:$0 sm:$0xff] }
 0x6fa   :  { %2475 = vmatmul.f32.vlgmr.msra.gmra.mxu1 %v5679_v19 }
 0x6fb   :  { %2363 = vmatpush.msrb.mxu2 %v5498_v56  ;;  %2539 = vmatpush.msrb.mxu1 %v3981_v51  ;;  %v3991_v56 = vld [vmem:[#allocation10 + $0xa0] sm:$0xff] }
 0x6fd   :  { %2540 = vmatpush.msrb.mxu1 %v3982_v58  ;;  %v5775_v58 = vld [vmem:[%s6625_s29] ss:$0 sm:$0xff] }
 0x6ff   :  { %2541 = vmatpush.msrb.mxu1 %v3983_v54  ;;  %v6706_v54 = vld [vmem:[#allocation20_spill] sm:$0xff] }
 0x701   :  { %2542 = vmatpush.msrb.mxu1 %v3984_v7  ;;  %v496_v7 = vadd.f32 %v5775_v58, %v6706_v54 }
 0x703   :  { %2543 = vmatpush.msrb.mxu1 %v3985_v6 }
 0x705   :  { %2544 = vmatpush.msrb.mxu1 %v3986_v47 }
 0x707   :  { %2545 = vmatpush.msrb.mxu1 %v3987_v17  ;;  %v6707_v17 = vld [vmem:[#allocation27_spill] sm:$0xff] }
 0x709   :  { %2546 = vmatpush.msrb.mxu1 %v3988_v4  ;;  %v508_v4 = vadd.f32 %v5775_v58, %v6707_v17  ;;  %v5833_v17 = vld [vmem:[%s6473_s13 + $0x20] sm:$0xff] }
 0x70b   :  { %2547 = vmatpush.msrb.mxu1 %v3989_v15 }
 0x70d   :  { %2548 = vmatpush.msrb.mxu1 %v3990_v45 }
 0x70f   :  { %2549 = vmatpush.msrb.mxu1 %v3991_v56 }
 0x711   :  { %2550 = vmatpush.msrb.mxu1 %v3992_v42 }
 0x713   :  { %2551 = vmatpush.msrb.mxu1 %v3993_v37 }
 0x715   :  { %2552 = vmatpush.msrb.mxu1 %v3994_v55 }
 0x717   :  { %2553 = vmatpush.msrb.mxu1 %v3995_v29 }
 0x719   :  { %2554 = vmatpush.msrb.mxu1 %v3996_v60  ;;  %v5787_v60 = vld [vmem:[%s6474_s14 + $0x38] sm:$0xff] }
 0x71b   :  { %2686 = vmatpush.msra.mxu1 %v3997_v52 }
 0x71d   :  { %2687 = vmatpush.msra.mxu1 %v3998_v25  ;;  %v5794_v25 = vld [vmem:[%s6474_s14 + $0x18] sm:$0xff] }
 0x71f   :  { %2688 = vmatpush.msra.mxu1 %v3999_v13 }
 0x721   :  { %2689 = vmatpush.msra.mxu1 %v4000_v63 }
 0x723   :  { %2690 = vmatpush.msra.mxu1 %v4001_v32  ;;  %v5802_v32 = vld [vmem:[%s6483_s23] ss:$0 sm:$0xff] }
 0x725   :  { %2691 = vmatpush.msra.mxu1 %v4002_v50 }
 0x727   :  { %2692 = vmatpush.msra.mxu1 %v4003_v8 }
 0x729   :  { %2693 = vmatpush.msra.mxu1 %v4004_v39  ;;  %v5805_v39 = vld [vmem:[#allocation7] ss:$0 sm:$0xff] }
 0x72b   :  { %2694 = vmatpush.msra.mxu1 %v4005_v49 }
 0x72d   :  { %2695 = vmatpush.msra.mxu1 %v4006_v53 }
 0x72f   :  { %2696 = vmatpush.msra.mxu1 %v4007_v28 }
 0x731   :  { %2697 = vmatpush.msra.mxu1 %v4008_v5 }
 0x733   :  { %2698 = vmatpush.msra.mxu1 %v4009_v9 }
 0x735   :  { %2699 = vmatpush.msra.mxu1 %v4010_v38 }
 0x737   :  { %2700 = vmatpush.msra.mxu1 %v4011_v44  ;;  %v5814_v44 = vld [vmem:[%s6472_s12] ss:$0 sm:$0xff] }
 0x739   :  { %2701 = vmatpush.msra.mxu1 %v4012_v48 }
 0x757   :  { %v1981_v11 = vpop.f32.mrf.mxu1 }
 0x758   :  { %v1982_v16 = vadd.f32 %v5753_v41, %v1981_v11 }
 0x75a   :  { %v1984_v27 = vmax.f32 %v1982_v16, 0.0 }
 0x75c   :  { %3517 = vmatmul.msk.f32.vlgmr.msrb.gmra.mxu0 %vm1263_vm12, %v1984_v27 }
 0x75d   :  { %2197 = vmatpush.msrb.mxu0 %v5760_v61 }
 0x75f   :  { %v2028_v22 = vpop.f32.mrf.mxu2  ;;  %2198 = vmatpush.msrb.mxu0 %v5766_v62 }
 0x760   :  { %v2029_v51 = vadd.f32 %v5769_v43, %v2028_v22 }
 0x762   :  { %v2032_v6 = vrot.slane %v2029_v51, 1  ;;  %v2033_v47 = vperm.slane %v2029_v51, 0 }
 0x764   :  { %v2034_v15 = vperm.slane %v2032_v6, 0  ;;  %v2037_v45 = vadd.f32 %v2033_v47, %v496_v7  ;;  %v442_v7 = vld [vmem:[#allocation2 + $0x4] sm:$0x3]  ;;  %v5827_v47 = vld [vmem:[%s6473_s13 + $0x28] sm:$0xff] }
 0x765   :  { %3520 = vmatmul.msk.f32.vlgmr.msra.gmra.mxu0 %vm447_vm0, %v442_v7 }
 0x766   :  { %v2038_v56 = vadd.f32 %v2034_v15, %v508_v4  ;;  %v2039_v42 = vmax.f32 %v2037_v45, 0.0  ;;  %2262 = vmatpush.msra.mxu0 %v5827_v47  ;;  %v5839_v15 = vld [vmem:[%s6473_s13 + $0x8] sm:$0xff]  ;;  %v5845_v45 = vld [vmem:[%s6473_s13] sm:$0xff] }
 0x768   :  { %v2041_v37 = vmul.f32 %v2039_v42, %v6671_v34  ;;  %v2040_v55 = vmax.f32 %v2038_v56, 0.0  ;;  %2263 = vmatpush.msra.mxu0 %v5839_v15 }
 0x76a   :  { %v2043_v29 = vadd.f32 %v2041_v37, %v6672_v18  ;;  %v2042_v52 = vmul.f32 %v2040_v55, %v6671_v34 }
 0x76c   :  { %3518 = vmatmul.msk.f32.vlgmr.msrb.gmra.mxu3 %vm447_vm0, %v2043_v29  ;;  %v2044_v13 = vadd.f32 %v2042_v52, %v6672_v18  ;;  %v5850_v29 = vld [vmem:[#allocation8 + $0x1e8] sm:$0xff] }
 0x76d   :  { %2217 = vmatpush.msrb.mxu3 %v5787_v60  ;;  %3522 = vmatmul.msk.f32.vlgmr.msrb.gmra.mxu0 %vm447_vm0, %v442_v7  ;;  %v5856_v52 = vld [vmem:[%s6473_s13 + $0x38] sm:$0xff] }
 0x76e   :  { %2328 = vmatpush.msrb.mxu0 %v5850_v29 }
 0x76f   :  { %2218 = vmatpush.msrb.mxu3 %v5794_v25 }
 0x774   :  { %3519 = vmatmul.msk.f32.gmra.mxu3 %vm447_vm0, %v2044_v13 }
 0x77c   :  { %3521 = vmatmul.msk.f32.vlgmr.msra.gmra.mxu3 %vm447_vm0, %v442_v7 }
 0x77d   :  { %2242 = vmatpush.msra.mxu3 %v5833_v17 }
 0x77f   :  { %2243 = vmatpush.msra.mxu3 %v5845_v45 }
 0x784   :  { %3523 = vmatmul.msk.f32.vlgmr.msrb.gmra.mxu3 %vm447_vm0, %v442_v7 }
 0x785   :  { %2302 = vmatpush.msrb.mxu3 %v5856_v52 }
 0x7d9   :  { %v2005_v63 = vpop.f32.mrf.mxu0 }
 0x7da   :  { %v2006_v50 = vadd.f32 %v5802_v32, %v2005_v63 }
 0x7dc   :  { %2009 = vst [vmem:[#allocation13 + $0x2] sm:$0x3] %v2006_v50  ;;  %v5859_v50 = vld [vmem:[#allocation8 + $0x1c8] sm:$0xff] }
 0x7dd   :  { %2329 = vmatpush.msrb.mxu0 %v5859_v50 }
 0x7ef   :  { %v2068_v8 = vpop.f32.mrf.mxu3 }
 0x7f0   :  { %v2074_v49 = vadd.f32 %v5805_v39, %v2068_v8  ;;  %v5865_v8 = vld [vmem:[%s6473_s13 + $0x18] sm:$0xff] }
 0x7f1   :  { %2303 = vmatpush.msrb.mxu3 %v5865_v8 }
 0x7f2   :  { %v2076_v53 = vmax.f32 %v2074_v49, 0.0 }
 0x7f4   :  { %v2078_v28 = vmul.f32 %v2076_v53, %v6673_v3 }
 0x7f6   :  { %v2080_v5 = vadd.f32 %v2078_v28, %v6674_v12  ;;  %v5868_v28 = vld [vmem:[#allocation8 + $0x1a8] sm:$0xff] }
 0x7f7   :  { %v2071_v9 = vpop.f32.mrf.mxu3  ;;  %2330 = vmatpush.msrb.mxu0 %v5868_v28 }
 0x7f8   :  { %v2075_v38 = vadd.f32 %v5805_v39, %v2071_v9  ;;  %v2082_v48 = vmul.f32 %v5814_v44, %v2080_v5 }
 0x7fa   :  { %v2077_v11 = vmax.f32 %v2075_v38, 0.0  ;;  %v2084_v16 = vsel %vm447_vm0, %v2082_v48, 0.0  ;;  %v5871_v38 = vld [vmem:[#allocation8 + $0x188] sm:$0xff] }
 0x7fb   :  { %2085 = vadd.xlane.f32.xlu2 %v2084_v16  ;;  %2331 = vmatpush.msrb.mxu0 %v5871_v38  ;;  %v5874_v16 = vld [vmem:[#allocation8 + $0x168] sm:$0xff] }
 0x7fc   :  { %v2079_v27 = vmul.f32 %v2077_v11, %v6673_v3 }
 0x7fd   :  { %2332 = vmatpush.msrb.mxu0 %v5874_v16 }
 0x7fe   :  { %v2081_v22 = vadd.f32 %v2079_v27, %v6674_v12 }
 0x800   :  { %v2083_v51 = vmul.f32 %v5814_v44, %v2081_v22  ;;  %v5877_v22 = vld [vmem:[#allocation8 + $0x148] sm:$0xff] }
 0x801   :  { %6708 = vst [vmem:[#allocation34_spill] sm:$0xff] %v5877_v22  ;;  %2333 = vmatpush.msrb.mxu0 %v5877_v22 }
 0x802   :  { %v2087_v54 = vsel %vm447_vm0, %v2083_v51, 0.0 }
 0x803   :  { %2088 = vadd.xlane.f32.xlu2 %v2087_v54  ;;  %v5880_v54 = vld [vmem:[#allocation8 + $0x128] sm:$0xff] }
 0x804   :  { %6709 = vst [vmem:[#allocation35_spill] sm:$0xff] %v5880_v54  ;;  %2334 = vmatpush.msrb.mxu0 %v5880_v54 }
 0x86e   :  { %v2086_v6 = vpop.xlane.xlu2 %2085 }
 0x86f   :  { %v2090_v4 = vrot.slane %v2086_v6, 4 }
 0x871   :  { %v2091_v56 = vmax.f32 %v2086_v6, %v2090_v4 }
 0x873   :  { %v2092_v42 = vrot.slane %v2091_v56, 2 }
 0x875   :  { %v2093_v37 = vmax.f32 %v2091_v56, %v2092_v42 }
 0x876   :  { %v2089_v55 = vpop.xlane.xlu2 %2088 }
 0x877   :  { %v2094_v13 = vrot.slane %v2093_v37, 1  ;;  %v2096_v63 = vrot.slane %v2089_v55, 4 }
 0x879   :  { %v2095_v49 = vmax.f32 %v2093_v37, %v2094_v13  ;;  %v2097_v53 = vmax.f32 %v2089_v55, %v2096_v63  ;;  %v5886_v37 = vld [vmem:[#allocation8 + $0xe8] sm:$0xff] }
 0x87a   :  { %6711 = vst [vmem:[#allocation37_spill] sm:$0xff] %v5886_v37  ;;  %v5889_v63 = vld [vmem:[#allocation8 + $0xc8] sm:$0xff] }
 0x87b   :  { %v2102_v5 = vsub.f32 %v2086_v6, %v2095_v49  ;;  %v2098_v9 = vrot.slane %v2097_v53, 2  ;;  %v5883_v6 = vld [vmem:[#allocation8 + $0x108] sm:$0xff]  ;;  %6712 = vst [vmem:[#allocation38_spill] sm:$0xff] %v5889_v63 }
 0x87c   :  { %6710 = vst [vmem:[#allocation36_spill] sm:$0xff] %v5883_v6  ;;  %2335 = vmatpush.msrb.mxu0 %v5883_v6 }
 0x87d   :  { %v2104_v48 = vmul.f32 1.442695, %v2102_v5  ;;  %v2099_v11 = vmax.f32 %v2097_v53, %v2098_v9  ;;  %v5892_v53 = vld [vmem:[#allocation8 + $0xa8] sm:$0xff] }
 0x87e   :  { %2336 = vmatpush.msrb.mxu0 %v5886_v37  ;;  %6713 = vst [vmem:[#allocation33_spill] sm:$0xff] %v5892_v53  ;;  %v5895_v5 = vld [vmem:[#allocation8 + $0x88] sm:$0xff] }
 0x87f   :  { %3652 = vpow2.f32 %v2104_v48  ;;  %v2100_v27 = vrot.slane %v2099_v11, 1  ;;  %6714 = vst [vmem:[#allocation48_spill] sm:$0xff] %v5895_v5 }
 0x880   :  { %2337 = vmatpush.msrb.mxu0 %v5889_v63 }
 0x881   :  { %v2101_v51 = vmax.f32 %v2099_v11, %v2100_v27  ;;  %v5898_v27 = vld [vmem:[#allocation8 + $0x68] sm:$0xff] }
 0x882   :  { %2338 = vmatpush.msrb.mxu0 %v5892_v53  ;;  %6715 = vst [vmem:[#allocation49_spill] sm:$0xff] %v5898_v27 }
 0x883   :  { %v2103_v7 = vsub.f32 %v2089_v55, %v2101_v51 }
 0x884   :  { %2339 = vmatpush.msrb.mxu0 %v5895_v5  ;;  %v5907_v5 = vld [vmem:[#allocation8 + $0x8] sm:$0xff] }
 0x885   :  { %v3653_v4 = vpop.eup %3652  ;;  %v2106_v56 = vmul.f32 1.442695, %v2103_v7  ;;  %6718 = vst [vmem:[#allocation27_spill] sm:$0xff] %v5907_v5 }
 0x886   :  { %v2108_v42 = vrot.slane %v3653_v4, 4  ;;  %2340 = vmatpush.msrb.mxu0 %v5898_v27 }
 0x887   :  { %3654 = vpow2.f32 %v2106_v56  ;;  %v5901_v56 = vld [vmem:[#allocation8 + $0x48] sm:$0xff] }
 0x888   :  { %v2109_v13 = vadd.f32 %v3653_v4, %v2108_v42  ;;  %6716 = vst [vmem:[#allocation50_spill] sm:$0xff] %v5901_v56  ;;  %2341 = vmatpush.msrb.mxu0 %v5901_v56 }
 0x88a   :  { %v2110_v49 = vrot.slane %v2109_v13, 2 }
 0x88c   :  { %v2111_v55 = vadd.f32 %v2110_v49, %v2109_v13  ;;  %v5904_v13 = vld [vmem:[#allocation8 + $0x28] sm:$0xff] }
 0x88d   :  { %v3655_v9 = vpop.eup %3654  ;;  %6717 = vst [vmem:[#allocation20_spill] sm:$0xff] %v5904_v13  ;;  %2342 = vmatpush.msrb.mxu0 %v5904_v13 }
 0x88e   :  { %v2112_v48 = vrot.slane %v2111_v55, 1  ;;  %v2114_v11 = vrot.slane %v3655_v9, 4 }
 0x88f   :  { %2343 = vmatpush.msrb.mxu0 %v5907_v5 }
 0x890   :  { %v2113_v51 = vadd.f32 %v2112_v48, %v2111_v55  ;;  %v2115_v7 = vadd.f32 %v3655_v9, %v2114_v11  ;;  %v4045_v48 = vld [vmem:[%s6618_s27 + $0x10] sm:$0xff] }
 0x892   :  { %3656 = vrcp.f32 %v2113_v51  ;;  %v2116_v42 = vrot.slane %v2115_v7, 2 }
 0x894   :  { %v2117_v49 = vadd.f32 %v2116_v42, %v2115_v7  ;;  %v4046_v42 = vld [vmem:[%s6618_s27 + $0x30] sm:$0xff] }
 0x896   :  { %v2118_v53 = vrot.slane %v2117_v49, 1 }
 0x898   :  { %v3657_v63 = vpop.eup %3656  ;;  %v2119_v27 = vadd.f32 %v2118_v53, %v2117_v49 }
 0x899   :  { %v2122_v55 = vmul.f32 %v3657_v63, %v3653_v4 }
 0x89a   :  { %3658 = vrcp.f32 %v2119_v27 }
 0x89b   :  { %v2124_v11 = vmul.f32 %v4045_v48, %v2122_v55 }
 0x89d   :  { %v2126_v51 = vsel %vm447_vm0, %v2124_v11, 0.0 }
 0x89e   :  { %v2127_v56 = vrot.slane %v2126_v51, 4 }
 0x8a0   :  { %v3659_v37 = vpop.eup %3658  ;;  %v2128_v13 = vadd.f32 %v2127_v56, %v2126_v51  ;;  %v5957_v51 = vld [vmem:[#allocation8 + $0x158] sm:$0xff] }
 0x8a1   :  { %v2123_v7 = vmul.f32 %v3659_v37, %v3655_v9  ;;  %v5922_v37 = vld [vmem:[#allocation8 + $0x1f8] sm:$0xff]  ;;  %v5939_v9 = vld [vmem:[#allocation11 + $0x1a8] sm:$0xff] }
 0x8a2   :  { %v2129_v6 = vrot.slane %v2128_v13, 2  ;;  %6721 = vst [vmem:[#allocation56_spill] sm:$0xff] %v5939_v9 }
 0x8a3   :  { %v2125_v5 = vmul.f32 %v4046_v42, %v2123_v7  ;;  %v4058_v7 = vld [vmem:[#allocation11 + $0x148] sm:$0xff] }
 0x8a4   :  { %v2130_v53 = vadd.f32 %v2129_v6, %v2128_v13  ;;  %v5925_v6 = vld [vmem:[#allocation11 + $0x1e8] sm:$0xff] }
 0x8a5   :  { %v2133_v4 = vsel %vm447_vm0, %v2125_v5, 0.0  ;;  %6719 = vst [vmem:[#allocation54_spill] sm:$0xff] %v5925_v6  ;;  %v5936_v5 = vld [vmem:[#allocation8 + $0x1b8] sm:$0xff]  ;;  %v5946_v13 = vld [vmem:[#allocation11 + $0x188] sm:$0xff] }
 0x8a6   :  { %v2134_v63 = vrot.slane %v2133_v4, 4  ;;  %v2131_v54 = vrot.slane %v2130_v53, 1  ;;  %6722 = vst [vmem:[#allocation57_spill] sm:$0xff] %v5946_v13  ;;  %v4060_v42 = vld [vmem:[#allocation11 + $0x128] sm:$0xff] }
 0x8a8   :  { %v2135_v27 = vadd.f32 %v2134_v63, %v2133_v4  ;;  %v2132_v11 = vadd.f32 %v2131_v54, %v2130_v53  ;;  %v5929_v54 = vld [vmem:[#allocation8 + $0x1d8] sm:$0xff] }
 0x8a9   :  { %v5965_v4 = vld [vmem:[#allocation8 + $0x118] sm:$0xff] }
 0x8aa   :  { %v2136_v49 = vrot.slane %v2135_v27, 2  ;;  %6723 = vst [vmem:[#allocation58_spill] sm:$0xff] %v5965_v4  ;;  %v5969_v63 = vld [vmem:[#allocation8 + $0xf8] sm:$0xff] }
 0x8ab   :  { %6724 = vst [vmem:[#allocation59_spill] sm:$0xff] %v5969_v63  ;;  %v5973_v53 = vld [vmem:[#allocation8 + $0xd8] sm:$0xff] }
 0x8ac   :  { %v2137_v55 = vadd.f32 %v2136_v49, %v2135_v27  ;;  %6725 = vst [vmem:[#allocation60_spill] sm:$0xff] %v5973_v53  ;;  %v5977_v27 = vld [vmem:[#allocation8 + $0xb8] sm:$0xff] }
 0x8ad   :  { %6726 = vst [vmem:[#allocation61_spill] sm:$0xff] %v5977_v27  ;;  %v5981_v49 = vld [vmem:[#allocation8 + $0x98] sm:$0xff] }
 0x8ae   :  { %v2138_v48 = vrot.slane %v2137_v55, 1  ;;  %6727 = vst [vmem:[#allocation62_spill] sm:$0xff] %v5981_v49 }
 0x8b0   :  { %v2139_v22 = vadd.f32 %v2138_v48, %v2137_v55  ;;  %v5985_v55 = vld [vmem:[#allocation8 + $0x78] sm:$0xff] }
 0x8b1   :  { %6728 = vst [vmem:[#allocation63_spill] sm:$0xff] %v5985_v55  ;;  %v5989_v48 = vld [vmem:[#allocation8 + $0x58] sm:$0xff] }
 0x8b2   :  { %v2225_v56 = vsel %vm756_vm1, %v2139_v22, %v2132_v11  ;;  %v5932_v22 = vld [vmem:[#allocation11 + $0x1c8] sm:$0xff]  ;;  %6729 = vst [vmem:[#allocation64_spill] sm:$0xff] %v5989_v48 }
 0x8b3   :  { %3524 = vmatmul.msk.f32.vlgmr.msra.gmra.mxu3 %vm447_vm0, %v2225_v56  ;;  %3525 = vmatmul.msk.f32.vlgmr.msra.gmra.mxu0 %vm447_vm0, %v2225_v56  ;;  %6720 = vst [vmem:[#allocation55_spill] sm:$0xff] %v5932_v22  ;;  %v6730_v11 = vld [vmem:[#allocation39_spill] sm:$0xff] }
 0x8b4   :  { %3526 = vmatmul.msk.f32.vlgmr.msra.gmra.mxu2 %vm447_vm0, %v2225_v56  ;;  %2368 = vmatpush.msra.mxu3 %v5922_v37 }
 0x8b5   :  { %2479 = vmatpush.msra.mxu0 %v5925_v6  ;;  %2499 = vmatpush.msra.mxu2 %v5503_v33  ;;  %v5943_v33 = vld [vmem:[#allocation8 + $0x198] sm:$0xff] }
 0x8b6   :  { %2369 = vmatpush.msra.mxu3 %v5929_v54 }
 0x8b7   :  { %2480 = vmatpush.msra.mxu0 %v5932_v22  ;;  %2500 = vmatpush.msra.mxu2 %v5507_v46  ;;  %v5953_v46 = vld [vmem:[#allocation8 + $0x178] sm:$0xff] }
 0x8b8   :  { %2370 = vmatpush.msra.mxu3 %v5936_v5 }
 0x8b9   :  { %2481 = vmatpush.msra.mxu0 %v5939_v9  ;;  %2501 = vmatpush.msra.mxu2 %v5510_v23  ;;  %v4056_v23 = vld [vmem:[#allocation11 + $0x168] sm:$0xff] }
 0x8ba   :  { %2371 = vmatpush.msra.mxu3 %v5943_v33 }
 0x8bb   :  { %2482 = vmatpush.msra.mxu0 %v5946_v13  ;;  %2502 = vmatpush.msra.mxu2 %v5513_v26  ;;  %v5961_v26 = vld [vmem:[#allocation8 + $0x138] sm:$0xff] }
 0x8bc   :  { %3527 = vmatmul.msk.f32.vlgmr.msrb.gmra.mxu3 %vm447_vm0, %v2225_v56  ;;  %2344 = vmatmul.f32.vlgmr.msrb.gmra.mxu0 %v5655_v31  ;;  %v5993_v56 = vld [vmem:[#allocation8 + $0x38] sm:$0xff] }
 0x8bd   :  { %2364 = vmatmul.f32.vlgmr.msrb.gmra.mxu2 %v5655_v31  ;;  %2372 = vmatpush.msra.mxu3 %v5953_v46  ;;  %6731 = vst [vmem:[#allocation39_spill] sm:$0xff] %v5993_v56 }
 0x8be   :  { %2483 = vmatpush.msra.mxu0 %v4056_v23  ;;  %2503 = vmatpush.msra.mxu2 %v5516_v2  ;;  %v4062_v2 = vld [vmem:[#allocation11 + $0x108] sm:$0xff]  ;;  %v6732_v23 = vld [vmem:[#allocation40_spill] sm:$0xff] }
 0x8bf   :  { %2373 = vmatpush.msra.mxu3 %v5957_v51 }
 0x8c0   :  { %2484 = vmatpush.msra.mxu0 %v4058_v7  ;;  %2504 = vmatpush.msra.mxu2 %v5519_v36  ;;  %v4064_v36 = vld [vmem:[#allocation11 + $0xe8] sm:$0xff]  ;;  %v5997_v7 = vld [vmem:[#allocation8 + $0x18] sm:$0xff] }
 0x8c1   :  { %2374 = vmatpush.msra.mxu3 %v5961_v26  ;;  %6733 = vst [vmem:[#allocation40_spill] sm:$0xff] %v5997_v7 }
 0x8c2   :  { %2485 = vmatpush.msra.mxu0 %v4060_v42  ;;  %2505 = vmatpush.msra.mxu2 %v5522_v20  ;;  %v4066_v20 = vld [vmem:[#allocation11 + $0xc8] sm:$0xff]  ;;  %v6734_v42 = vld [vmem:[#allocation41_spill] sm:$0xff] }
 0x8c3   :  { %2375 = vmatpush.msra.mxu3 %v5965_v4 }
 0x8c4   :  { %2486 = vmatpush.msra.mxu0 %v4062_v2  ;;  %2506 = vmatpush.msra.mxu2 %v5525_v1  ;;  %v4068_v1 = vld [vmem:[#allocation11 + $0xa8] sm:$0xff]  ;;  %v6004_v2 = vld [vmem:[#allocation11 + $0x1f8] sm:$0xff] }
 0x8c5   :  { %2376 = vmatpush.msra.mxu3 %v5969_v63  ;;  %6735 = vst [vmem:[#allocation41_spill] sm:$0xff] %v6004_v2 }
 0x8c6   :  { %2487 = vmatpush.msra.mxu0 %v4064_v36  ;;  %2507 = vmatpush.msra.mxu2 %v5528_v24  ;;  %v4070_v24 = vld [vmem:[#allocation11 + $0x88] sm:$0xff] }
 0x8c7   :  { %2377 = vmatpush.msra.mxu3 %v5973_v53  ;;  %v4080_v36 = vld [vmem:[#allocation10 + $0x1e8] sm:$0xff] }
 0x8c8   :  { %2488 = vmatpush.msra.mxu0 %v4066_v20  ;;  %2508 = vmatpush.msra.mxu2 %v5531_v40  ;;  %v4072_v40 = vld [vmem:[#allocation11 + $0x68] sm:$0xff]  ;;  %v6736_v20 = vld [vmem:[#allocation42_spill] sm:$0xff] }
 0x8c9   :  { %2378 = vmatpush.msra.mxu3 %v5977_v27  ;;  %v6784_v27 = vld [vmem:[#allocation32_spill] sm:$0xff] }
 0x8ca   :  { %2489 = vmatpush.msra.mxu0 %v4068_v1  ;;  %2509 = vmatpush.msra.mxu2 %v5534_v57  ;;  %v4074_v57 = vld [vmem:[#allocation11 + $0x48] sm:$0xff]  ;;  %v6008_v1 = vld [vmem:[#allocation11 + $0x1d8] sm:$0xff] }
 0x8cb   :  { %2379 = vmatpush.msra.mxu3 %v5981_v49  ;;  %6737 = vst [vmem:[#allocation42_spill] sm:$0xff] %v6008_v1 }
 0x8cc   :  { %2490 = vmatpush.msra.mxu0 %v4070_v24  ;;  %2510 = vmatpush.msra.mxu2 %v5537_v35  ;;  %v4076_v35 = vld [vmem:[#allocation11 + $0x28] sm:$0xff] }
 0x8cd   :  { %2380 = vmatpush.msra.mxu3 %v5985_v55  ;;  %v4082_v24 = vld [vmem:[#allocation10 + $0x1c8] sm:$0xff] }
 0x8ce   :  { %2491 = vmatpush.msra.mxu0 %v4072_v40  ;;  %2511 = vmatpush.msra.mxu2 %v5540_v10  ;;  %v4078_v10 = vld [vmem:[#allocation11 + $0x8] sm:$0xff] }
 0x8cf   :  { %2381 = vmatpush.msra.mxu3 %v5989_v48  ;;  %v6738_v40 = vld [vmem:[#allocation43_spill] sm:$0xff] }
 0x8d0   :  { %2492 = vmatpush.msra.mxu0 %v4074_v57  ;;  %2512 = vmatpush.msra.mxu2 %v6730_v11  ;;  %v4084_v57 = vld [vmem:[#allocation10 + $0x1a8] sm:$0xff]  ;;  %v6740_v11 = vld [vmem:[#allocation44_spill] sm:$0xff] }
 0x8d1   :  { %2382 = vmatpush.msra.mxu3 %v5993_v56 }
 0x8d2   :  { %2493 = vmatpush.msra.mxu0 %v4076_v35  ;;  %2513 = vmatpush.msra.mxu2 %v6732_v23  ;;  %v6016_v35 = vld [vmem:[#allocation11 + $0x198] sm:$0xff]  ;;  %v4086_v23 = vld [vmem:[#allocation10 + $0x188] sm:$0xff] }
 0x8d3   :  { %2383 = vmatpush.msra.mxu3 %v5997_v7  ;;  %6741 = vst [vmem:[#allocation44_spill] sm:$0xff] %v6016_v35 }
 0x8d4   :  { %2494 = vmatpush.msra.mxu0 %v4078_v10  ;;  %2514 = vmatpush.msra.mxu2 %v6734_v42  ;;  %v6742_v10 = vld [vmem:[#allocation45_spill] sm:$0xff] }
 0x8d5   :  { %2384 = vmatmul.f32.vlgmr.msra.gmra.mxu3 %v5655_v31  ;;  %2495 = vmatmul.f32.vlgmr.msra.gmra.mxu0 %v5679_v19  ;;  %v6012_v31 = vld [vmem:[#allocation11 + $0x1b8] sm:$0xff] }
 0x8d6   :  { %2515 = vmatmul.f32.vlgmr.msra.gmra.mxu2 %v5679_v19  ;;  %2519 = vmatpush.msrb.mxu3 %v6004_v2  ;;  %6739 = vst [vmem:[#allocation43_spill] sm:$0xff] %v6012_v31  ;;  %v6020_v42 = vld [vmem:[#allocation11 + $0x178] sm:$0xff] }
 0x8d7   :  { %2559 = vmatpush.msrb.mxu0 %v4080_v36  ;;  %2579 = vmatpush.msrb.mxu2 %v6736_v20  ;;  %6743 = vst [vmem:[#allocation45_spill] sm:$0xff] %v6020_v42  ;;  %v4088_v36 = vld [vmem:[#allocation10 + $0x168] sm:$0xff]  ;;  %v6744_v20 = vld [vmem:[#allocation46_spill] sm:$0xff] }
 0x8d8   :  { %2520 = vmatpush.msrb.mxu3 %v6008_v1  ;;  %v6781_v1 = vld [vmem:[#allocation29_spill] sm:$0xff] }
 0x8d9   :  { %2560 = vmatpush.msrb.mxu0 %v4082_v24  ;;  %2580 = vmatpush.msrb.mxu2 %v6738_v40  ;;  %v6024_v24 = vld [vmem:[#allocation11 + $0x158] sm:$0xff]  ;;  %v4090_v40 = vld [vmem:[#allocation10 + $0x148] sm:$0xff] }
 0x8da   :  { %2521 = vmatpush.msrb.mxu3 %v6012_v31  ;;  %6745 = vst [vmem:[#allocation46_spill] sm:$0xff] %v6024_v24 }
 0x8db   :  { %2561 = vmatpush.msrb.mxu0 %v4084_v57  ;;  %2581 = vmatpush.msrb.mxu2 %v6740_v11  ;;  %v6746_v57 = vld [vmem:[#allocation47_spill] sm:$0xff]  ;;  %v6028_v11 = vld [vmem:[#allocation11 + $0x138] sm:$0xff] }
 0x8dc   :  { %2522 = vmatpush.msrb.mxu3 %v6016_v35  ;;  %6747 = vst [vmem:[#allocation47_spill] sm:$0xff] %v6028_v11  ;;  %v2325_v35 = vpop.f32.mrf.mxu1 }
 0x8dd   :  { %2562 = vmatpush.msrb.mxu0 %v4086_v23  ;;  %2582 = vmatpush.msrb.mxu2 %v6742_v10  ;;  %v4092_v23 = vld [vmem:[#allocation10 + $0x128] sm:$0xff] }
 0x8de   :  { %2523 = vmatpush.msrb.mxu3 %v6020_v42  ;;  %v6748_v10 = vld [vmem:[#allocation19_spill] sm:$0xff]  ;;  %v6032_v42 = vld [vmem:[#allocation11 + $0x118] sm:$0xff] }
 0x8df   :  { %2563 = vmatpush.msrb.mxu0 %v4088_v36  ;;  %2583 = vmatpush.msrb.mxu2 %v6744_v20  ;;  %6749 = vst [vmem:[#allocation19_spill] sm:$0xff] %v6032_v42  ;;  %v4094_v36 = vld [vmem:[#allocation10 + $0x108] sm:$0xff]  ;;  %v6750_v20 = vld [vmem:[#allocation26_spill] sm:$0xff] }
 0x8e0   :  { %2524 = vmatpush.msrb.mxu3 %v6024_v24  ;;  %v6036_v24 = vld [vmem:[#allocation11 + $0xf8] sm:$0xff] }
 0x8e1   :  { %2564 = vmatpush.msrb.mxu0 %v4090_v40  ;;  %2584 = vmatpush.msrb.mxu2 %v6746_v57  ;;  %6751 = vst [vmem:[#allocation26_spill] sm:$0xff] %v6036_v24  ;;  %v4096_v40 = vld [vmem:[#allocation10 + $0xe8] sm:$0xff]  ;;  %v6752_v57 = vld [vmem:[#allocation22_spill] sm:$0xff] }
 0x8e2   :  { %2525 = vmatpush.msrb.mxu3 %v6028_v11  ;;  %v6040_v11 = vld [vmem:[#allocation11 + $0xd8] sm:$0xff] }
 0x8e3   :  { %2565 = vmatpush.msrb.mxu0 %v4092_v23  ;;  %2585 = vmatpush.msrb.mxu2 %v6748_v10  ;;  %6753 = vst [vmem:[#allocation22_spill] sm:$0xff] %v6040_v11  ;;  %v4098_v23 = vld [vmem:[#allocation10 + $0xc8] sm:$0xff] }
 0x8e4   :  { %2526 = vmatpush.msrb.mxu3 %v6032_v42  ;;  %v6754_v10 = vld [vmem:[#allocation23_spill] sm:$0xff]  ;;  %v6044_v42 = vld [vmem:[#allocation11 + $0xb8] sm:$0xff] }
 0x8e5   :  { %2566 = vmatpush.msrb.mxu0 %v4094_v36  ;;  %2586 = vmatpush.msrb.mxu2 %v6750_v20  ;;  %6755 = vst [vmem:[#allocation23_spill] sm:$0xff] %v6044_v42  ;;  %v4100_v36 = vld [vmem:[#allocation10 + $0xa8] sm:$0xff]  ;;  %v6756_v20 = vld [vmem:[#allocation24_spill] sm:$0xff] }
 0x8e6   :  { %2527 = vmatpush.msrb.mxu3 %v6036_v24  ;;  %v6048_v24 = vld [vmem:[#allocation11 + $0x98] sm:$0xff] }
 0x8e7   :  { %2567 = vmatpush.msrb.mxu0 %v4096_v40  ;;  %2587 = vmatpush.msrb.mxu2 %v6752_v57  ;;  %6757 = vst [vmem:[#allocation24_spill] sm:$0xff] %v6048_v24  ;;  %v4102_v40 = vld [vmem:[#allocation10 + $0x88] sm:$0xff]  ;;  %v6758_v57 = vld [vmem:[#allocation25_spill] sm:$0xff] }
 0x8e8   :  { %2528 = vmatpush.msrb.mxu3 %v6040_v11  ;;  %v6052_v11 = vld [vmem:[#allocation11 + $0x78] sm:$0xff] }
 0x8e9   :  { %2568 = vmatpush.msrb.mxu0 %v4098_v23  ;;  %2588 = vmatpush.msrb.mxu2 %v6754_v10  ;;  %6759 = vst [vmem:[#allocation25_spill] sm:$0xff] %v6052_v11  ;;  %v4104_v23 = vld [vmem:[#allocation10 + $0x68] sm:$0xff]  ;;  %v6760_v10 = vld [vmem:[#allocation52_spill] sm:$0xff] }
 0x8ea   :  { %2529 = vmatpush.msrb.mxu3 %v6044_v42  ;;  %v6056_v42 = vld [vmem:[#allocation11 + $0x58] sm:$0xff] }
 0x8eb   :  { %2569 = vmatpush.msrb.mxu0 %v4100_v36  ;;  %2589 = vmatpush.msrb.mxu2 %v6756_v20  ;;  %6761 = vst [vmem:[#allocation52_spill] sm:$0xff] %v6056_v42  ;;  %v4106_v36 = vld [vmem:[#allocation10 + $0x48] sm:$0xff]  ;;  %v6762_v20 = vld [vmem:[#allocation53_spill] sm:$0xff] }
 0x8ec   :  { %2530 = vmatpush.msrb.mxu3 %v6048_v24  ;;  %v6060_v24 = vld [vmem:[#allocation11 + $0x38] sm:$0xff] }
 0x8ed   :  { %2570 = vmatpush.msrb.mxu0 %v4102_v40  ;;  %2590 = vmatpush.msrb.mxu2 %v6758_v57  ;;  %6763 = vst [vmem:[#allocation53_spill] sm:$0xff] %v6060_v24  ;;  %v4108_v40 = vld [vmem:[#allocation10 + $0x28] sm:$0xff]  ;;  %v4109_v57 = vld [vmem:[#allocation10 + $0x30] sm:$0xff] }
 0x8ee   :  { %2531 = vmatpush.msrb.mxu3 %v6052_v11  ;;  %v6063_v11 = vld [vmem:[#allocation11 + $0x18] sm:$0xff] }
 0x8ef   :  { %2571 = vmatpush.msrb.mxu0 %v4104_v23  ;;  %2591 = vmatpush.msrb.mxu2 %v6760_v10  ;;  %6764 = vst [vmem:[#allocation65_spill] sm:$0xff] %v6063_v11  ;;  %v4111_v23 = vld [vmem:[#allocation10 + $0x8] sm:$0xff]  ;;  %v6067_v10 = vld [vmem:[#allocation10 + $0x1f8] sm:$0xff] }
 0x8f0   :  { %2532 = vmatpush.msrb.mxu3 %v6056_v42  ;;  %6765 = vst [vmem:[#allocation66_spill] sm:$0xff] %v6067_v10 }
 0x8f1   :  { %2572 = vmatpush.msrb.mxu0 %v4106_v36  ;;  %2592 = vmatpush.msrb.mxu2 %v6762_v20  ;;  %v4113_v36 = vld [vmem:[#allocation10 + $0x10] sm:$0xff] }
 0x8f2   :  { %2533 = vmatpush.msrb.mxu3 %v6060_v24  ;;  %v4114_v20 = vld [vmem:[%s6617_s0 + $0x78] sm:$0xff] }
 0x8f3   :  { %2573 = vmatpush.msrb.mxu0 %v4108_v40  ;;  %2593 = vmatpush.msrb.mxu2 %v4109_v57  ;;  %v4115_v40 = vld [vmem:[%s6482_s22 + $0x38] sm:$0xff]  ;;  %v6076_v57 = vld [vmem:[#allocation10 + $0x1d8] sm:$0xff] }
 0x8f4   :  { %2534 = vmatpush.msrb.mxu3 %v6063_v11  ;;  %6766 = vst [vmem:[#allocation67_spill] sm:$0xff] %v6076_v57 }
 0x8f5   :  { %2535 = vmatmul.f32.vlgmr.msrb.gmra.mxu3 %v5679_v19  ;;  %2574 = vmatpush.msrb.mxu0 %v4111_v23  ;;  %v4117_v19 = vld [vmem:[%s6617_s0 + $0x70] sm:$0xff] }
 0x8f6   :  { %2599 = vmatpush.msra.mxu3 %v6067_v10  ;;  %2594 = vmatpush.msrb.mxu2 %v4113_v36  ;;  %v4118_v23 = vld [vmem:[%s6482_s22 + $0x30] sm:$0xff]  ;;  %v6085_v36 = vld [vmem:[#allocation10 + $0x1b8] sm:$0xff] }
 0x8f7   :  { %2718 = vmatpush.msra.mxu0 %v4115_v40  ;;  %6767 = vst [vmem:[#allocation68_spill] sm:$0xff] %v6085_v36  ;;  %v4121_v40 = vld [vmem:[%s6482_s22 + $0x28] sm:$0xff] }
 0x8f8   :  { %2733 = vmatpush.msra.mxu2 %v4114_v20  ;;  %2600 = vmatpush.msra.mxu3 %v6076_v57  ;;  %v4120_v20 = vld [vmem:[%s6617_s0 + $0x68] sm:$0xff] }
 0x8f9   :  { %2719 = vmatpush.msra.mxu0 %v4118_v23  ;;  %v4123_v23 = vld [vmem:[%s6617_s0 + $0x60] sm:$0xff] }
 0x8fa   :  { %2734 = vmatpush.msra.mxu2 %v4117_v19  ;;  %2601 = vmatpush.msra.mxu3 %v6085_v36  ;;  %v6094_v19 = vld [vmem:[#allocation10 + $0x198] sm:$0xff] }
 0x8fb   :  { %2720 = vmatpush.msra.mxu0 %v4121_v40  ;;  %6768 = vst [vmem:[#allocation69_spill] sm:$0xff] %v6094_v19  ;;  %v4124_v36 = vld [vmem:[%s6482_s22 + $0x20] sm:$0xff]  ;;  %v4126_v40 = vld [vmem:[%s6617_s0 + $0x58] sm:$0xff] }
 0x8fc   :  { %2735 = vmatpush.msra.mxu2 %v4120_v20  ;;  %2602 = vmatpush.msra.mxu3 %v6094_v19  ;;  %v6103_v20 = vld [vmem:[#allocation10 + $0x178] sm:$0xff]  ;;  %v4127_v19 = vld [vmem:[%s6482_s22 + $0x18] sm:$0xff] }
 0x8fd   :  { %2721 = vmatpush.msra.mxu0 %v4124_v36  ;;  %6769 = vst [vmem:[#allocation70_spill] sm:$0xff] %v6103_v20  ;;  %v4129_v36 = vld [vmem:[%s6617_s0 + $0x50] sm:$0xff]  ;;  %v6151_v57 = vld [vmem:[#allocation10 + $0xb8] sm:$0xff] }
 0x8fe   :  { %2736 = vmatpush.msra.mxu2 %v4123_v23  ;;  %2603 = vmatpush.msra.mxu3 %v6103_v20  ;;  %v6112_v23 = vld [vmem:[#allocation10 + $0x158] sm:$0xff]  ;;  %v4130_v20 = vld [vmem:[%s6482_s22 + $0x10] sm:$0xff]  ;;  %6775 = vst [vmem:[#allocation76_spill] sm:$0xff] %v6151_v57 }
 0x8ff   :  { %2722 = vmatpush.msra.mxu0 %v4127_v19  ;;  %6770 = vst [vmem:[#allocation71_spill] sm:$0xff] %v6112_v23  ;;  %v4132_v19 = vld [vmem:[%s6617_s0 + $0x48] sm:$0xff] }
 0x900   :  { %2737 = vmatpush.msra.mxu2 %v4126_v40  ;;  %2604 = vmatpush.msra.mxu3 %v6112_v23  ;;  %v6121_v40 = vld [vmem:[#allocation10 + $0x138] sm:$0xff] }
 0x901   :  { %2723 = vmatpush.msra.mxu0 %v4130_v20  ;;  %6771 = vst [vmem:[#allocation72_spill] sm:$0xff] %v6121_v40  ;;  %v4133_v23 = vld [vmem:[%s6482_s22 + $0x8] sm:$0xff]  ;;  %v4135_v20 = vld [vmem:[%s6617_s0 + $0x40] sm:$0xff] }
 0x902   :  { %2738 = vmatpush.msra.mxu2 %v4129_v36  ;;  %2605 = vmatpush.msra.mxu3 %v6121_v40  ;;  %v6130_v36 = vld [vmem:[#allocation10 + $0x118] sm:$0xff] }
 0x903   :  { %2724 = vmatpush.msra.mxu0 %v4133_v23  ;;  %6772 = vst [vmem:[#allocation73_spill] sm:$0xff] %v6130_v36  ;;  %v4136_v40 = vld [vmem:[%s6482_s22] sm:$0xff]  ;;  %v4138_v23 = vld [vmem:[%s6617_s0 + $0x38] sm:$0xff] }
 0x904   :  { %2739 = vmatpush.msra.mxu2 %v4132_v19  ;;  %2606 = vmatpush.msra.mxu3 %v6130_v36  ;;  %v6139_v19 = vld [vmem:[#allocation10 + $0xf8] sm:$0xff] }
 0x905   :  { %2725 = vmatpush.msra.mxu0 %v4136_v40  ;;  %6773 = vst [vmem:[#allocation74_spill] sm:$0xff] %v6139_v19  ;;  %v6145_v36 = vld [vmem:[#allocation10 + $0xd8] sm:$0xff] }
 0x906   :  { %2740 = vmatpush.msra.mxu2 %v4135_v20  ;;  %2607 = vmatpush.msra.mxu3 %v6139_v19  ;;  %6774 = vst [vmem:[#allocation75_spill] sm:$0xff] %v6145_v36  ;;  %v4140_v20 = vld [vmem:[%s6617_s0 + $0x30] sm:$0xff]  ;;  %v4142_v40 = vld [vmem:[%s6617_s0 + $0x28] sm:$0xff] }
 0x907   :  { %v6157_v19 = vld [vmem:[#allocation10 + $0x98] sm:$0xff] }
 0x908   :  { %2741 = vmatpush.msra.mxu2 %v4138_v23  ;;  %2608 = vmatpush.msra.mxu3 %v6145_v36  ;;  %6776 = vst [vmem:[#allocation77_spill] sm:$0xff] %v6157_v19  ;;  %v4144_v23 = vld [vmem:[%s6617_s0 + $0x20] sm:$0xff] }
 0x909   :  { %v6163_v36 = vld [vmem:[#allocation10 + $0x78] sm:$0xff] }
 0x90a   :  { %2742 = vmatpush.msra.mxu2 %v4140_v20  ;;  %2609 = vmatpush.msra.mxu3 %v6151_v57  ;;  %6777 = vst [vmem:[#allocation78_spill] sm:$0xff] %v6163_v36  ;;  %v4146_v20 = vld [vmem:[%s6617_s0 + $0x18] sm:$0xff]  ;;  %v6169_v57 = vld [vmem:[#allocation10 + $0x58] sm:$0xff] }
 0x90b   :  { %6778 = vst [vmem:[#allocation79_spill] sm:$0xff] %v6169_v57 }
 0x90c   :  { %2743 = vmatpush.msra.mxu2 %v4142_v40  ;;  %2610 = vmatpush.msra.mxu3 %v6157_v19  ;;  %v4148_v40 = vld [vmem:[%s6617_s0 + $0x10] sm:$0xff]  ;;  %v6175_v19 = vld [vmem:[#allocation10 + $0x38] sm:$0xff] }
 0x90d   :  { %6779 = vst [vmem:[#allocation80_spill] sm:$0xff] %v6175_v19 }
 0x90e   :  { %2744 = vmatpush.msra.mxu2 %v4144_v23  ;;  %2611 = vmatpush.msra.mxu3 %v6163_v36  ;;  %v4150_v23 = vld [vmem:[%s6617_s0 + $0x8] sm:$0xff] }
 0x90f   :  { %v6181_v36 = vld [vmem:[#allocation10 + $0x18] sm:$0xff] }
 0x910   :  { %2745 = vmatpush.msra.mxu2 %v4146_v20  ;;  %2612 = vmatpush.msra.mxu3 %v6169_v57  ;;  %6780 = vst [vmem:[#allocation81_spill] sm:$0xff] %v6181_v36  ;;  %v4152_v20 = vld [vmem:[%s6617_s0] sm:$0xff]  ;;  %v2180_v57 = vpop.f32.mrf.mxu3 }
 0x912   :  { %2746 = vmatpush.msra.mxu2 %v4148_v40  ;;  %2613 = vmatpush.msra.mxu3 %v6175_v19  ;;  %v4153_v40 = vld [vmem:[%s6621_s5 + $0x8] sm:$0xff]  ;;  %v4154_v19 = vld [vmem:[%s6621_s5] sm:$0xff] }
 0x914   :  { %2747 = vmatpush.msra.mxu2 %v4150_v23  ;;  %2614 = vmatpush.msra.mxu3 %v6181_v36  ;;  %v2160_v23 = vpop.f32.mrf.mxu0 }
 0x916   :  { %2748 = vmatpush.msra.mxu2 %v4152_v20  ;;  %2787 = vmatpush.msrb.mxu3 %v4153_v40  ;;  %v6782_v40 = vld [vmem:[#allocation30_spill] sm:$0xff] }
 0x918   :  { %2788 = vmatpush.msrb.mxu3 %v4154_v19  ;;  %v2220_v11 = vpop.f32.mrf.mxu3 }
 0x91c   :  { %v2200_v10 = vpop.f32.mrf.mxu0 }
 0x930   :  { %v2265_v36 = vpop.f32.mrf.mxu0 }
 0x931   :  { %v2266_v13 = vadd.f32 %v2265_v36, %v2180_v57 }
 0x936   :  { %v2245_v24 = vpop.f32.mrf.mxu3 }
 0x937   :  { %v2246_v42 = vadd.f32 %v2245_v24, %v2160_v23  ;;  %v2285_v24 = vpop.f32.mrf.mxu2 }
 0x939   :  { %v2388_v20 = vadd.f32 %v2325_v35, %v2246_v42  ;;  %v2345_v31 = vpop.f32.mrf.mxu0 }
 0x93a   :  { %v2389_v9 = vadd.f32 %v2345_v31, %v2266_v13 }
 0x93b   :  { %v2392_v22 = vadd.f32 %v2388_v20, %v6781_v1 }
 0x93c   :  { %v2393_v2 = vadd.f32 %v2389_v9, %v6782_v40  ;;  %v6783_v40 = vld [vmem:[#allocation31_spill] sm:$0xff] }
 0x93d   :  { %v3528_v6 = vmul.f32 -1.442695, %v2392_v22 }
 0x93e   :  { %v3529_v7 = vmul.f32 -1.442695, %v2393_v2  ;;  %v2286_v2 = vadd.f32 %v2285_v24, %v2200_v10 }
 0x93f   :  { %3660 = vpow2.f32 %v3528_v6  ;;  %v2305_v57 = vpop.f32.mrf.mxu3 }
 0x940   :  { %3662 = vpow2.f32 %v3529_v7  ;;  %v2306_v31 = vadd.f32 %v2305_v57, %v2220_v11  ;;  %v2365_v9 = vpop.f32.mrf.mxu2 }
 0x941   :  { %v2390_v7 = vadd.f32 %v2365_v9, %v2286_v2 }
 0x943   :  { %v2394_v53 = vadd.f32 %v2390_v7, %v6784_v27 }
 0x945   :  { %v3661_v19 = vpop.eup %3660 }
 0x946   :  { %v3663_v56 = vpop.eup %3662  ;;  %v2399_v48 = vadd.f32 1.0, %v3661_v19 }
 0x947   :  { %v2418_v55 = vadd.f32 1.0, %v3663_v56 }
 0x948   :  { %3664 = vrcp.f32 %v2399_v48  ;;  %vm2405_vm13 = vweird.f32 %v2399_v48  ;;  %v2411_v57 = vand.u32 2147483648, %v2399_v48  ;;  %v2409_v10 = vand.u32 2147483647, %v2399_v48 }
 0x949   :  { %3666 = vrcp.f32 %v2418_v55  ;;  %v2430_v11 = vand.u32 2147483648, %v2418_v55  ;;  %vm2424_vm14 = vweird.f32 %v2418_v55  ;;  %v2428_v24 = vand.u32 2147483647, %v2418_v55 }
 0x94a   :  { %vm2410_vm3 = vcmp.eq.f32.partialorder %v2409_v10, 8.507059e+37  ;;  %v4155_v10 = vld [vmem:[%s6474_s14 + $0x20] sm:$0xff] }
 0x94b   :  { %vm2429_vm4 = vcmp.eq.f32.partialorder %v2428_v24, 8.507059e+37  ;;  %v4156_v24 = vld [vmem:[%s6474_s14 + $0x28] sm:$0xff] }
 0x94e   :  { %v3665_v23 = vpop.eup %3664 }
 0x94f   :  { %v3667_v35 = vpop.eup %3666  ;;  %v2401_v42 = vmul.f32 %v3665_v23, %v2399_v48  ;;  %vm2406_vm10 = vweird.f32 %v3665_v23 }
 0x950   :  { %v2420_v13 = vmul.f32 %v3667_v35, %v2418_v55  ;;  %vm2425_vm11 = vweird.f32 %v3667_v35  ;;  %vm2407_vm15 = vmor %vm2405_vm13, %vm2406_vm10 }
 0x951   :  { %v2402_v36 = vsub.f32 1.0, %v2401_v42  ;;  %vm2426_vm2 = vmor %vm2424_vm14, %vm2425_vm11 }
 0x952   :  { %v2421_v20 = vsub.f32 1.0, %v2420_v13 }
 0x953   :  { %v2403_v56 = vmul.f32 %v3665_v23, %v2402_v36  ;;  %v2412_v36 = vor.u32 1.1754944e-38, %v2411_v57 }
 0x954   :  { %v2422_v19 = vmul.f32 %v3667_v35, %v2421_v20 }
 0x955   :  { %v2404_v63 = vadd.f32 %v3665_v23, %v2403_v56 }
 0x956   :  { %v2423_v4 = vadd.f32 %v3667_v35, %v2422_v19 }
 0x957   :  { %v2408_v42 = vsel %vm2407_vm15, %v3665_v23, %v2404_v63 }
 0x958   :  { %v2385_v22 = vpop.f32.mrf.mxu3  ;;  %v2427_v13 = vsel %vm2426_vm2, %v3667_v35, %v2423_v4  ;;  %v2413_v20 = vsel %vm2410_vm3, %v2412_v36, %v2408_v42  ;;  %v4157_v42 = vld [vmem:[%s6473_s13 + $0x30] sm:$0xff]  ;;  %v2496_v36 = vpop.f32.mrf.mxu0 }
 0x959   :  { %v2391_v6 = vadd.f32 %v2385_v22, %v2306_v31 }
 0x95b   :  { %v2395_v1 = vadd.f32 %v2391_v6, %v6783_v40 }
 0x95d   :  { %v3530_v49 = vmul.f32 -1.442695, %v2395_v1  ;;  %v2431_v1 = vor.u32 1.1754944e-38, %v2430_v11 }
 0x95f   :  { %3668 = vpow2.f32 %v3530_v49  ;;  %v2432_v9 = vsel %vm2429_vm4, %v2431_v1, %v2427_v13  ;;  %v4158_v13 = vld [vmem:[%s6474_s14] sm:$0xff]  ;;  %v2476_v1 = vpop.f32.mrf.mxu1 }
 0x960   :  { %3670 = vtanh.f32 %v2394_v53  ;;  %v2454_v2 = vmul.f32 %v2432_v9, %v5652_v14 }
 0x965   :  { %v3669_v31 = vpop.eup %3668 }
 0x966   :  { %v2438_v49 = vadd.f32 1.0, %v3669_v31  ;;  %v3671_v22 = vpop.eup %3670  ;;  %v4159_v31 = vld [vmem:[%s6474_s14 + $0x8] sm:$0xff] }
 0x967   :  { %v2455_v6 = vmul.f32 %v3671_v22, %v2413_v20 }
 0x968   :  { %3672 = vrcp.f32 %v2438_v49  ;;  %v2450_v4 = vand.u32 2147483648, %v2438_v49  ;;  %v2448_v23 = vand.u32 2147483647, %v2438_v49  ;;  %vm2444_vm6 = vweird.f32 %v2438_v49 }
 0x969   :  { %v6198_v48 = vadd.f32 %v2455_v6, %v2454_v2 }
 0x96a   :  { %v2451_v19 = vor.u32 1.1754944e-38, %v2450_v4  ;;  %vm2449_vm8 = vcmp.eq.f32.partialorder %v2448_v23, 8.507059e+37  ;;  %v2516_v4 = vpop.f32.mrf.mxu2 }
 0x96b   :  { %3674 = vtanh.f32 %v6198_v48 }
 0x96e   :  { %v3673_v7 = vpop.eup %3672 }
 0x96f   :  { %v2440_v55 = vmul.f32 %v3673_v7, %v2438_v49  ;;  %vm2445_vm5 = vweird.f32 %v3673_v7 }
 0x970   :  { %vm2446_vm7 = vmor %vm2444_vm6, %vm2445_vm5 }
 0x971   :  { %v2441_v53 = vsub.f32 1.0, %v2440_v55  ;;  %v3675_v11 = vpop.eup %3674 }
 0x973   :  { %v2442_v63 = vmul.f32 %v3673_v7, %v2441_v53 }
 0x975   :  { %v2443_v35 = vadd.f32 %v3673_v7, %v2442_v63 }
 0x977   :  { %v2447_v56 = vsel %vm2446_vm7, %v3673_v7, %v2443_v35 }
 0x978   :  { %v2452_v14 = vsel %vm2449_vm8, %v2451_v19, %v2447_v56  ;;  %v2536_v49 = vpop.f32.mrf.mxu3 }
 0x979   :  { %v6201_v57 = vmul.f32 %v3675_v11, %v2452_v14 }
 0x97b   :  { %2555 = vmatmul.f32.vlgmr.msrb.gmra.mxu1 %v6201_v57  ;;  %2575 = vmatmul.f32.vlgmr.msrb.gmra.mxu0 %v6201_v57 }
 0x97c   :  { %2595 = vmatmul.f32.vlgmr.msrb.gmra.mxu2 %v6201_v57  ;;  %2615 = vmatmul.f32.vlgmr.msra.gmra.mxu3 %v6201_v57 }
 0x97d   :  { %2879 = vmatpush.msrb.mxu0 %v4155_v10  ;;  %2899 = vmatpush.msra.mxu3 %v4156_v24 }
 0x97e   :  { %2964 = vmatpush.msrb.mxu1 %v5833_v17  ;;  %3004 = vmatpush.msrb.mxu2 %v4157_v42  ;;  %v4160_v17 = vld [vmem:[%s6473_s13 + $0x10] sm:$0xff] }
 0x97f   :  { %2880 = vmatpush.msrb.mxu0 %v4158_v13  ;;  %2900 = vmatpush.msra.mxu3 %v4159_v31 }
 0x980   :  { %2965 = vmatpush.msrb.mxu1 %v5845_v45  ;;  %3005 = vmatpush.msrb.mxu2 %v4160_v17  ;;  %v6785_v17 = vld [vmem:[#allocation51_spill] sm:$0xff] }
 0x9f8   :  { %v2556_v20 = vpop.f32.mrf.mxu1  ;;  %v2576_v9 = vpop.f32.mrf.mxu0 }
 0x9f9   :  { %v2557_v22 = vadd.f32 %v2556_v20, %v2476_v1  ;;  %v2577_v2 = vadd.f32 %v2576_v9, %v2496_v36 }
 0x9fb   :  { %v2619_v6 = vadd.f32 %v2557_v22, %v6702_v0  ;;  %v2620_v7 = vadd.f32 %v2577_v2, %v6703_v59 }
 0x9fd   :  { %v3531_v55 = vmul.f32 -1.442695, %v2619_v6  ;;  %v3532_v53 = vmul.f32 -1.442695, %v2620_v7 }
 0x9ff   :  { %3676 = vpow2.f32 %v3531_v55  ;;  %v2616_v45 = vpop.f32.mrf.mxu3  ;;  %v2596_v10 = vpop.f32.mrf.mxu2 }
 0xa00   :  { %3678 = vpow2.f32 %v3532_v53  ;;  %v2617_v63 = vadd.f32 %v2616_v45, %v2536_v49  ;;  %v2597_v24 = vadd.f32 %v2596_v10, %v2516_v4 }
 0xa02   :  { %v2622_v23 = vadd.f32 %v2617_v63, %v6704_v30  ;;  %v2621_v1 = vadd.f32 %v2597_v24, %v6785_v17 }
 0xa04   :  { %v3533_v35 = vmul.f32 -1.442695, %v2622_v23 }
 0xa05   :  { %v3677_v19 = vpop.eup %3676 }
 0xa06   :  { %v3679_v56 = vpop.eup %3678  ;;  %v2626_v11 = vadd.f32 1.0, %v3677_v19  ;;  %3680 = vpow2.f32 %v3533_v35 }
 0xa07   :  { %v2645_v14 = vadd.f32 1.0, %v3679_v56 }
 0xa08   :  { %3682 = vrcp.f32 %v2626_v11  ;;  %v2638_v2 = vand.u32 2147483648, %v2626_v11  ;;  %v2636_v55 = vand.u32 2147483647, %v2626_v11  ;;  %vm2632_vm11 = vweird.f32 %v2626_v11 }
 0xa09   :  { %3684 = vrcp.f32 %v2645_v14  ;;  %v2657_v6 = vand.u32 2147483648, %v2645_v14  ;;  %v2655_v4 = vand.u32 2147483647, %v2645_v14  ;;  %vm2651_vm13 = vweird.f32 %v2645_v14 }
 0xa0a   :  { %v2639_v23 = vor.u32 1.1754944e-38, %v2638_v2  ;;  %vm2637_vm2 = vcmp.eq.f32.partialorder %v2636_v55, 8.507059e+37 }
 0xa0b   :  { %v2658_v56 = vor.u32 1.1754944e-38, %v2657_v6  ;;  %vm2656_vm3 = vcmp.eq.f32.partialorder %v2655_v4, 8.507059e+37 }
 0xa0c   :  { %v3681_v42 = vpop.eup %3680 }
 0xa0d   :  { %v2665_v13 = vadd.f32 1.0, %v3681_v42 }
 0xa0e   :  { %v3683_v31 = vpop.eup %3682 }
 0xa0f   :  { %v3685_v36 = vpop.eup %3684  ;;  %v2628_v20 = vmul.f32 %v3683_v31, %v2626_v11  ;;  %3686 = vrcp.f32 %v2665_v13  ;;  %vm2633_vm9 = vweird.f32 %v3683_v31  ;;  %v2677_v2 = vand.u32 2147483648, %v2665_v13 }
 0xa10   :  { %v2647_v49 = vmul.f32 %v3685_v36, %v2645_v14  ;;  %3688 = vtanh.f32 %v2621_v1  ;;  %vm2652_vm10 = vweird.f32 %v3685_v36  ;;  %vm2634_vm14 = vmor %vm2632_vm11, %vm2633_vm9  ;;  %vm2671_vm5 = vweird.f32 %v2665_v13 }
 0xa11   :  { %v2629_v9 = vsub.f32 1.0, %v2628_v20  ;;  %vm2653_vm15 = vmor %vm2651_vm13, %vm2652_vm10  ;;  %v2678_v55 = vor.u32 1.1754944e-38, %v2677_v2  ;;  %v4178_v2 = vld [vmem:[#allocation8 + $0xf0] sm:$0xff] }
 0xa12   :  { %v2648_v22 = vsub.f32 1.0, %v2647_v49 }
 0xa13   :  { %v2630_v7 = vmul.f32 %v3683_v31, %v2629_v9 }
 0xa14   :  { %v2649_v53 = vmul.f32 %v3685_v36, %v2648_v22 }
 0xa15   :  { %v3687_v45 = vpop.eup %3686  ;;  %v2631_v63 = vadd.f32 %v3683_v31, %v2630_v7 }
 0xa16   :  { %v2650_v35 = vadd.f32 %v3685_v36, %v2649_v53  ;;  %v2667_v19 = vmul.f32 %v3687_v45, %v2665_v13  ;;  %v3689_v24 = vpop.eup %3688  ;;  %vm2672_vm4 = vweird.f32 %v3687_v45 }
 0xa17   :  { %v2635_v10 = vsel %vm2634_vm14, %v3683_v31, %v2631_v63  ;;  %v2675_v31 = vand.u32 2147483647, %v2665_v13  ;;  %vm2673_vm6 = vmor %vm2671_vm5, %vm2672_vm4  ;;  %v4161_v63 = vld [vmem:[#allocation8 + $0x1e0] sm:$0xff]  ;;  %v4164_v13 = vld [vmem:[#allocation8 + $0x1d0] sm:$0xff] }
 0xa18   :  { %v2640_v42 = vsel %vm2637_vm2, %v2639_v23, %v2635_v10  ;;  %v2654_v1 = vsel %vm2653_vm15, %v3685_v36, %v2650_v35  ;;  %v2668_v20 = vsub.f32 1.0, %v2667_v19  ;;  %v4162_v23 = vld [vmem:[#allocation8 + $0x1f0] sm:$0xff]  ;;  %v4163_v35 = vld [vmem:[#allocation8 + $0x1c0] sm:$0xff] }
 0xa19   :  { %v2659_v49 = vsel %vm2656_vm3, %v2658_v56, %v2654_v1  ;;  %v2682_v9 = vmul.f32 %v3689_v24, %v2640_v42  ;;  %vm2676_vm7 = vcmp.eq.f32.partialorder %v2675_v31, 8.507059e+37  ;;  %v4166_v19 = vld [vmem:[#allocation8 + $0x1b0] sm:$0xff]  ;;  %v4167_v56 = vld [vmem:[#allocation8 + $0x180] sm:$0xff] }
 0xa1a   :  { %v2681_v22 = vmul.f32 %v2659_v49, %v5676_v21  ;;  %v2669_v7 = vmul.f32 %v3687_v45, %v2668_v20  ;;  %v4168_v10 = vld [vmem:[#allocation8 + $0x190] sm:$0xff]  ;;  %v4169_v24 = vld [vmem:[#allocation8 + $0x160] sm:$0xff] }
 0xa1b   :  { %v4170_v42 = vld [vmem:[#allocation8 + $0x170] sm:$0xff]  ;;  %v4171_v1 = vld [vmem:[#allocation8 + $0x140] sm:$0xff] }
 0xa1c   :  { %v6232_v11 = vadd.f32 %v2682_v9, %v2681_v22  ;;  %v2670_v14 = vadd.f32 %v3687_v45, %v2669_v7  ;;  %v4172_v20 = vld [vmem:[#allocation8 + $0x150] sm:$0xff]  ;;  %v4173_v49 = vld [vmem:[#allocation8 + $0x120] sm:$0xff] }
 0xa1d   :  { %v4174_v9 = vld [vmem:[#allocation8 + $0x130] sm:$0xff]  ;;  %v4175_v22 = vld [vmem:[#allocation8 + $0x100] sm:$0xff] }
 0xa1e   :  { %3690 = vtanh.f32 %v6232_v11  ;;  %v2674_v6 = vsel %vm2673_vm6, %v3687_v45, %v2670_v14  ;;  %v4165_v45 = vld [vmem:[#allocation8 + $0x1a0] sm:$0xff]  ;;  %v4176_v7 = vld [vmem:[#allocation8 + $0x110] sm:$0xff] }
 0xa1f   :  { %v2679_v53 = vsel %vm2676_vm7, %v2678_v55, %v2674_v6  ;;  %v4177_v14 = vld [vmem:[#allocation8 + $0xe0] sm:$0xff]  ;;  %v4180_v6 = vld [vmem:[#allocation8 + $0xd0] sm:$0xff] }
 0xa20   :  { %v4179_v31 = vld [vmem:[#allocation8 + $0xc0] sm:$0xff] }
 0xa21   :  { %v4181_v55 = vld [vmem:[#allocation8 + $0xa0] sm:$0xff] }
 0xa24   :  { %v3691_v36 = vpop.eup %3690 }
 0xa25   :  { %v6235_v4 = vmul.f32 %v3691_v36, %v2679_v53  ;;  %v4182_v36 = vld [vmem:[#allocation8 + $0xb0] sm:$0xff]  ;;  %v4183_v53 = vld [vmem:[#allocation8 + $0x80] sm:$0xff] }
 0xa27   :  { %2702 = vmatmul.f32.vlgmr.msra.gmra.mxu1 %v6235_v4  ;;  %v2732_v21 = vadd.f32 %v6235_v4, %v6201_v57 }
 0xa28   :  { %3030 = vmatpush.msra.mxu1 %v4161_v63  ;;  %v4185_v63 = vld [vmem:[#allocation8 + $0x60] sm:$0xff] }
 0xa29   :  { %2749 = vmatmul.f32.vlgmr.msra.gmra.mxu2 %v2732_v21  ;;  %v4184_v21 = vld [vmem:[#allocation8 + $0x90] sm:$0xff] }
 0xa2a   :  { %3070 = vmatpush.msra.mxu2 %v4162_v23  ;;  %3031 = vmatpush.msra.mxu1 %v4163_v35  ;;  %v4186_v23 = vld [vmem:[#allocation8 + $0x70] sm:$0xff]  ;;  %v4187_v35 = vld [vmem:[#allocation8 + $0x40] sm:$0xff] }
 0xa2c   :  { %3071 = vmatpush.msra.mxu2 %v4164_v13  ;;  %3032 = vmatpush.msra.mxu1 %v4165_v45  ;;  %v4188_v13 = vld [vmem:[#allocation8 + $0x50] sm:$0xff]  ;;  %v4189_v45 = vld [vmem:[#allocation8 + $0x20] sm:$0xff] }
 0xa2e   :  { %3072 = vmatpush.msra.mxu2 %v4166_v19  ;;  %3033 = vmatpush.msra.mxu1 %v4167_v56  ;;  %v4190_v19 = vld [vmem:[#allocation8 + $0x30] sm:$0xff]  ;;  %v4191_v56 = vld [vmem:[#allocation8] sm:$0xff] }
 0xa30   :  { %3073 = vmatpush.msra.mxu2 %v4168_v10  ;;  %3034 = vmatpush.msra.mxu1 %v4169_v24  ;;  %v4192_v10 = vld [vmem:[#allocation8 + $0x10] sm:$0xff] }
 0xa32   :  { %3074 = vmatpush.msra.mxu2 %v4170_v42  ;;  %3035 = vmatpush.msra.mxu1 %v4171_v1 }
 0xa34   :  { %3075 = vmatpush.msra.mxu2 %v4172_v20  ;;  %3036 = vmatpush.msra.mxu1 %v4173_v49 }
 0xa36   :  { %3076 = vmatpush.msra.mxu2 %v4174_v9  ;;  %3037 = vmatpush.msra.mxu1 %v4175_v22  ;;  %v6786_v9 = vld [vmem:[#allocation21_spill] sm:$0xff] }
 0xa37   :  { %v499_v22 = vadd.f32 %v5775_v58, %v6786_v9 }
 0xa38   :  { %3077 = vmatpush.msra.mxu2 %v4176_v7  ;;  %3038 = vmatpush.msra.mxu1 %v4177_v14 }
 0xa3a   :  { %3078 = vmatpush.msra.mxu2 %v4178_v2  ;;  %3039 = vmatpush.msra.mxu1 %v4179_v31  ;;  %v6787_v2 = vld [vmem:[#allocation28_spill] sm:$0xff] }
 0xa3b   :  { %v511_v31 = vadd.f32 %v5775_v58, %v6787_v2 }
 0xa3c   :  { %3079 = vmatpush.msra.mxu2 %v4180_v6  ;;  %3040 = vmatpush.msra.mxu1 %v4181_v55 }
 0xa3e   :  { %3080 = vmatpush.msra.mxu2 %v4182_v36  ;;  %3041 = vmatpush.msra.mxu1 %v4183_v53 }
 0xa40   :  { %3081 = vmatpush.msra.mxu2 %v4184_v21  ;;  %3042 = vmatpush.msra.mxu1 %v4185_v63 }
 0xa42   :  { %3082 = vmatpush.msra.mxu2 %v4186_v23  ;;  %3043 = vmatpush.msra.mxu1 %v4187_v35 }
 0xa44   :  { %3083 = vmatpush.msra.mxu2 %v4188_v13  ;;  %3044 = vmatpush.msra.mxu1 %v4189_v45 }
 0xa46   :  { %3084 = vmatpush.msra.mxu2 %v4190_v19  ;;  %3045 = vmatpush.msra.mxu1 %v4191_v56 }
 0xa48   :  { %3085 = vmatpush.msra.mxu2 %v4192_v10 }
 0xaa4   :  { %v2703_v24 = vpop.f32.mrf.mxu1 }
 0xaa5   :  { %v2704_v42 = vadd.f32 %v5753_v41, %v2703_v24 }
 0xaa7   :  { %v2706_v1 = vmax.f32 %v2704_v42, 0.0 }
 0xaa9   :  { %3534 = vmatmul.msk.f32.vlgmr.msra.gmra.mxu0 %vm1263_vm12, %v2706_v1  ;;  %v443_v1 = vld [vmem:[#allocation2 + $0x6] sm:$0x3] }
 0xaaa   :  { %2919 = vmatpush.msra.mxu0 %v5760_v61 }
 0xaac   :  { %v2750_v20 = vpop.f32.mrf.mxu2  ;;  %2920 = vmatpush.msra.mxu0 %v5766_v62 }
 0xaad   :  { %v2751_v49 = vadd.f32 %v5769_v43, %v2750_v20 }
 0xaaf   :  { %v2754_v7 = vrot.slane %v2751_v49, 1  ;;  %v2755_v14 = vperm.slane %v2751_v49, 0 }
 0xab1   :  { %v2756_v6 = vperm.slane %v2754_v7, 0  ;;  %v2759_v41 = vadd.f32 %v2755_v14, %v499_v22  ;;  %3537 = vmatmul.msk.f32.vlgmr.msrb.gmra.mxu0 %vm447_vm0, %v443_v1  ;;  %v6790_v7 = vld [vmem:[#allocation36_spill] sm:$0xff] }
 0xab2   :  { %2984 = vmatpush.msrb.mxu0 %v5827_v47 }
 0xab3   :  { %v2760_v55 = vadd.f32 %v2756_v6, %v511_v31  ;;  %v2761_v36 = vmax.f32 %v2759_v41, 0.0  ;;  %v6793_v31 = vld [vmem:[#allocation59_spill] sm:$0xff]  ;;  %v6795_v41 = vld [vmem:[#allocation60_spill] sm:$0xff] }
 0xab4   :  { %2985 = vmatpush.msrb.mxu0 %v5839_v15 }
 0xab5   :  { %v2763_v53 = vmul.f32 %v2761_v36, %v6671_v34  ;;  %v2762_v61 = vmax.f32 %v2760_v55, 0.0  ;;  %v6797_v36 = vld [vmem:[#allocation61_spill] sm:$0xff] }
 0xab7   :  { %v2765_v21 = vadd.f32 %v2763_v53, %v6672_v18  ;;  %v2764_v62 = vmul.f32 %v2762_v61, %v6671_v34  ;;  %v6798_v61 = vld [vmem:[#allocation48_spill] sm:$0xff] }
 0xab9   :  { %3535 = vmatmul.msk.f32.vlgmr.msrb.gmra.mxu3 %vm447_vm0, %v2765_v21  ;;  %v2766_v43 = vadd.f32 %v2764_v62, %v6672_v18  ;;  %3539 = vmatmul.msk.f32.vlgmr.msra.gmra.mxu0 %vm447_vm0, %v443_v1  ;;  %v6799_v21 = vld [vmem:[#allocation62_spill] sm:$0xff] }
 0xaba   :  { %2939 = vmatpush.msrb.mxu3 %v5787_v60  ;;  %3050 = vmatpush.msra.mxu0 %v5850_v29 }
 0xabc   :  { %2940 = vmatpush.msrb.mxu3 %v5794_v25  ;;  %3051 = vmatpush.msra.mxu0 %v5859_v50 }
 0xabe   :  { %3052 = vmatpush.msra.mxu0 %v5868_v28 }
 0xac0   :  { %3053 = vmatpush.msra.mxu0 %v5871_v38 }
 0xac1   :  { %3536 = vmatmul.msk.f32.gmra.mxu3 %vm447_vm0, %v2766_v43 }
 0xac2   :  { %3054 = vmatpush.msra.mxu0 %v5874_v16 }
 0xac9   :  { %3538 = vmatmul.msk.f32.vlgmr.msra.gmra.mxu3 %vm447_vm0, %v443_v1 }
 0xaca   :  { %3024 = vmatpush.msra.mxu3 %v5856_v52 }
 0xacc   :  { %3025 = vmatpush.msra.mxu3 %v5865_v8 }
 0xad1   :  { %3540 = vmatmul.msk.f32.vlgmr.msrb.gmra.mxu3 %vm447_vm0, %v443_v1 }
 0xad2   :  { %3090 = vmatpush.msrb.mxu3 %v5922_v37 }
 0xad4   :  { %3091 = vmatpush.msrb.mxu3 %v5929_v54  ;;  %v6788_v54 = vld [vmem:[#allocation34_spill] sm:$0xff] }
 0xad5   :  { %3055 = vmatpush.msra.mxu0 %v6788_v54 }
 0xad6   :  { %3092 = vmatpush.msrb.mxu3 %v5936_v5  ;;  %v6789_v5 = vld [vmem:[#allocation35_spill] sm:$0xff] }
 0xad7   :  { %3056 = vmatpush.msra.mxu0 %v6789_v5 }
 0xad8   :  { %3093 = vmatpush.msrb.mxu3 %v5943_v33  ;;  %v6791_v33 = vld [vmem:[#allocation58_spill] sm:$0xff] }
 0xad9   :  { %3057 = vmatpush.msra.mxu0 %v6790_v7 }
 0xada   :  { %3094 = vmatpush.msrb.mxu3 %v5953_v46  ;;  %v6792_v46 = vld [vmem:[#allocation37_spill] sm:$0xff] }
 0xadb   :  { %3058 = vmatpush.msra.mxu0 %v6792_v46  ;;  %v6809_v46 = vld [vmem:[#allocation41_spill] sm:$0xff] }
 0xadc   :  { %3095 = vmatpush.msrb.mxu3 %v5957_v51  ;;  %v6794_v51 = vld [vmem:[#allocation38_spill] sm:$0xff] }
 0xadd   :  { %3059 = vmatpush.msra.mxu0 %v6794_v51  ;;  %v4198_v51 = vld [vmem:[#allocation11 + $0x1d0] sm:$0xff] }
 0xade   :  { %3096 = vmatpush.msrb.mxu3 %v5961_v26  ;;  %v6796_v26 = vld [vmem:[#allocation33_spill] sm:$0xff] }
 0xadf   :  { %3060 = vmatpush.msra.mxu0 %v6796_v26  ;;  %v6812_v26 = vld [vmem:[#allocation56_spill] sm:$0xff] }
 0xae0   :  { %3097 = vmatpush.msrb.mxu3 %v6791_v33 }
 0xae1   :  { %3061 = vmatpush.msra.mxu0 %v6798_v61  ;;  %v4201_v61 = vld [vmem:[#allocation11 + $0x180] sm:$0xff] }
 0xae2   :  { %3098 = vmatpush.msrb.mxu3 %v6793_v31  ;;  %v4197_v31 = vld [vmem:[#allocation11 + $0x1c0] sm:$0xff] }
 0xae4   :  { %3099 = vmatpush.msrb.mxu3 %v6795_v41  ;;  %v6811_v41 = vld [vmem:[#allocation42_spill] sm:$0xff] }
 0xae6   :  { %3100 = vmatpush.msrb.mxu3 %v6797_v36  ;;  %v4200_v36 = vld [vmem:[#allocation11 + $0x1b0] sm:$0xff] }
 0xae8   :  { %3101 = vmatpush.msrb.mxu3 %v6799_v21  ;;  %v6814_v21 = vld [vmem:[#allocation57_spill] sm:$0xff] }
 0xb26   :  { %v2727_v58 = vpop.f32.mrf.mxu0 }
 0xb27   :  { %v2728_v63 = vadd.f32 %v5802_v32, %v2727_v58 }
 0xb29   :  { %2731 = vst [vmem:[#allocation13 + $0x4] sm:$0x3] %v2728_v63  ;;  %v6800_v63 = vld [vmem:[#allocation49_spill] sm:$0xff] }
 0xb2a   :  { %3062 = vmatpush.msra.mxu0 %v6800_v63  ;;  %v4204_v63 = vld [vmem:[#allocation11 + $0x168] sm:$0xff] }
 0xb3c   :  { %v2790_v23 = vpop.f32.mrf.mxu3 }
 0xb3d   :  { %v2796_v35 = vadd.f32 %v5805_v39, %v2790_v23  ;;  %v6801_v23 = vld [vmem:[#allocation63_spill] sm:$0xff] }
 0xb3e   :  { %3102 = vmatpush.msrb.mxu3 %v6801_v23  ;;  %v4205_v23 = vld [vmem:[#allocation11 + $0x170] sm:$0xff] }
 0xb3f   :  { %v2798_v13 = vmax.f32 %v2796_v35, 0.0 }
 0xb41   :  { %v2800_v45 = vmul.f32 %v2798_v13, %v6673_v3 }
 0xb43   :  { %v2802_v60 = vadd.f32 %v2800_v45, %v6674_v12  ;;  %v6802_v45 = vld [vmem:[#allocation50_spill] sm:$0xff] }
 0xb44   :  { %v2793_v19 = vpop.f32.mrf.mxu3  ;;  %3063 = vmatpush.msra.mxu0 %v6802_v45  ;;  %v4207_v45 = vld [vmem:[#allocation11 + $0x148] sm:$0xff] }
 0xb45   :  { %v2797_v34 = vadd.f32 %v5805_v39, %v2793_v19  ;;  %v2804_v25 = vmul.f32 %v5814_v44, %v2802_v60  ;;  %v6803_v60 = vld [vmem:[#allocation64_spill] sm:$0xff] }
 0xb46   :  { %3103 = vmatpush.msrb.mxu3 %v6803_v60  ;;  %v4208_v60 = vld [vmem:[#allocation11 + $0x150] sm:$0xff] }
 0xb47   :  { %v2799_v18 = vmax.f32 %v2797_v34, 0.0  ;;  %v2806_v56 = vsel %vm447_vm0, %v2804_v25, 0.0  ;;  %v6804_v34 = vld [vmem:[#allocation20_spill] sm:$0xff]  ;;  %v6805_v25 = vld [vmem:[#allocation39_spill] sm:$0xff] }
 0xb48   :  { %2807 = vadd.xlane.f32.xlu2 %v2806_v56  ;;  %3064 = vmatpush.msra.mxu0 %v6804_v34  ;;  %v6806_v56 = vld [vmem:[#allocation27_spill] sm:$0xff]  ;;  %v4209_v34 = vld [vmem:[#allocation11 + $0x120] sm:$0xff] }
 0xb49   :  { %v2801_v32 = vmul.f32 %v2799_v18, %v6673_v3  ;;  %3104 = vmatpush.msrb.mxu3 %v6805_v25  ;;  %v4210_v25 = vld [vmem:[#allocation11 + $0x128] sm:$0xff] }
 0xb4a   :  { %3065 = vmatpush.msra.mxu0 %v6806_v56  ;;  %v4212_v56 = vld [vmem:[#allocation11 + $0x100] sm:$0xff] }
 0xb4b   :  { %v2803_v10 = vadd.f32 %v2801_v32, %v6674_v12  ;;  %v6807_v32 = vld [vmem:[#allocation40_spill] sm:$0xff] }
 0xb4c   :  { %3105 = vmatpush.msrb.mxu3 %v6807_v32  ;;  %v4213_v32 = vld [vmem:[#allocation11 + $0x108] sm:$0xff] }
 0xb4d   :  { %v2805_v24 = vmul.f32 %v5814_v44, %v2803_v10 }
 0xb4f   :  { %v2809_v42 = vsel %vm447_vm0, %v2805_v24, 0.0 }
 0xb50   :  { %2810 = vadd.xlane.f32.xlu2 %v2809_v42 }
 0xbbb   :  { %v2808_v39 = vpop.xlane.xlu2 %2807 }
 0xbbc   :  { %v2812_v20 = vrot.slane %v2808_v39, 4 }
 0xbbe   :  { %v2813_v3 = vmax.f32 %v2808_v39, %v2812_v20 }
 0xbc0   :  { %v2814_v12 = vrot.slane %v2813_v3, 2 }
 0xbc2   :  { %v2815_v44 = vmax.f32 %v2813_v3, %v2814_v12 }
 0xbc3   :  { %v2811_v49 = vpop.xlane.xlu2 %2810 }
 0xbc4   :  { %v2816_v47 = vrot.slane %v2815_v44, 1  ;;  %v2818_v9 = vrot.slane %v2811_v49, 4 }
 0xbc6   :  { %v2817_v15 = vmax.f32 %v2815_v44, %v2816_v47  ;;  %v2819_v52 = vmax.f32 %v2811_v49, %v2818_v9  ;;  %v4194_v9 = vld [vmem:[%s6618_s27 + $0x38] sm:$0xff] }
 0xbc8   :  { %v2824_v8 = vsub.f32 %v2808_v39, %v2817_v15  ;;  %v2820_v22 = vrot.slane %v2819_v52, 2  ;;  %v4193_v39 = vld [vmem:[%s6618_s27 + $0x18] sm:$0xff]  ;;  %s4502_s27 = smov [#allocation13]  }
 0xbc9   :  { %s3458_s1 = sshll.u32 %s4502_s27, 4  ;;  %s3459_s1 = int_to_ptr.vmem [resolvable:$true] %s3458_s1 }
 0xbca   :  { %v2826_v29 = vmul.f32 1.442695, %v2824_v8  ;;  %v2821_v37 = vmax.f32 %v2819_v52, %v2820_v22 }
 0xbcc   :  { %3692 = vpow2.f32 %v2826_v29  ;;  %v2822_v50 = vrot.slane %v2821_v37, 1 }
 0xbce   :  { %v2823_v28 = vmax.f32 %v2821_v37, %v2822_v50 }
 0xbd0   :  { %v2825_v38 = vsub.f32 %v2811_v49, %v2823_v28 }
 0xbd2   :  { %v3693_v14 = vpop.eup %3692  ;;  %v2828_v16 = vmul.f32 1.442695, %v2825_v38 }
 0xbd3   :  { %v2830_v2 = vrot.slane %v3693_v14, 4 }
 0xbd4   :  { %3694 = vpow2.f32 %v2828_v16  ;;  %v6808_v16 = vld [vmem:[#allocation54_spill] sm:$0xff] }
 0xbd5   :  { %v2831_v6 = vadd.f32 %v3693_v14, %v2830_v2  ;;  %v4196_v2 = vld [vmem:[#allocation11 + $0x1f0] sm:$0xff] }
 0xbd7   :  { %v2832_v55 = vrot.slane %v2831_v6, 2 }
 0xbd9   :  { %v2833_v53 = vadd.f32 %v2832_v55, %v2831_v6  ;;  %v6810_v6 = vld [vmem:[#allocation55_spill] sm:$0xff]  ;;  %v4199_v55 = vld [vmem:[#allocation11 + $0x1a0] sm:$0xff] }
 0xbda   :  { %v3695_v62 = vpop.eup %3694 }
 0xbdb   :  { %v2834_v43 = vrot.slane %v2833_v53, 1  ;;  %v2836_v58 = vrot.slane %v3695_v62, 4 }
 0xbdd   :  { %v2835_v35 = vadd.f32 %v2834_v43, %v2833_v53  ;;  %v2837_v13 = vadd.f32 %v3695_v62, %v2836_v58  ;;  %v6813_v53 = vld [vmem:[#allocation43_spill] sm:$0xff]  ;;  %v6815_v43 = vld [vmem:[#allocation44_spill] sm:$0xff]  ;;  %v4203_v58 = vld [vmem:[#allocation11 + $0x160] sm:$0xff] }
 0xbdf   :  { %3696 = vrcp.f32 %v2835_v35  ;;  %v2838_v19 = vrot.slane %v2837_v13, 2  ;;  %v6816_v35 = vld [vmem:[#allocation45_spill] sm:$0xff] }
 0xbe1   :  { %v2839_v18 = vadd.f32 %v2838_v19, %v2837_v13  ;;  %v4206_v13 = vld [vmem:[#allocation11 + $0x140] sm:$0xff] }
 0xbe2   :  { %v6817_v19 = vld [vmem:[#allocation46_spill] sm:$0xff] }
 0xbe3   :  { %v2840_v10 = vrot.slane %v2839_v18, 1 }
 0xbe5   :  { %v3697_v24 = vpop.eup %3696  ;;  %v2841_v42 = vadd.f32 %v2840_v10, %v2839_v18  ;;  %v6818_v18 = vld [vmem:[#allocation47_spill] sm:$0xff]  ;;  %v4214_v10 = vld [vmem:[#allocation11 + $0x110] sm:$0xff] }
 0xbe6   :  { %v2844_v1 = vmul.f32 %v3697_v24, %v3693_v14  ;;  %v4195_v14 = vld [vmem:[#allocation11 + $0x1e0] sm:$0xff]  ;;  %v6819_v24 = vld [vmem:[#allocation19_spill] sm:$0xff] }
 0xbe7   :  { %3698 = vrcp.f32 %v2841_v42  ;;  %v4215_v42 = vld [vmem:[#allocation11 + $0xe0] sm:$0xff] }
 0xbe8   :  { %v2846_v20 = vmul.f32 %v4193_v39, %v2844_v1  ;;  %v4216_v1 = vld [vmem:[#allocation11 + $0xe8] sm:$0xff]  ;;  %v4217_v39 = vld [vmem:[#allocation11 + $0xf0] sm:$0xff] }
 0xbea   :  { %v2848_v3 = vsel %vm447_vm0, %v2846_v20, 0.0  ;;  %v6820_v20 = vld [vmem:[#allocation26_spill] sm:$0xff] }
 0xbeb   :  { %v2849_v12 = vrot.slane %v2848_v3, 4 }
 0xbed   :  { %v3699_v44 = vpop.eup %3698  ;;  %v2850_v49 = vadd.f32 %v2849_v12, %v2848_v3  ;;  %v4218_v3 = vld [vmem:[#allocation11 + $0xc0] sm:$0xff]  ;;  %v4219_v12 = vld [vmem:[#allocation11 + $0xc8] sm:$0xff] }
 0xbee   :  { %v2845_v47 = vmul.f32 %v3699_v44, %v3695_v62  ;;  %v4202_v62 = vld [vmem:[#allocation11 + $0x190] sm:$0xff] }
 0xbef   :  { %v2851_v52 = vrot.slane %v2850_v49, 2  ;;  %v4220_v44 = vld [vmem:[#allocation11 + $0xd0] sm:$0xff] }
 0xbf0   :  { %v2847_v15 = vmul.f32 %v4194_v9, %v2845_v47  ;;  %v4221_v47 = vld [vmem:[#allocation11 + $0xa0] sm:$0xff]  ;;  %v4222_v9 = vld [vmem:[#allocation11 + $0xa8] sm:$0xff] }
 0xbf1   :  { %v2852_v29 = vadd.f32 %v2851_v52, %v2850_v49  ;;  %v6821_v49 = vld [vmem:[#allocation22_spill] sm:$0xff]  ;;  %v6822_v52 = vld [vmem:[#allocation23_spill] sm:$0xff] }
 0xbf2   :  { %v2855_v8 = vsel %vm447_vm0, %v2847_v15, 0.0  ;;  %v4223_v15 = vld [vmem:[#allocation11 + $0xb0] sm:$0xff] }
 0xbf3   :  { %v2856_v22 = vrot.slane %v2855_v8, 4  ;;  %v2853_v54 = vrot.slane %v2852_v29, 1 }
 0xbf5   :  { %v2857_v37 = vadd.f32 %v2856_v22, %v2855_v8  ;;  %v2854_v38 = vadd.f32 %v2853_v54, %v2852_v29  ;;  %v4224_v8 = vld [vmem:[#allocation11 + $0x80] sm:$0xff]  ;;  %v4225_v22 = vld [vmem:[#allocation11 + $0x88] sm:$0xff]  ;;  %v4226_v29 = vld [vmem:[#allocation11 + $0x90] sm:$0xff] }
 0xbf6   :  { %v4228_v54 = vld [vmem:[#allocation11 + $0x68] sm:$0xff] }
 0xbf7   :  { %v2858_v50 = vrot.slane %v2857_v37, 2 }
 0xbf9   :  { %v2859_v28 = vadd.f32 %v2858_v50, %v2857_v37  ;;  %v6823_v37 = vld [vmem:[#allocation24_spill] sm:$0xff]  ;;  %v4227_v50 = vld [vmem:[#allocation11 + $0x60] sm:$0xff] }
 0xbfb   :  { %v2860_v5 = vrot.slane %v2859_v28, 1 }
 0xbfd   :  { %v2861_v7 = vadd.f32 %v2860_v5, %v2859_v28  ;;  %v4229_v28 = vld [vmem:[#allocation11 + $0x70] sm:$0xff]  ;;  %v6824_v5 = vld [vmem:[#allocation25_spill] sm:$0xff] }
 0xbff   :  { %v2947_v33 = vsel %vm756_vm1, %v2861_v7, %v2854_v38  ;;  %v4230_v38 = vld [vmem:[#allocation11 + $0x40] sm:$0xff]  ;;  %v4231_v7 = vld [vmem:[#allocation11 + $0x48] sm:$0xff] }
 0xc00   :  { %3541 = vmatmul.msk.f32.vlgmr.msrb.gmra.mxu1 %vm447_vm0, %v2947_v33  ;;  %3542 = vmatmul.msk.f32.vlgmr.msrb.gmra.mxu0 %vm447_vm0, %v2947_v33 }
 0xc01   :  { %3543 = vmatmul.msk.f32.vlgmr.msrb.gmra.mxu2 %vm447_vm0, %v2947_v33  ;;  %3544 = vmatmul.msk.f32.vlgmr.msra.gmra.mxu3 %vm447_vm0, %v2947_v33  ;;  %v4232_v33 = vld [vmem:[#allocation11 + $0x50] sm:$0xff] }
 0xc02   :  { %3181 = vmatpush.msrb.mxu1 %v4195_v14  ;;  %3201 = vmatpush.msrb.mxu0 %v6808_v16  ;;  %v6825_v14 = vld [vmem:[#allocation52_spill] sm:$0xff]  ;;  %v4233_v16 = vld [vmem:[#allocation11 + $0x20] sm:$0xff] }
 0xc03   :  { %3221 = vmatpush.msrb.mxu2 %v4196_v2  ;;  %3241 = vmatpush.msra.mxu3 %v6809_v46  ;;  %v4234_v2 = vld [vmem:[#allocation11 + $0x28] sm:$0xff]  ;;  %v4235_v46 = vld [vmem:[#allocation11 + $0x30] sm:$0xff] }
 0xc04   :  { %3182 = vmatpush.msrb.mxu1 %v4197_v31  ;;  %3202 = vmatpush.msrb.mxu0 %v6810_v6  ;;  %v6826_v31 = vld [vmem:[#allocation53_spill] sm:$0xff]  ;;  %v4236_v6 = vld [vmem:[#allocation11] sm:$0xff] }
 0xc05   :  { %3222 = vmatpush.msrb.mxu2 %v4198_v51  ;;  %3242 = vmatpush.msra.mxu3 %v6811_v41  ;;  %v4237_v51 = vld [vmem:[#allocation11 + $0x8] sm:$0xff]  ;;  %v4238_v41 = vld [vmem:[#allocation11 + $0x10] sm:$0xff] }
 0xc06   :  { %3183 = vmatpush.msrb.mxu1 %v4199_v55  ;;  %3203 = vmatpush.msrb.mxu0 %v6812_v26  ;;  %v6827_v55 = vld [vmem:[#allocation65_spill] sm:$0xff]  ;;  %v4239_v26 = vld [vmem:[#allocation10 + $0x1e0] sm:$0xff] }
 0xc07   :  { %3223 = vmatpush.msrb.mxu2 %v4200_v36  ;;  %3243 = vmatpush.msra.mxu3 %v6813_v53  ;;  %v4240_v36 = vld [vmem:[#allocation10 + $0x1e8] sm:$0xff]  ;;  %v4241_v53 = vld [vmem:[#allocation10 + $0x1f0] sm:$0xff] }
 0xc08   :  { %3184 = vmatpush.msrb.mxu1 %v4201_v61  ;;  %3204 = vmatpush.msrb.mxu0 %v6814_v21  ;;  %v6828_v61 = vld [vmem:[#allocation66_spill] sm:$0xff] }
 0xc09   :  { %3224 = vmatpush.msrb.mxu2 %v4202_v62  ;;  %3244 = vmatpush.msra.mxu3 %v6815_v43  ;;  %v4242_v21 = vld [vmem:[#allocation10 + $0x1c0] sm:$0xff]  ;;  %v4243_v62 = vld [vmem:[#allocation10 + $0x1c8] sm:$0xff]  ;;  %v4244_v43 = vld [vmem:[#allocation10 + $0x1d0] sm:$0xff] }
 0xc0a   :  { %3046 = vmatmul.f32.vlgmr.msra.gmra.mxu1 %v6201_v57  ;;  %3066 = vmatmul.f32.vlgmr.msra.gmra.mxu0 %v6201_v57 }
 0xc0b   :  { %3086 = vmatmul.f32.vlgmr.msra.gmra.mxu2 %v6201_v57  ;;  %3106 = vmatmul.f32.vlgmr.msrb.gmra.mxu3 %v6201_v57  ;;  %v4211_v57 = vld [vmem:[#allocation11 + $0x130] sm:$0xff] }
 0xc0c   :  { %3185 = vmatpush.msrb.mxu1 %v4203_v58  ;;  %3205 = vmatpush.msrb.mxu0 %v4204_v63  ;;  %v6829_v58 = vld [vmem:[#allocation67_spill] sm:$0xff]  ;;  %v4245_v63 = vld [vmem:[#allocation10 + $0x1a0] sm:$0xff] }
 0xc0d   :  { %3225 = vmatpush.msrb.mxu2 %v4205_v23  ;;  %3245 = vmatpush.msra.mxu3 %v6816_v35  ;;  %v4246_v23 = vld [vmem:[#allocation10 + $0x1a8] sm:$0xff]  ;;  %v6830_v35 = vld [vmem:[#allocation68_spill] sm:$0xff] }
 0xc0e   :  { %3186 = vmatpush.msrb.mxu1 %v4206_v13  ;;  %3206 = vmatpush.msrb.mxu0 %v4207_v45  ;;  %v4248_v13 = vld [vmem:[#allocation10 + $0x180] sm:$0xff]  ;;  %v4249_v45 = vld [vmem:[#allocation10 + $0x188] sm:$0xff] }
 0xc0f   :  { %3226 = vmatpush.msrb.mxu2 %v4208_v60  ;;  %3246 = vmatpush.msra.mxu3 %v6817_v19  ;;  %v4250_v60 = vld [vmem:[#allocation10 + $0x190] sm:$0xff]  ;;  %v6831_v19 = vld [vmem:[#allocation69_spill] sm:$0xff] }
 0xc10   :  { %3187 = vmatpush.msrb.mxu1 %v4209_v34  ;;  %3207 = vmatpush.msrb.mxu0 %v4210_v25  ;;  %v4251_v34 = vld [vmem:[#allocation10 + $0x160] sm:$0xff]  ;;  %v4252_v25 = vld [vmem:[#allocation10 + $0x168] sm:$0xff] }
 0xc11   :  { %3227 = vmatpush.msrb.mxu2 %v4211_v57  ;;  %3247 = vmatpush.msra.mxu3 %v6818_v18  ;;  %v4253_v57 = vld [vmem:[#allocation10 + $0x170] sm:$0xff]  ;;  %v6832_v18 = vld [vmem:[#allocation70_spill] sm:$0xff] }
 0xc12   :  { %3188 = vmatpush.msrb.mxu1 %v4212_v56  ;;  %3208 = vmatpush.msrb.mxu0 %v4213_v32  ;;  %v4254_v56 = vld [vmem:[#allocation10 + $0x140] sm:$0xff]  ;;  %v4255_v32 = vld [vmem:[#allocation10 + $0x148] sm:$0xff] }
 0xc13   :  { %3228 = vmatpush.msrb.mxu2 %v4214_v10  ;;  %3248 = vmatpush.msra.mxu3 %v6819_v24  ;;  %v4256_v10 = vld [vmem:[#allocation10 + $0x150] sm:$0xff]  ;;  %v6833_v24 = vld [vmem:[#allocation71_spill] sm:$0xff] }
 0xc14   :  { %3189 = vmatpush.msrb.mxu1 %v4215_v42  ;;  %3209 = vmatpush.msrb.mxu0 %v4216_v1  ;;  %v4257_v42 = vld [vmem:[#allocation10 + $0x120] sm:$0xff]  ;;  %v4258_v1 = vld [vmem:[#allocation10 + $0x128] sm:$0xff] }
 0xc15   :  { %3229 = vmatpush.msrb.mxu2 %v4217_v39  ;;  %3249 = vmatpush.msra.mxu3 %v6820_v20  ;;  %v4259_v39 = vld [vmem:[#allocation10 + $0x130] sm:$0xff] }
 0xc16   :  { %3190 = vmatpush.msrb.mxu1 %v4218_v3  ;;  %3210 = vmatpush.msrb.mxu0 %v4219_v12  ;;  %v6834_v20 = vld [vmem:[#allocation72_spill] sm:$0xff]  ;;  %v4260_v3 = vld [vmem:[#allocation10 + $0x100] sm:$0xff]  ;;  %v4261_v12 = vld [vmem:[#allocation10 + $0x108] sm:$0xff] }
 0xc17   :  { %3230 = vmatpush.msrb.mxu2 %v4220_v44  ;;  %3250 = vmatpush.msra.mxu3 %v6821_v49  ;;  %v4262_v44 = vld [vmem:[#allocation10 + $0x110] sm:$0xff]  ;;  %v6835_v49 = vld [vmem:[#allocation73_spill] sm:$0xff] }
 0xc18   :  { %3191 = vmatpush.msrb.mxu1 %v4221_v47  ;;  %3211 = vmatpush.msrb.mxu0 %v4222_v9  ;;  %v4263_v47 = vld [vmem:[#allocation10 + $0xe0] sm:$0xff]  ;;  %v4264_v9 = vld [vmem:[#allocation10 + $0xe8] sm:$0xff] }
 0xc19   :  { %3231 = vmatpush.msrb.mxu2 %v4223_v15  ;;  %3251 = vmatpush.msra.mxu3 %v6822_v52  ;;  %v4265_v15 = vld [vmem:[#allocation10 + $0xf0] sm:$0xff]  ;;  %v6836_v52 = vld [vmem:[#allocation74_spill] sm:$0xff] }
 0xc1a   :  { %3192 = vmatpush.msrb.mxu1 %v4224_v8  ;;  %3212 = vmatpush.msrb.mxu0 %v4225_v22  ;;  %v4266_v8 = vld [vmem:[#allocation10 + $0xc0] sm:$0xff]  ;;  %v4267_v22 = vld [vmem:[#allocation10 + $0xc8] sm:$0xff] }
 0xc1b   :  { %3232 = vmatpush.msrb.mxu2 %v4226_v29  ;;  %3252 = vmatpush.msra.mxu3 %v6823_v37  ;;  %v4268_v29 = vld [vmem:[#allocation10 + $0xd0] sm:$0xff]  ;;  %v6837_v37 = vld [vmem:[#allocation75_spill] sm:$0xff] }
 0xc1c   :  { %3193 = vmatpush.msrb.mxu1 %v4227_v50  ;;  %3213 = vmatpush.msrb.mxu0 %v4228_v54  ;;  %v4269_v50 = vld [vmem:[#allocation10 + $0xa0] sm:$0xff]  ;;  %v4270_v54 = vld [vmem:[#allocation10 + $0xa8] sm:$0xff] }
 0xc1d   :  { %3233 = vmatpush.msrb.mxu2 %v4229_v28  ;;  %3253 = vmatpush.msra.mxu3 %v6824_v5  ;;  %v4271_v28 = vld [vmem:[#allocation10 + $0xb0] sm:$0xff] }
 0xc1e   :  { %3194 = vmatpush.msrb.mxu1 %v4230_v38  ;;  %3214 = vmatpush.msrb.mxu0 %v4231_v7  ;;  %v6838_v5 = vld [vmem:[#allocation76_spill] sm:$0xff]  ;;  %v4272_v38 = vld [vmem:[#allocation10 + $0x80] sm:$0xff]  ;;  %v4273_v7 = vld [vmem:[#allocation10 + $0x88] sm:$0xff] }
 0xc1f   :  { %3234 = vmatpush.msrb.mxu2 %v4232_v33  ;;  %3254 = vmatpush.msra.mxu3 %v6825_v14  ;;  %v4274_v33 = vld [vmem:[#allocation10 + $0x90] sm:$0xff]  ;;  %v6839_v14 = vld [vmem:[#allocation77_spill] sm:$0xff] }
 0xc20   :  { %3195 = vmatpush.msrb.mxu1 %v4233_v16  ;;  %3215 = vmatpush.msrb.mxu0 %v4234_v2  ;;  %v4275_v16 = vld [vmem:[#allocation10 + $0x60] sm:$0xff]  ;;  %v4276_v2 = vld [vmem:[#allocation10 + $0x68] sm:$0xff] }
 0xc21   :  { %3235 = vmatpush.msrb.mxu2 %v4235_v46  ;;  %3255 = vmatpush.msra.mxu3 %v6826_v31  ;;  %v4277_v46 = vld [vmem:[#allocation10 + $0x70] sm:$0xff]  ;;  %v6840_v31 = vld [vmem:[#allocation78_spill] sm:$0xff] }
 0xc22   :  { %3196 = vmatpush.msrb.mxu1 %v4236_v6  ;;  %3216 = vmatpush.msrb.mxu0 %v4237_v51  ;;  %v4278_v6 = vld [vmem:[#allocation10 + $0x40] sm:$0xff]  ;;  %v4279_v51 = vld [vmem:[#allocation10 + $0x48] sm:$0xff] }
 0xc23   :  { %3236 = vmatpush.msrb.mxu2 %v4238_v41  ;;  %3256 = vmatpush.msra.mxu3 %v6827_v55  ;;  %v4280_v41 = vld [vmem:[#allocation10 + $0x50] sm:$0xff]  ;;  %v6841_v55 = vld [vmem:[#allocation79_spill] sm:$0xff] }
 0xc24   :  { %3197 = vmatmul.f32.vlgmr.msrb.gmra.mxu1 %v6235_v4  ;;  %3217 = vmatmul.f32.vlgmr.msrb.gmra.mxu0 %v6235_v4 }
 0xc25   :  { %3237 = vmatmul.f32.vlgmr.msrb.gmra.mxu2 %v6235_v4  ;;  %3257 = vmatmul.f32.vlgmr.msra.gmra.mxu3 %v6235_v4  ;;  %v4247_v4 = vld [vmem:[#allocation10 + $0x1b0] sm:$0xff] }
 0xc26   :  { %3261 = vmatpush.msra.mxu1 %v4239_v26  ;;  %3281 = vmatpush.msra.mxu0 %v4240_v36  ;;  %v4281_v26 = vld [vmem:[#allocation10 + $0x20] sm:$0xff]  ;;  %v4282_v36 = vld [vmem:[#allocation10 + $0x28] sm:$0xff] }
 0xc27   :  { %3301 = vmatpush.msra.mxu2 %v4241_v53  ;;  %3321 = vmatpush.msrb.mxu3 %v6828_v61  ;;  %v4283_v53 = vld [vmem:[#allocation10 + $0x30] sm:$0xff] }
 0xc28   :  { %3262 = vmatpush.msra.mxu1 %v4242_v21  ;;  %3282 = vmatpush.msra.mxu0 %v4243_v62  ;;  %v6842_v61 = vld [vmem:[#allocation80_spill] sm:$0xff]  ;;  %v4284_v21 = vld [vmem:[#allocation10] sm:$0xff]  ;;  %v4285_v62 = vld [vmem:[#allocation10 + $0x8] sm:$0xff] }
 0xc29   :  { %3302 = vmatpush.msra.mxu2 %v4244_v43  ;;  %3322 = vmatpush.msrb.mxu3 %v6829_v58  ;;  %v4286_v43 = vld [vmem:[#allocation10 + $0x10] sm:$0xff]  ;;  %v6843_v58 = vld [vmem:[#allocation81_spill] sm:$0xff] }
 0xc2a   :  { %3263 = vmatpush.msra.mxu1 %v4245_v63  ;;  %3283 = vmatpush.msra.mxu0 %v4246_v23  ;;  %v4287_v63 = vld [vmem:[%s6480_s20 + $0x78] sm:$0xff] }
 0xc2b   :  { %3303 = vmatpush.msra.mxu2 %v4247_v4  ;;  %3323 = vmatpush.msrb.mxu3 %v6830_v35  ;;  %v4288_v23 = vld [vmem:[%s6482_s22 + $0x38] sm:$0xff]  ;;  %v4289_v4 = vld [vmem:[%s6480_s20 + $0x70] sm:$0xff] }
 0xc2c   :  { %3264 = vmatpush.msra.mxu1 %v4248_v13  ;;  %3284 = vmatpush.msra.mxu0 %v4249_v45  ;;  %v4290_v35 = vld [vmem:[%s6482_s22 + $0x30] sm:$0xff]  ;;  %v4291_v13 = vld [vmem:[%s6480_s20 + $0x68] sm:$0xff] }
 0xc2d   :  { %3304 = vmatpush.msra.mxu2 %v4250_v60  ;;  %3324 = vmatpush.msrb.mxu3 %v6831_v19  ;;  %v4292_v45 = vld [vmem:[%s6482_s22 + $0x28] sm:$0xff]  ;;  %v4293_v60 = vld [vmem:[%s6480_s20 + $0x60] sm:$0xff] }
 0xc2e   :  { %3265 = vmatpush.msra.mxu1 %v4251_v34  ;;  %3285 = vmatpush.msra.mxu0 %v4252_v25  ;;  %v4294_v19 = vld [vmem:[%s6482_s22 + $0x20] sm:$0xff]  ;;  %v4295_v34 = vld [vmem:[%s6480_s20 + $0x58] sm:$0xff] }
 0xc2f   :  { %3305 = vmatpush.msra.mxu2 %v4253_v57  ;;  %3325 = vmatpush.msrb.mxu3 %v6832_v18  ;;  %v4296_v25 = vld [vmem:[%s6482_s22 + $0x18] sm:$0xff]  ;;  %v4297_v57 = vld [vmem:[%s6480_s20 + $0x50] sm:$0xff] }
 0xc30   :  { %3266 = vmatpush.msra.mxu1 %v4254_v56  ;;  %3286 = vmatpush.msra.mxu0 %v4255_v32  ;;  %v4298_v18 = vld [vmem:[%s6482_s22 + $0x10] sm:$0xff]  ;;  %v4299_v56 = vld [vmem:[%s6480_s20 + $0x48] sm:$0xff] }
 0xc31   :  { %3306 = vmatpush.msra.mxu2 %v4256_v10  ;;  %3326 = vmatpush.msrb.mxu3 %v6833_v24  ;;  %v4300_v32 = vld [vmem:[%s6482_s22 + $0x8] sm:$0xff]  ;;  %v4301_v10 = vld [vmem:[%s6480_s20 + $0x40] sm:$0xff] }
 0xc32   :  { %3267 = vmatpush.msra.mxu1 %v4257_v42  ;;  %3287 = vmatpush.msra.mxu0 %v4258_v1  ;;  %v4302_v24 = vld [vmem:[%s6482_s22] sm:$0xff]  ;;  %v4303_v42 = vld [vmem:[%s6480_s20 + $0x38] sm:$0xff]  ;;  %v4304_v1 = vld [vmem:[%s6480_s20 + $0x30] sm:$0xff] }
 0xc33   :  { %3307 = vmatpush.msra.mxu2 %v4259_v39  ;;  %3327 = vmatpush.msrb.mxu3 %v6834_v20  ;;  %v4305_v39 = vld [vmem:[%s6480_s20 + $0x28] sm:$0xff]  ;;  %v4306_v20 = vld [vmem:[%s6480_s20 + $0x20] sm:$0xff] }
 0xc34   :  { %3268 = vmatpush.msra.mxu1 %v4260_v3  ;;  %3288 = vmatpush.msra.mxu0 %v4261_v12  ;;  %v4307_v3 = vld [vmem:[%s6480_s20 + $0x18] sm:$0xff]  ;;  %v4308_v12 = vld [vmem:[%s6480_s20 + $0x10] sm:$0xff] }
 0xc35   :  { %3308 = vmatpush.msra.mxu2 %v4262_v44  ;;  %3328 = vmatpush.msrb.mxu3 %v6835_v49  ;;  %v4309_v44 = vld [vmem:[%s6480_s20 + $0x8] sm:$0xff]  ;;  %v4310_v49 = vld [vmem:[%s6480_s20] sm:$0xff] }
 0xc36   :  { %3269 = vmatpush.msra.mxu1 %v4263_v47  ;;  %3289 = vmatpush.msra.mxu0 %v4264_v9  ;;  %v2882_v47 = vpop.f32.mrf.mxu0  ;;  %v2902_v9 = vpop.f32.mrf.mxu3 }
 0xc37   :  { %3309 = vmatpush.msra.mxu2 %v4265_v15  ;;  %3329 = vmatpush.msrb.mxu3 %v6836_v52 }
 0xc38   :  { %3270 = vmatpush.msra.mxu1 %v4266_v8  ;;  %3290 = vmatpush.msra.mxu0 %v4267_v22 }
 0xc39   :  { %3310 = vmatpush.msra.mxu2 %v4268_v29  ;;  %3330 = vmatpush.msrb.mxu3 %v6837_v37 }
 0xc3a   :  { %3271 = vmatpush.msra.mxu1 %v4269_v50  ;;  %3291 = vmatpush.msra.mxu0 %v4270_v54 }
 0xc3b   :  { %3311 = vmatpush.msra.mxu2 %v4271_v28  ;;  %3331 = vmatpush.msrb.mxu3 %v6838_v5 }
 0xc3c   :  { %3272 = vmatpush.msra.mxu1 %v4272_v38  ;;  %3292 = vmatpush.msra.mxu0 %v4273_v7  ;;  %v6844_v7 = vld [vmem:[#allocation29_spill] sm:$0xff] }
 0xc3d   :  { %3312 = vmatpush.msra.mxu2 %v4274_v33  ;;  %3332 = vmatpush.msrb.mxu3 %v6839_v14  ;;  %v6845_v14 = vld [vmem:[#allocation30_spill] sm:$0xff] }
 0xc3e   :  { %3273 = vmatpush.msra.mxu1 %v4275_v16  ;;  %3293 = vmatpush.msra.mxu0 %v4276_v2  ;;  %v2922_v15 = vpop.f32.mrf.mxu0  ;;  %v2942_v52 = vpop.f32.mrf.mxu3 }
 0xc3f   :  { %3313 = vmatpush.msra.mxu2 %v4277_v46  ;;  %3333 = vmatpush.msrb.mxu3 %v6840_v31 }
 0xc40   :  { %3274 = vmatpush.msra.mxu1 %v4278_v6  ;;  %3294 = vmatpush.msra.mxu0 %v4279_v51 }
 0xc41   :  { %3314 = vmatpush.msra.mxu2 %v4280_v41  ;;  %3334 = vmatpush.msrb.mxu3 %v6841_v55 }
 0xc42   :  { %3275 = vmatpush.msra.mxu1 %v4281_v26  ;;  %3295 = vmatpush.msra.mxu0 %v4282_v36 }
 0xc43   :  { %3315 = vmatpush.msra.mxu2 %v4283_v53  ;;  %3335 = vmatpush.msrb.mxu3 %v6842_v61 }
 0xc44   :  { %3276 = vmatpush.msra.mxu1 %v4284_v21  ;;  %3296 = vmatpush.msra.mxu0 %v4285_v62 }
 0xc45   :  { %3316 = vmatpush.msra.mxu2 %v4286_v43  ;;  %3336 = vmatpush.msrb.mxu3 %v6843_v58 }
 0xc46   :  { %3408 = vmatpush.msrb.mxu1 %v4287_v63  ;;  %3440 = vmatpush.msrb.mxu0 %v4288_v23 }
 0xc48   :  { %3409 = vmatpush.msrb.mxu1 %v4289_v4  ;;  %3441 = vmatpush.msrb.mxu0 %v4290_v35 }
 0xc4a   :  { %3410 = vmatpush.msrb.mxu1 %v4291_v13  ;;  %3442 = vmatpush.msrb.mxu0 %v4292_v45 }
 0xc4c   :  { %3411 = vmatpush.msrb.mxu1 %v4293_v60  ;;  %3443 = vmatpush.msrb.mxu0 %v4294_v19 }
 0xc4e   :  { %3412 = vmatpush.msrb.mxu1 %v4295_v34  ;;  %3444 = vmatpush.msrb.mxu0 %v4296_v25 }
 0xc50   :  { %3413 = vmatpush.msrb.mxu1 %v4297_v57  ;;  %3445 = vmatpush.msrb.mxu0 %v4298_v18 }
 0xc52   :  { %3414 = vmatpush.msrb.mxu1 %v4299_v56  ;;  %3446 = vmatpush.msrb.mxu0 %v4300_v32 }
 0xc54   :  { %3415 = vmatpush.msrb.mxu1 %v4301_v10  ;;  %3447 = vmatpush.msrb.mxu0 %v4302_v24 }
 0xc56   :  { %3416 = vmatpush.msrb.mxu1 %v4303_v42 }
 0xc58   :  { %3417 = vmatpush.msrb.mxu1 %v4304_v1 }
 0xc5a   :  { %3418 = vmatpush.msrb.mxu1 %v4305_v39 }
 0xc5c   :  { %3419 = vmatpush.msrb.mxu1 %v4306_v20 }
 0xc5e   :  { %3420 = vmatpush.msrb.mxu1 %v4307_v3 }
 0xc60   :  { %3421 = vmatpush.msrb.mxu1 %v4308_v12 }
 0xc62   :  { %3422 = vmatpush.msrb.mxu1 %v4309_v44 }
 0xc64   :  { %3423 = vmatpush.msrb.mxu1 %v4310_v49 }
 0xc7d   :  { %v2967_v8 = vpop.f32.mrf.mxu1  ;;  %v2987_v22 = vpop.f32.mrf.mxu0 }
 0xc7e   :  { %v2968_v37 = vadd.f32 %v2967_v8, %v2882_v47  ;;  %v2988_v50 = vadd.f32 %v2987_v22, %v2902_v9 }
 0xc84   :  { %v3027_v29 = vpop.f32.mrf.mxu3  ;;  %v3007_v2 = vpop.f32.mrf.mxu2 }
 0xc85   :  { %v3028_v6 = vadd.f32 %v3027_v29, %v2942_v52  ;;  %v3008_v43 = vadd.f32 %v3007_v2, %v2922_v15 }
 0xc87   :  { %v3047_v54 = vpop.f32.mrf.mxu1  ;;  %v3067_v28 = vpop.f32.mrf.mxu0 }
 0xc88   :  { %v3110_v5 = vadd.f32 %v3047_v54, %v2968_v37  ;;  %v3111_v38 = vadd.f32 %v3067_v28, %v2988_v50 }
 0xc8a   :  { %v3114_v33 = vadd.f32 %v3110_v5, %v6844_v7  ;;  %v3115_v16 = vadd.f32 %v3111_v38, %v6845_v14 }
 0xc8c   :  { %v3545_v46 = vmul.f32 -1.442695, %v3114_v33  ;;  %v3546_v31 = vmul.f32 -1.442695, %v3115_v16 }
 0xc8e   :  { %3700 = vpow2.f32 %v3545_v46  ;;  %v3107_v51 = vpop.f32.mrf.mxu3  ;;  %v3087_v62 = vpop.f32.mrf.mxu2 }
 0xc8f   :  { %3702 = vpow2.f32 %v3546_v31  ;;  %v3113_v41 = vadd.f32 %v3107_v51, %v3028_v6  ;;  %v3112_v58 = vadd.f32 %v3087_v62, %v3008_v43 }
 0xc91   :  { %v3117_v55 = vadd.f32 %v3113_v41, %v6783_v40  ;;  %v3116_v35 = vadd.f32 %v3112_v58, %v6784_v27 }
 0xc93   :  { %v3547_v26 = vmul.f32 -1.442695, %v3117_v55 }
 0xc94   :  { %v3701_v36 = vpop.eup %3700 }
 0xc95   :  { %v3703_v53 = vpop.eup %3702  ;;  %v3121_v61 = vadd.f32 1.0, %v3701_v36  ;;  %3704 = vpow2.f32 %v3547_v26 }
 0xc96   :  { %v3140_v21 = vadd.f32 1.0, %v3703_v53 }
 0xc97   :  { %3706 = vrcp.f32 %v3121_v61  ;;  %v3133_v34 = vand.u32 2147483648, %v3121_v61  ;;  %v3131_v18 = vand.u32 2147483647, %v3121_v61  ;;  %vm3127_vm8 = vweird.f32 %v3121_v61 }
 0xc98   :  { %3708 = vrcp.f32 %v3140_v21  ;;  %v3152_v25 = vand.u32 2147483648, %v3140_v21  ;;  %v3150_v32 = vand.u32 2147483647, %v3140_v21  ;;  %vm3146_vm9 = vweird.f32 %v3140_v21 }
 0xc99   :  { %v3134_v27 = vor.u32 1.1754944e-38, %v3133_v34  ;;  %vm3132_vm13 = vcmp.eq.f32.partialorder %v3131_v18, 8.507059e+37 }
 0xc9a   :  { %v3153_v39 = vor.u32 1.1754944e-38, %v3152_v25  ;;  %vm3151_vm14 = vcmp.eq.f32.partialorder %v3150_v32, 8.507059e+37 }
 0xc9b   :  { %v3705_v63 = vpop.eup %3704 }
 0xc9c   :  { %v3160_v23 = vadd.f32 1.0, %v3705_v63 }
 0xc9d   :  { %v3707_v4 = vpop.eup %3706 }
 0xc9e   :  { %v3709_v13 = vpop.eup %3708  ;;  %v3123_v45 = vmul.f32 %v3707_v4, %v3121_v61  ;;  %3710 = vrcp.f32 %v3160_v23  ;;  %vm3128_vm0 = vweird.f32 %v3707_v4  ;;  %v3172_v29 = vand.u32 2147483648, %v3160_v23 }
 0xc9f   :  { %v3142_v40 = vmul.f32 %v3709_v13, %v3140_v21  ;;  %3712 = vtanh.f32 %v3116_v35  ;;  %vm3147_vm1 = vweird.f32 %v3709_v13  ;;  %vm3129_vm10 = vmor %vm3127_vm8, %vm3128_vm0  ;;  %vm3166_vm2 = vweird.f32 %v3160_v23 }
 0xca0   :  { %v3124_v60 = vsub.f32 1.0, %v3123_v45  ;;  %vm3148_vm11 = vmor %vm3146_vm9, %vm3147_vm1  ;;  %v3170_v37 = vand.u32 2147483647, %v3160_v23  ;;  %v3173_v54 = vor.u32 1.1754944e-38, %v3172_v29 }
 0xca1   :  { %v3143_v19 = vsub.f32 1.0, %v3142_v40  ;;  %v3218_v7 = vpop.f32.mrf.mxu0 }
 0xca2   :  { %v3125_v57 = vmul.f32 %v3707_v4, %v3124_v60  ;;  %vm3171_vm4 = vcmp.eq.f32.partialorder %v3170_v37, 8.507059e+37 }
 0xca3   :  { %v3144_v56 = vmul.f32 %v3709_v13, %v3143_v19 }
 0xca4   :  { %v3711_v10 = vpop.eup %3710  ;;  %v3126_v24 = vadd.f32 %v3707_v4, %v3125_v57 }
 0xca5   :  { %v3145_v42 = vadd.f32 %v3709_v13, %v3144_v56  ;;  %v3162_v1 = vmul.f32 %v3711_v10, %v3160_v23  ;;  %v3713_v3 = vpop.eup %3712  ;;  %vm3167_vm15 = vweird.f32 %v3711_v10 }
 0xca6   :  { %v3130_v20 = vsel %vm3129_vm10, %v3707_v4, %v3126_v24  ;;  %vm3168_vm3 = vmor %vm3166_vm2, %vm3167_vm15 }
 0xca7   :  { %v3135_v12 = vsel %vm3132_vm13, %v3134_v27, %v3130_v20  ;;  %v3149_v44 = vsel %vm3148_vm11, %v3709_v13, %v3145_v42  ;;  %v3163_v49 = vsub.f32 1.0, %v3162_v1 }
 0xca8   :  { %v3154_v47 = vsel %vm3151_vm14, %v3153_v39, %v3149_v44  ;;  %v3177_v9 = vmul.f32 %v3713_v3, %v3135_v12  ;;  %v3258_v33 = vpop.f32.mrf.mxu3  ;;  %v3238_v55 = vpop.f32.mrf.mxu2 }
 0xca9   :  { %v3176_v15 = vmul.f32 %v3154_v47, %v6198_v48  ;;  %v3164_v52 = vmul.f32 %v3711_v10, %v3163_v49  ;;  %v3198_v48 = vpop.f32.mrf.mxu1 }
 0xcab   :  { %v3178_v8 = vadd.f32 %v3177_v9, %v3176_v15  ;;  %v3165_v22 = vadd.f32 %v3711_v10, %v3164_v52 }
 0xcad   :  { %3714 = vtanh.f32 %v3178_v8  ;;  %v3169_v50 = vsel %vm3168_vm3, %v3711_v10, %v3165_v22 }
 0xcae   :  { %v3174_v5 = vsel %vm3171_vm4, %v3173_v54, %v3169_v50 }
 0xcb3   :  { %v3715_v28 = vpop.eup %3714 }
 0xcb4   :  { %v3180_v38 = vmul.f32 %v3715_v28, %v3174_v5 }
 0xcb6   :  { %3277 = vmatmul.f32.vlgmr.msra.gmra.mxu1 %v3180_v38  ;;  %3297 = vmatmul.f32.vlgmr.msra.gmra.mxu0 %v3180_v38 }
 0xcb7   :  { %3317 = vmatmul.f32.vlgmr.msra.gmra.mxu2 %v3180_v38  ;;  %3337 = vmatmul.f32.vlgmr.msrb.gmra.mxu3 %v3180_v38 }
 0xd33   :  { %v3278_v14 = vpop.f32.mrf.mxu1  ;;  %v3298_v16 = vpop.f32.mrf.mxu0 }
 0xd34   :  { %v3279_v2 = vadd.f32 %v3278_v14, %v3198_v48  ;;  %v3299_v46 = vadd.f32 %v3298_v16, %v3218_v7 }
 0xd36   :  { %v3341_v31 = vadd.f32 %v3279_v2, %v6702_v0  ;;  %v3342_v6 = vadd.f32 %v3299_v46, %v6703_v59 }
 0xd38   :  { %v3548_v51 = vmul.f32 -1.442695, %v3341_v31  ;;  %v3549_v41 = vmul.f32 -1.442695, %v3342_v6 }
 0xd3a   :  { %3716 = vpow2.f32 %v3548_v51  ;;  %v3338_v26 = vpop.f32.mrf.mxu3  ;;  %v3318_v63 = vpop.f32.mrf.mxu2 }
 0xd3b   :  { %3718 = vpow2.f32 %v3549_v41  ;;  %v3339_v36 = vadd.f32 %v3338_v26, %v3258_v33  ;;  %v3319_v0 = vadd.f32 %v3318_v63, %v3238_v55  ;;  %v4312_v33 = vld [vmem:[%s6483_s23] ss:$0 sm:$0xff] }
 0xd3d   :  { %v3344_v53 = vadd.f32 %v3339_v36, %v6704_v30  ;;  %v3343_v35 = vadd.f32 %v3319_v0, %v6785_v17 }
 0xd3f   :  { %v3550_v61 = vmul.f32 -1.442695, %v3344_v53 }
 0xd40   :  { %v3717_v21 = vpop.eup %3716 }
 0xd41   :  { %v3719_v62 = vpop.eup %3718  ;;  %v3348_v43 = vadd.f32 1.0, %v3717_v21  ;;  %3720 = vpow2.f32 %v3550_v61 }
 0xd42   :  { %v3367_v58 = vadd.f32 1.0, %v3719_v62 }
 0xd43   :  { %3722 = vrcp.f32 %v3348_v43  ;;  %v3360_v19 = vand.u32 2147483648, %v3348_v43  ;;  %v3358_v57 = vand.u32 2147483647, %v3348_v43  ;;  %vm3354_vm7 = vweird.f32 %v3348_v43 }
 0xd44   :  { %3724 = vrcp.f32 %v3367_v58  ;;  %v3379_v34 = vand.u32 2147483648, %v3367_v58  ;;  %v3377_v56 = vand.u32 2147483647, %v3367_v58  ;;  %vm3373_vm0 = vweird.f32 %v3367_v58 }
 0xd45   :  { %v3361_v17 = vor.u32 1.1754944e-38, %v3360_v19  ;;  %vm3359_vm9 = vcmp.eq.f32.partialorder %v3358_v57, 8.507059e+37 }
 0xd46   :  { %v3380_v42 = vor.u32 1.1754944e-38, %v3379_v34  ;;  %vm3378_vm10 = vcmp.eq.f32.partialorder %v3377_v56, 8.507059e+37 }
 0xd47   :  { %v3721_v59 = vpop.eup %3720 }
 0xd48   :  { %v3387_v23 = vadd.f32 1.0, %v3721_v59 }
 0xd49   :  { %v3723_v4 = vpop.eup %3722 }
 0xd4a   :  { %v3725_v13 = vpop.eup %3724  ;;  %v3350_v45 = vmul.f32 %v3723_v4, %v3348_v43  ;;  %3726 = vrcp.f32 %v3387_v23  ;;  %vm3355_vm5 = vweird.f32 %v3723_v4  ;;  %v3399_v8 = vand.u32 2147483648, %v3387_v23 }
 0xd4b   :  { %v3369_v40 = vmul.f32 %v3725_v13, %v3367_v58  ;;  %3728 = vtanh.f32 %v3343_v35  ;;  %vm3374_vm6 = vweird.f32 %v3725_v13  ;;  %vm3356_vm1 = vmor %vm3354_vm7, %vm3355_vm5  ;;  %vm3393_vm13 = vweird.f32 %v3387_v23 }
 0xd4c   :  { %v3351_v30 = vsub.f32 1.0, %v3350_v45  ;;  %vm3375_vm8 = vmor %vm3373_vm0, %vm3374_vm6  ;;  %v3397_v22 = vand.u32 2147483647, %v3387_v23  ;;  %v3400_v37 = vor.u32 1.1754944e-38, %v3399_v8 }
 0xd4d   :  { %v3370_v60 = vsub.f32 1.0, %v3369_v40 }
 0xd4e   :  { %v3352_v25 = vmul.f32 %v3723_v4, %v3351_v30  ;;  %vm3398_vm15 = vcmp.eq.f32.partialorder %v3397_v22, 8.507059e+37 }
 0xd4f   :  { %v3371_v18 = vmul.f32 %v3725_v13, %v3370_v60 }
 0xd50   :  { %v3727_v32 = vpop.eup %3726  ;;  %v3353_v10 = vadd.f32 %v3723_v4, %v3352_v25 }
 0xd51   :  { %v3372_v24 = vadd.f32 %v3725_v13, %v3371_v18  ;;  %v3389_v27 = vmul.f32 %v3727_v32, %v3387_v23  ;;  %v3729_v39 = vpop.eup %3728  ;;  %vm3394_vm11 = vweird.f32 %v3727_v32 }
 0xd52   :  { %v3357_v1 = vsel %vm3356_vm1, %v3723_v4, %v3353_v10  ;;  %vm3395_vm14 = vmor %vm3393_vm13, %vm3394_vm11 }
 0xd53   :  { %v3362_v20 = vsel %vm3359_vm9, %v3361_v17, %v3357_v1  ;;  %v3376_v3 = vsel %vm3375_vm8, %v3725_v13, %v3372_v24  ;;  %v3390_v12 = vsub.f32 1.0, %v3389_v27 }
 0xd54   :  { %v3381_v44 = vsel %vm3378_vm10, %v3380_v42, %v3376_v3  ;;  %v3404_v49 = vmul.f32 %v3729_v39, %v3362_v20 }
 0xd55   :  { %v3403_v47 = vmul.f32 %v3381_v44, %v6232_v11  ;;  %v3391_v9 = vmul.f32 %v3727_v32, %v3390_v12  ;;  %v4311_v11 = vld [vmem:[%s6481_s21] ss:$0 sm:$0xff] }
 0xd57   :  { %v3405_v15 = vadd.f32 %v3404_v49, %v3403_v47  ;;  %v3392_v52 = vadd.f32 %v3727_v32, %v3391_v9 }
 0xd59   :  { %3730 = vtanh.f32 %v3405_v15  ;;  %v3396_v29 = vsel %vm3395_vm14, %v3727_v32, %v3392_v52 }
 0xd5a   :  { %v3401_v54 = vsel %vm3398_vm15, %v3400_v37, %v3396_v29 }
 0xd5f   :  { %v3731_v50 = vpop.eup %3730 }
 0xd60   :  { %v3407_v28 = vmul.f32 %v3731_v50, %v3401_v54 }
 0xd62   :  { %3424 = vmatmul.f32.vlgmr.msrb.gmra.mxu1 %v3407_v28 }
 0xddf   :  { %v3425_v5 = vpop.f32.mrf.mxu1 }
 0xde0   :  { %v3426_v38 = vadd.f32 %v4311_v11, %v3425_v5 }
 0xde2   :  { %v3428_v48 = vmax.f32 %v3426_v38, 0.0 }
 0xde4   :  { %3551 = vmatmul.msk.f32.vlgmr.msrb.gmra.mxu0 %vm1263_vm12, %v3428_v48 }
 0xe61   :  { %v3449_v7 = vpop.f32.mrf.mxu0 }
 0xe62   :  { %v3450_v14 = vadd.f32 %v4312_v33, %v3449_v7 }
 0xe64   :  { %3453 = vst [vmem:[#allocation13 + $0x6] sm:$0x3] %v3450_v14 }
 0xe65   :  { %3466 = dma.vmem_to_hbm [thread:$0]  %s3459_s1, 128, %s3461_s9, [#allocation4], %s4494_s8, %s4494_s8, %s4496_s6  }
 0xe66   :  { %4489 = dma.done.wait [#allocation4], 128  }
 0xe67   :  { %4490 = vsyncadd [#allocation4], 4294967168 }
 0xe68   :  { %3471 = vsyncpa [#allocation3], 1 }
 0xe69   :  { %3472 = vsyncpa [#allocation6], 1 }
 0xe6a   :  { %3473 = vsyncpa [#allocation9], 1 }
 0xe6b   :  { %3474 = vsyncpa [#allocation12], 1 }
 0xe6c   :  { %3475 = vsyncpa [#allocation4], 1 }

</bundles_post_ra>
